<compile_context>
chip_gen: v7x
topology: tpu7x:2x2x1
jax: 0.10.0
libtpu: 0.0.40
codegen_flags: <defaults>
</compile_context>

<pallas_src>
import functools

import jax
import jax.numpy as jnp
from jax import lax
from jax.experimental import pallas as pl
from jax.experimental.pallas import tpu as pltpu

BN_EPS = 1e-5
_VMEM_LIMIT = 48 * 1024 * 1024  # safe on v5e/v6e (128 MiB) and v7x (64 MiB/TC)


def _round_up(x, m):
    return ((x + m - 1) // m) * m


def _m_tiling(M, target=1024):
    """Row tiling for (M, K) matmul slabs: large tiles, >=2 grid steps when
    worthwhile, no host padding (last block may be ragged; writes are masked)."""
    n = max(1, pl.cdiv(M, target))
    if n == 1 and M >= 128:
        n = 2  # give megacore (v7x) two blocks to shard
    tile_m = min(M, _round_up(pl.cdiv(M, n), 16))
    return tile_m, pl.cdiv(M, tile_m)


def _choose_tq(N, B):
    if N <= 512:
        tq = N
    elif N <= 4096:
        tq = 512
    else:
        tq = 256
    if B * pl.cdiv(N, tq) < 2 and N >= 16:
        tq = _round_up(pl.cdiv(N, 2), 8)  # >=2 steps for megacore
    return tq


# ---------------------------------------------------------------------------
# Kernel 1: cv1 (1x1 conv + BN + SiLU) fused with the attention qkv projection.
#   y   = SiLU(x @ w_cv1 + b_cv1)              -> stored (M, 2c) bf16
#   qkv = y[:, c:] @ w_qkv + b_qkv             -> stored (M, 2c) bf16
# The b-half slice happens in VMEM; attention scale is pre-folded into w_qkv/b_qkv.
# ---------------------------------------------------------------------------
def _cv1_qkv_kernel(x_ref, wc_ref, bc_ref, wq_ref, bq_ref, y_ref, qkv_ref, *, c):
    y = jnp.dot(x_ref[...], wc_ref[...], preferred_element_type=jnp.float32)
    y = y + bc_ref[...]
    y = y * jax.nn.sigmoid(y)                      # SiLU
    y_ref[...] = y.astype(y_ref.dtype)
    b_half = y[:, c:].astype(jnp.bfloat16)         # 'b' half, never hits HBM separately
    qkv = jnp.dot(b_half, wq_ref[...], preferred_element_type=jnp.float32)
    qkv_ref[...] = (qkv + bq_ref[...]).astype(qkv_ref.dtype)


def cv1_qkv_fused(x2d, w_cv1, b_cv1, w_qkv, b_qkv, c):
    M, C1 = x2d.shape
    C2 = w_cv1.shape[1]          # 2c
    Hq = w_qkv.shape[1]          # nh * per_head == 2c
    tile_m, n_m = _m_tiling(M)
    flops = 2 * M * (C1 * C2 + c * Hq)
    bytes_accessed = 2 * (M * C1 + M * C2 + M * Hq + C1 * C2 + c * Hq) + 4 * (C2 + Hq)
    return pl.pallas_call(
        functools.partial(_cv1_qkv_kernel, c=c),
        out_shape=(jax.ShapeDtypeStruct((M, C2), jnp.bfloat16),
                   jax.ShapeDtypeStruct((M, Hq), jnp.bfloat16)),
        grid=(n_m,),
        in_specs=[pl.BlockSpec((tile_m, C1), lambda i: (i, 0)),
                  pl.BlockSpec((C1, C2), lambda i: (0, 0)),
                  pl.BlockSpec((1, C2), lambda i: (0, 0)),
                  pl.BlockSpec((c, Hq), lambda i: (0, 0)),
                  pl.BlockSpec((1, Hq), lambda i: (0, 0))],
        out_specs=(pl.BlockSpec((tile_m, C2), lambda i: (i, 0)),
                   pl.BlockSpec((tile_m, Hq), lambda i: (i, 0))),
        compiler_params=pltpu.CompilerParams(
            dimension_semantics=("parallel",), vmem_limit_bytes=_VMEM_LIMIT),
        cost_estimate=pl.CostEstimate(flops=int(flops),
                                      transcendentals=int(M * C2),
                                      bytes_accessed=int(bytes_accessed)),
    )(x2d, w_cv1,
      b_cv1.reshape(1, C2).astype(jnp.float32),
      w_qkv,
      b_qkv.reshape(1, Hq).astype(jnp.float32))


# ---------------------------------------------------------------------------
# Kernel 2: attention.  q/k/v are sliced from the qkv slab in VMEM; heads are
# looped in-kernel (amortizes per-step overhead for PSA's small N / nh).
# Scale is already folded into the q columns of the qkv weights.
# ---------------------------------------------------------------------------
def _attention_kernel(qs_ref, kv_ref, o_ref, *, nh, kd, hd):
    qs = qs_ref[...]          # (1, tq, nh, per_head) bf16
    kv = kv_ref[...]          # (1, N,  nh, per_head) bf16
    for h in range(nh):
        q = qs[0, :, h, :kd]                 # (tq, kd) — already scaled
        k = kv[0, :, h, kd:2 * kd]           # (N,  kd)
        v = kv[0, :, h, 2 * kd:]             # (N,  hd)
        s = jnp.einsum("qd,nd->qn", q, k, preferred_element_type=jnp.float32)
        m = jnp.max(s, axis=-1, keepdims=True)
        p = jnp.exp(s - m)
        p = p * pl.reciprocal(jnp.sum(p, axis=-1, keepdims=True), approx=True)
        o = jnp.einsum("qn,nd->qd", p.astype(v.dtype), v,
                       preferred_element_type=jnp.float32)
        o_ref[0, :, h, :] = o.astype(o_ref.dtype)


def attention_pallas(qkv4, key_dim, head_dim):
    B, N, nh, per_head = qkv4.shape
    hd = head_dim
    tq = _choose_tq(N, B)
    n_q = pl.cdiv(N, tq)
    flops = 2 * B * nh * N * N * (key_dim + hd)
    bytes_accessed = 2 * (B * n_q * N * nh * per_head + B * N * nh * per_head
                          + B * N * nh * hd)
    return pl.pallas_call(
        functools.partial(_attention_kernel, nh=nh, kd=key_dim, hd=hd),
        out_shape=jax.ShapeDtypeStruct((B, N, nh, hd), qkv4.dtype),
        grid=(B, n_q),
        in_specs=[pl.BlockSpec((1, tq, nh, per_head), lambda b, i: (b, i, 0, 0)),
                  pl.BlockSpec((1, N, nh, per_head), lambda b, i: (b, 0, 0, 0))],
        out_specs=pl.BlockSpec((1, tq, nh, hd), lambda b, i: (b, i, 0, 0)),
        compiler_params=pltpu.CompilerParams(
            dimension_semantics=("parallel", "parallel"),
            vmem_limit_bytes=_VMEM_LIMIT),
        cost_estimate=pl.CostEstimate(flops=int(flops),
                                      transcendentals=int(B * nh * N * N),
                                      bytes_accessed=int(bytes_accessed)),
    )(qkv4, qkv4)


# ---------------------------------------------------------------------------
# Kernel 3: depthwise 3x3 conv + BN (no act) with the attention output fused in
# as a residual.  The 3 column (sublane) shifts are hoisted out of the tap loop;
# the bf16 tile is promoted per-tap (no blanket f32 upcast).
# ---------------------------------------------------------------------------
def _dw3x3_kernel(x_ref, w_ref, b_ref, r_ref, o_ref, *, H, W):
    x = x_ref[0]                                       # (H+2, W+2, cb) bf16
    w = w_ref[...]                                     # (9, cb) f32
    acc = b_ref[...] + r_ref[0].astype(jnp.float32)    # (H, W, cb) via broadcast
    cols = [x[:, kw:kw + W, :] for kw in range(3)]     # hoist the sublane shifts
    for kh in range(3):
        for kw in range(3):
            acc = acc + cols[kw][kh:kh + H] * w[kh * 3 + kw]
    o_ref[0] = acc.astype(o_ref.dtype)


def dwconv3x3_bn_addres(x_nhwc, taps, bias, residual, out_dtype=jnp.bfloat16):
    B, H, W, C = x_nhwc.shape
    cb = 128 if C % 128 == 0 else C       # extra parallel axis when channels allow
    xp = jnp.pad(x_nhwc, ((0, 0), (1, 1), (1, 1), (0, 0)))
    bytes_accessed = 2 * (xp.size + residual.size + B * H * W * C) + 4 * taps.size
    return pl.pallas_call(
        functools.partial(_dw3x3_kernel, H=H, W=W),
        out_shape=jax.ShapeDtypeStruct((B, H, W, C), out_dtype),
        grid=(B, C // cb),
        in_specs=[pl.BlockSpec((1, H + 2, W + 2, cb), lambda b, j: (b, 0, 0, j)),
                  pl.BlockSpec((9, cb), lambda b, j: (0, j)),
                  pl.BlockSpec((1, cb), lambda b, j: (0, j)),
                  pl.BlockSpec((1, H, W, cb), lambda b, j: (b, 0, 0, j))],
        out_specs=pl.BlockSpec((1, H, W, cb), lambda b, j: (b, 0, 0, j)),
        compiler_params=pltpu.CompilerParams(
            dimension_semantics=("parallel", "parallel"),
            vmem_limit_bytes=_VMEM_LIMIT),
        cost_estimate=pl.CostEstimate(flops=int(2 * 9 * B * H * W * C),
                                      transcendentals=0,
                                      bytes_accessed=int(bytes_accessed)),
    )(xp, taps, bias.reshape(1, C).astype(jnp.float32), residual)


# ---------------------------------------------------------------------------
# Kernel 4: proj + FFN + cv2 fully fused.
#   t  = pe_att @ w_proj + b_proj + b          (b = b + attn(b))
#   h  = SiLU(t @ w_f1 + b_f1)
#   b2 = h @ w_f2 + b_f2 + t                   (b = b + ffn(b))
#   o  = SiLU(a @ w_cv2a + b2 @ w_cv2b + b_cv2)   == cv2(cat(a, b))
# Intermediates stay in VMEM; only the lane-dense (M, C1) f32 output is stored.
# ---------------------------------------------------------------------------
def _proj_ffn_cv2_kernel(pe_ref, y_ref, wp_ref, wf1_ref, wf2_ref, wa_ref, wb_ref,
                         bp_ref, bf1_ref, bf2_ref, bc2_ref, o_ref, *, c):
    y = y_ref[...]                                  # (tm, 2c) bf16
    a = y[:, :c]                                    # 'a' half (bf16)
    b0 = y[:, c:].astype(jnp.float32)               # 'b' half (f32 residual)

    t = jnp.dot(pe_ref[...], wp_ref[...], preferred_element_type=jnp.float32)
    t = t + bp_ref[...] + b0                        # residual applied AFTER linear proj

    h = jnp.dot(t.astype(jnp.bfloat16), wf1_ref[...],
                preferred_element_type=jnp.float32) + bf1_ref[...]
    h = h * jax.nn.sigmoid(h)                       # SiLU (ffn hidden)

    b2 = jnp.dot(h.astype(jnp.bfloat16), wf2_ref[...],
                 preferred_element_type=jnp.float32) + bf2_ref[...] + t

    o = jnp.dot(a, wa_ref[...], preferred_element_type=jnp.float32)
    o = o + jnp.dot(b2.astype(jnp.bfloat16), wb_ref[...],
                    preferred_element_type=jnp.float32)
    o = o + bc2_ref[...]
    o = o * jax.nn.sigmoid(o)                       # SiLU (cv2)
    o_ref[...] = o.astype(o_ref.dtype)


def proj_ffn_cv2_fused(pe_att, y, w_proj, b_proj, w_f1, b_f1, w_f2, b_f2,
                       w_cv2a, w_cv2b, b_cv2, c, out_dtype=jnp.float32):
    M = pe_att.shape[0]
    C2 = y.shape[1]               # 2c
    cm = w_f1.shape[1]            # 2c
    C1 = w_cv2a.shape[1]
    tile_m, n_m = _m_tiling(M)
    flops = 2 * M * (c * c + c * cm + cm * c + C2 * C1)
    w_bytes = 2 * (c * c + c * cm + cm * c + 2 * c * C1)
    bytes_accessed = 2 * (M * c + M * C2) + 4 * M * C1 + w_bytes
    return pl.pallas_call(
        functools.partial(_proj_ffn_cv2_kernel, c=c),
        out_shape=jax.ShapeDtypeStruct((M, C1), out_dtype),
        grid=(n_m,),
        in_specs=[pl.BlockSpec((tile_m, c), lambda i: (i, 0)),
                  pl.BlockSpec((tile_m, C2), lambda i: (i, 0)),
                  pl.BlockSpec((c, c), lambda i: (0, 0)),
                  pl.BlockSpec((c, cm), lambda i: (0, 0)),
                  pl.BlockSpec((cm, c), lambda i: (0, 0)),
                  pl.BlockSpec((c, C1), lambda i: (0, 0)),
                  pl.BlockSpec((c, C1), lambda i: (0, 0)),
                  pl.BlockSpec((1, c), lambda i: (0, 0)),
                  pl.BlockSpec((1, cm), lambda i: (0, 0)),
                  pl.BlockSpec((1, c), lambda i: (0, 0)),
                  pl.BlockSpec((1, C1), lambda i: (0, 0))],
        out_specs=pl.BlockSpec((tile_m, C1), lambda i: (i, 0)),
        compiler_params=pltpu.CompilerParams(
            dimension_semantics=("parallel",), vmem_limit_bytes=_VMEM_LIMIT),
        cost_estimate=pl.CostEstimate(flops=int(flops),
                                      transcendentals=int(M * (cm + C1)),
                                      bytes_accessed=int(bytes_accessed)),
    )(pe_att, y, w_proj, w_f1, w_f2, w_cv2a, w_cv2b,
      b_proj.reshape(1, c).astype(jnp.float32),
      b_f1.reshape(1, cm).astype(jnp.float32),
      b_f2.reshape(1, c).astype(jnp.float32),
      b_cv2.reshape(1, C1).astype(jnp.float32))


# ---------------------------------------------------------------------------
# Host-side BN folding (scale folded into weights -> bias-only epilogue)
# ---------------------------------------------------------------------------
def fold_bn(p):
    scale = p["gamma"] / jnp.sqrt(p["var"] + BN_EPS)
    bias = p["beta"] - p["mean"] * scale
    return scale, bias


def fold_conv1x1(p, col_scale=None):
    """OIHW (Cout, Cin, 1, 1) + BN -> bf16 (Cin, Cout) weight (BN scale folded),
    f32 bias.  Optional col_scale folds a per-output-channel factor (used to bake
    the attention scale into the q columns of the qkv projection)."""
    scale, bias = fold_bn(p)
    w = p["weight"][:, :, 0, 0] * scale[:, None]            # (Cout, Cin) f32
    if col_scale is not None:
        w = w * col_scale[:, None]
        bias = bias * col_scale
    return w.T.astype(jnp.bfloat16), bias.astype(jnp.float32)


def fold_dw3x3(p):
    """Depthwise OIHW (C, 1, 3, 3) + BN -> f32 (9, C) taps (scale folded), f32 bias."""
    scale, bias = fold_bn(p)
    taps = p["weight"][:, 0, :, :] * scale[:, None, None]   # (C, 3, 3)
    taps = jnp.transpose(taps, (1, 2, 0)).reshape(9, -1)    # row = kh*3 + kw
    return taps.astype(jnp.float32), bias.astype(jnp.float32)


# ---------------------------------------------------------------------------
# PSA forward (Pallas-backed)
# ---------------------------------------------------------------------------
def psa_forward(x_nchw, params, e=0.5):
    B, C1, H, W = x_nchw.shape
    c = int(C1 * e)
    num_heads = c // 64
    assert num_heads >= 1, "PSA requires c1 * e >= 64"
    head_dim = c // num_heads
    key_dim = head_dim // 2                  # attn_ratio = 0.5
    scale = key_dim ** -0.5
    per_head = 2 * key_dim + head_dim
    M, N = B * H * W, H * W

    x2d = jnp.transpose(x_nchw, (0, 2, 3, 1)).reshape(M, C1).astype(jnp.bfloat16)

    # Fold BN into all 1x1 weights; bake the attention scale into qkv's q columns.
    w_cv1, b_cv1 = fold_conv1x1(params["cv1"])
    col = jnp.arange(num_heads * per_head)
    q_col_scale = jnp.where((col % per_head) < key_dim, scale, 1.0).astype(jnp.float32)
    w_qkv, b_qkv = fold_conv1x1(params["attn"]["qkv"], col_scale=q_col_scale)

    # K1: cv1 (+SiLU) and qkv in one kernel; the a/b channel split stays in VMEM.
    y, qkv = cv1_qkv_fused(x2d, w_cv1, b_cv1, w_qkv, b_qkv, c)   # (M,2c), (M,2c)
    qkv4 = qkv.reshape(B, N, num_heads, per_head)                # free reshape

    # K2: attention straight off the qkv slab; output already in NHWC-compatible
    # (B, N, nh, hd) layout -> free reshape below.
    att4 = attention_pallas(qkv4, key_dim, head_dim)             # (B, N, nh, hd)
    att_nhwc = att4.reshape(B, H, W, c)

    # K3: pe = depthwise 3x3 + BN on v, with "+ attention output" fused in.
    v_nhwc = qkv4[..., 2 * key_dim:].reshape(B, H, W, c)
    taps_pe, bias_pe = fold_dw3x3(params["attn"]["pe"])
    pe_plus_att = dwconv3x3_bn_addres(v_nhwc, taps_pe, bias_pe, residual=att_nhwc)

    # K4: proj + both outer residuals + FFN + cv2(cat(a, b)) fused; f32 output.
    w_proj, b_proj = fold_conv1x1(params["attn"]["proj"])
    w_f1, b_f1 = fold_conv1x1(params["ffn"][0])
    w_f2, b_f2 = fold_conv1x1(params["ffn"][1])
    w_cv2, b_cv2 = fold_conv1x1(params["cv2"])
    out2d = proj_ffn_cv2_fused(pe_plus_att.reshape(M, c), y,
                               w_proj, b_proj, w_f1, b_f1, w_f2, b_f2,
                               w_cv2[:c], w_cv2[c:], b_cv2, c,
                               out_dtype=jnp.float32)            # (M, C1) f32

    return jnp.transpose(out2d.reshape(B, H, W, C1), (0, 3, 1, 2))   # NCHW


# ---------------------------------------------------------------------------
# Pure-JAX f32 reference (correctness check only)
# ---------------------------------------------------------------------------
def ref_conv(x, p, k=1, groups=1, act=True):
    pad = k // 2
    y = lax.conv_general_dilated(
        x, p["weight"], (1, 1), [(pad, pad), (pad, pad)],
        dimension_numbers=("NCHW", "OIHW", "NCHW"),
        feature_group_count=groups, precision=lax.Precision.HIGHEST)
    scale, bias = fold_bn(p)
    y = y * scale[None, :, None, None] + bias[None, :, None, None]
    return y * jax.nn.sigmoid(y) if act else y


def ref_attention(x, p, num_heads):
    B, C, H, W = x.shape
    N = H * W
    head_dim = C // num_heads
    key_dim = head_dim // 2
    scale = key_dim ** -0.5
    qkv = ref_conv(x, p["qkv"], act=False).reshape(B, num_heads, 2 * key_dim + head_dim, N)
    q, k, v = qkv[:, :, :key_dim], qkv[:, :, key_dim:2 * key_dim], qkv[:, :, 2 * key_dim:]
    attn = jnp.einsum("bhdn,bhdm->bhnm", q, k, precision=lax.Precision.HIGHEST) * scale
    attn = jax.nn.softmax(attn, axis=-1)
    o = jnp.einsum("bhdm,bhnm->bhdn", v, attn,
                   precision=lax.Precision.HIGHEST).reshape(B, C, H, W)
    o = o + ref_conv(v.reshape(B, C, H, W), p["pe"], k=3, groups=C, act=False)
    return ref_conv(o, p["proj"], act=False)


def ref_psa(x, params, e=0.5):
    C1 = x.shape[1]
    c = int(C1 * e)
    num_heads = c // 64
    y = ref_conv(x, params["cv1"])
    a, b = y[:, :c], y[:, c:]
    b = b + ref_attention(b, params["attn"], num_heads)
    b = b + ref_conv(ref_conv(b, params["ffn"][0]), params["ffn"][1], act=False)
    return ref_conv(jnp.concatenate([a, b], axis=1), params["cv2"])


# ---------------------------------------------------------------------------
# Deterministic parameter construction
# ---------------------------------------------------------------------------
def make_conv_params(key, c_in, c_out, k=1, groups=1):
    kw, kg, kb, km, kv = jax.random.split(key, 5)
    return {
        "weight": 0.1 * jax.random.normal(kw, (c_out, c_in // groups, k, k), jnp.float32),
        "gamma": 1.0 + 0.1 * jax.random.normal(kg, (c_out,), jnp.float32),
        "beta": 0.05 * jax.random.normal(kb, (c_out,), jnp.float32),
        "mean": 0.05 * jax.random.normal(km, (c_out,), jnp.float32),
        "var": 1.0 + 0.1 * jax.random.uniform(kv, (c_out,), jnp.float32),
    }


def make_psa_params(key, c1, e=0.5):
    c = int(c1 * e)
    num_heads = c // 64
    key_dim = (c // num_heads) // 2
    h = c + 2 * num_heads * key_dim
    ks = jax.random.split(key, 7)
    return {
        "cv1": make_conv_params(ks[0], c1, 2 * c, 1),
        "cv2": make_conv_params(ks[1], 2 * c, c1, 1),
        "attn": {
            "qkv": make_conv_params(ks[2], c, h, 1),
            "proj": make_conv_params(ks[3], c, c, 1),
            "pe": make_conv_params(ks[4], c, c, 3, groups=c),
        },
        "ffn": [make_conv_params(ks[5], c, 2 * c, 1),
                make_conv_params(ks[6], 2 * c, c, 1)],
    }


if __name__ == "__main__":
    key = jax.random.PRNGKey(0)
    k_x, k_p = jax.random.split(key)

    # PSA needs c = c1*e to be a multiple of 64 (num_heads = c // 64), so the
    # smallest consistent config is c1 = c2 = 128 (c = 64, 1 head).
    B, C1, H, W = 2, 128, 8, 8
    E = 0.5

    x = jax.random.normal(k_x, (B, C1, H, W), jnp.float32)
    params = make_psa_params(k_p, C1, E)

    fwd = jax.jit(functools.partial(psa_forward, e=E))
    out = jax.block_until_ready(fwd(x, params))
    ref = jax.block_until_ready(ref_psa(x, params, E))

    assert out.shape == (B, C1, H, W), out.shape
    # bf16 operands / bf16 intermediate activations -> bf16-appropriate tolerances.
    rel = jnp.linalg.norm(out - ref) / jnp.linalg.norm(ref)
    assert float(rel) < 3e-2, float(rel)
    assert jnp.allclose(out, ref, atol=1e-1, rtol=1e-1), float(jnp.max(jnp.abs(out - ref)))

    print("KERNEL_OK")
</pallas_src>

<mosaic_0001>
module attributes {stable_mosaic.version = 11 : i64} {
  func.func @_cv1_qkv_kernel(%arg0: i32, %arg1: memref<64x128xbf16, #tpu.memory_space<vmem>>, %arg2: memref<128x128xbf16, #tpu.memory_space<vmem>>, %arg3: memref<1x128xf32, #tpu.memory_space<vmem>>, %arg4: memref<64x128xbf16, #tpu.memory_space<vmem>>, %arg5: memref<1x128xf32, #tpu.memory_space<vmem>>, %arg6: memref<64x128xbf16, #tpu.memory_space<vmem>>, %arg7: memref<64x128xbf16, #tpu.memory_space<vmem>>) attributes {dimension_semantics = [#tpu.dimension_semantics<parallel>], iteration_bounds = array<i64: 2>, scalar_prefetch = 0 : i64, scratch_operands = 0 : i64, tpu.core_type = #tpu.core_type<tc>, window_params = [{transform_indices = @transform_0, window_bounds = array<i64: 64, 128>}, {pipeline_mode = #tpu.pipeline_mode<synchronous>, transform_indices = @transform_1, window_bounds = array<i64: 128, 128>}, {pipeline_mode = #tpu.pipeline_mode<synchronous>, transform_indices = @transform_2, window_bounds = array<i64: 1, 128>}, {pipeline_mode = #tpu.pipeline_mode<synchronous>, transform_indices = @transform_3, window_bounds = array<i64: 64, 128>}, {pipeline_mode = #tpu.pipeline_mode<synchronous>, transform_indices = @transform_4, window_bounds = array<i64: 1, 128>}, {transform_indices = @transform_5, window_bounds = array<i64: 64, 128>}, {transform_indices = @transform_6, window_bounds = array<i64: 64, 128>}]} {
    %c0 = arith.constant 0 : index
    %c0_0 = arith.constant 0 : index
    %0 = vector.load %arg1[%c0, %c0_0] : memref<64x128xbf16, #tpu.memory_space<vmem>>, vector<64x128xbf16>
    %c0_1 = arith.constant 0 : index
    %c0_2 = arith.constant 0 : index
    %1 = vector.load %arg2[%c0_1, %c0_2] : memref<128x128xbf16, #tpu.memory_space<vmem>>, vector<128x128xbf16>
    %cst = arith.constant dense<0.000000e+00> : vector<64x128xf32>
    %2 = tpu.matmul %0, %1, %cst {dimension_numbers = #tpu.dot_dimension_numbers<[1], [0], [0], [1], [0, 0, 1, 1], [], []>} : vector<64x128xbf16>, vector<128x128xbf16>, vector<64x128xf32> -> vector<64x128xf32>
    %c0_3 = arith.constant 0 : index
    %c0_4 = arith.constant 0 : index
    %3 = vector.load %arg3[%c0_3, %c0_4] : memref<1x128xf32, #tpu.memory_space<vmem>>, vector<1x128xf32>
    %4 = vector.broadcast %3 : vector<1x128xf32> to vector<64x128xf32>
    %5 = arith.addf %2, %4 : vector<64x128xf32>
    %6 = arith.negf %5 : vector<64x128xf32>
    %7 = math.exp %6 : vector<64x128xf32>
    %cst_5 = arith.constant 1.000000e+00 : f32
    %8 = vector.broadcast %cst_5 : f32 to vector<64x128xf32>
    %9 = arith.addf %8, %7 : vector<64x128xf32>
    %10 = arith.divf %8, %9 : vector<64x128xf32>
    %11 = arith.mulf %5, %10 : vector<64x128xf32>
    %12 = arith.truncf %11 : vector<64x128xf32> to vector<64x128xbf16>
    %c0_6 = arith.constant 0 : index
    %c0_7 = arith.constant 0 : index
    %13 = vector.load %arg6[%c0_6, %c0_7] : memref<64x128xbf16, #tpu.memory_space<vmem>>, vector<64x128xbf16>
    tpu.vector_store %arg6[%c0_6, %c0_7], %12 {strides = array<i32>} : memref<64x128xbf16, #tpu.memory_space<vmem>>, vector<64x128xbf16>,
    %14 = vector.extract_strided_slice %11 {offsets = [0, 64], sizes = [64, 64], strides = [1, 1]} : vector<64x128xf32> to vector<64x64xf32>
    %15 = arith.truncf %14 : vector<64x64xf32> to vector<64x64xbf16>
    %c0_8 = arith.constant 0 : index
    %c0_9 = arith.constant 0 : index
    %16 = vector.load %arg4[%c0_8, %c0_9] : memref<64x128xbf16, #tpu.memory_space<vmem>>, vector<64x128xbf16>
    %cst_10 = arith.constant dense<0.000000e+00> : vector<64x128xf32>
    %17 = tpu.matmul %15, %16, %cst_10 {dimension_numbers = #tpu.dot_dimension_numbers<[1], [0], [0], [1], [0, 0, 1, 1], [], []>} : vector<64x64xbf16>, vector<64x128xbf16>, vector<64x128xf32> -> vector<64x128xf32>
    %c0_11 = arith.constant 0 : index
    %c0_12 = arith.constant 0 : index
    %18 = vector.load %arg5[%c0_11, %c0_12] : memref<1x128xf32, #tpu.memory_space<vmem>>, vector<1x128xf32>
    %19 = vector.broadcast %18 : vector<1x128xf32> to vector<64x128xf32>
    %20 = arith.addf %17, %19 : vector<64x128xf32>
    %21 = arith.truncf %20 : vector<64x128xf32> to vector<64x128xbf16>
    %c0_13 = arith.constant 0 : index
    %c0_14 = arith.constant 0 : index
    %22 = vector.load %arg7[%c0_13, %c0_14] : memref<64x128xbf16, #tpu.memory_space<vmem>>, vector<64x128xbf16>
    tpu.vector_store %arg7[%c0_13, %c0_14], %21 {strides = array<i32>} : memref<64x128xbf16, #tpu.memory_space<vmem>>, vector<64x128xbf16>,
    return
  }
  func.func @transform_0(%arg0: i32) -> (i32, i32) {
    %c0_i32 = arith.constant 0 : i32
    %c0_i32_0 = arith.constant 0 : i32
    return %arg0, %c0_i32 : i32, i32
  }
  func.func @transform_1(%arg0: i32) -> (i32, i32) {
    %c0_i32 = arith.constant 0 : i32
    %c0_i32_0 = arith.constant 0 : i32
    %c0_i32_1 = arith.constant 0 : i32
    return %c0_i32, %c0_i32_0 : i32, i32
  }
  func.func @transform_2(%arg0: i32) -> (i32, i32) {
    %c0_i32 = arith.constant 0 : i32
    %c0_i32_0 = arith.constant 0 : i32
    %c0_i32_1 = arith.constant 0 : i32
    return %c0_i32, %c0_i32_0 : i32, i32
  }
  func.func @transform_3(%arg0: i32) -> (i32, i32) {
    %c0_i32 = arith.constant 0 : i32
    %c0_i32_0 = arith.constant 0 : i32
    %c0_i32_1 = arith.constant 0 : i32
    return %c0_i32, %c0_i32_0 : i32, i32
  }
  func.func @transform_4(%arg0: i32) -> (i32, i32) {
    %c0_i32 = arith.constant 0 : i32
    %c0_i32_0 = arith.constant 0 : i32
    %c0_i32_1 = arith.constant 0 : i32
    return %c0_i32, %c0_i32_0 : i32, i32
  }
  func.func @transform_5(%arg0: i32) -> (i32, i32) {
    %c0_i32 = arith.constant 0 : i32
    %c0_i32_0 = arith.constant 0 : i32
    return %arg0, %c0_i32 : i32, i32
  }
  func.func @transform_6(%arg0: i32) -> (i32, i32) {
    %c0_i32 = arith.constant 0 : i32
    %c0_i32_0 = arith.constant 0 : i32
    return %arg0, %c0_i32 : i32, i32
  }
}

module attributes {stable_mosaic.version = 11 : i64} {
  func.func @_attention_kernel(%arg0: i32, %arg1: i32, %arg2: memref<1x64x1x128xbf16, #tpu.memory_space<vmem>>, %arg3: memref<1x64x1x128xbf16, #tpu.memory_space<vmem>>, %arg4: memref<1x64x1x64xbf16, #tpu.memory_space<vmem>>) attributes {dimension_semantics = [#tpu.dimension_semantics<parallel>, #tpu.dimension_semantics<parallel>], iteration_bounds = array<i64: 2, 1>, scalar_prefetch = 0 : i64, scratch_operands = 0 : i64, tpu.core_type = #tpu.core_type<tc>, window_params = [{transform_indices = @transform_0, window_bounds = array<i64: 1, 64, 1, 128>}, {transform_indices = @transform_1, window_bounds = array<i64: 1, 64, 1, 128>}, {transform_indices = @transform_2, window_bounds = array<i64: 1, 64, 1, 64>}]} {
    %c0 = arith.constant 0 : index
    %c0_0 = arith.constant 0 : index
    %c0_1 = arith.constant 0 : index
    %c0_2 = arith.constant 0 : index
    %0 = vector.load %arg2[%c0, %c0_0, %c0_1, %c0_2] : memref<1x64x1x128xbf16, #tpu.memory_space<vmem>>, vector<1x64x1x128xbf16>
    %c0_3 = arith.constant 0 : index
    %c0_4 = arith.constant 0 : index
    %c0_5 = arith.constant 0 : index
    %c0_6 = arith.constant 0 : index
    %1 = vector.load %arg3[%c0_3, %c0_4, %c0_5, %c0_6] : memref<1x64x1x128xbf16, #tpu.memory_space<vmem>>, vector<1x64x1x128xbf16>
    %2 = vector.extract_strided_slice %0 {offsets = [0, 0, 0, 0], sizes = [1, 64, 1, 32], strides = [1, 1, 1, 1]} : vector<1x64x1x128xbf16> to vector<1x64x1x32xbf16>
    %3 = vector.shape_cast %2 : vector<1x64x1x32xbf16> to vector<64x32xbf16>
    %4 = vector.extract_strided_slice %1 {offsets = [0, 0, 0, 32], sizes = [1, 64, 1, 32], strides = [1, 1, 1, 1]} : vector<1x64x1x128xbf16> to vector<1x64x1x32xbf16>
    %5 = vector.shape_cast %4 : vector<1x64x1x32xbf16> to vector<64x32xbf16>
    %6 = vector.extract_strided_slice %1 {offsets = [0, 0, 0, 64], sizes = [1, 64, 1, 64], strides = [1, 1, 1, 1]} : vector<1x64x1x128xbf16> to vector<1x64x1x64xbf16>
    %7 = vector.shape_cast %6 : vector<1x64x1x64xbf16> to vector<64x64xbf16>
    "tpu.trace_start"() <{level = 10 : i32, message = "qd,nd->qn"}> : () -> ()
    %cst = arith.constant dense<0.000000e+00> : vector<64x64xf32>
    %8 = tpu.matmul %3, %5, %cst {dimension_numbers = #tpu.dot_dimension_numbers<[1], [1], [0], [0], [0, 0, 1, 0], [], []>} : vector<64x32xbf16>, vector<64x32xbf16>, vector<64x64xf32> -> vector<64x64xf32>
    "tpu.trace_stop"() : () -> ()
    %cst_7 = arith.constant dense<0xFF800000> : vector<64xf32>
    %9 = vector.multi_reduction <maximumf>, %8, %cst_7 [1] : vector<64x64xf32> to vector<64xf32>
    %10 = vector.shape_cast %9 : vector<64xf32> to vector<64x1xf32>
    %11 = vector.broadcast %10 : vector<64x1xf32> to vector<64x64xf32>
    %12 = arith.subf %8, %11 : vector<64x64xf32>
    %13 = math.exp %12 : vector<64x64xf32>
    %cst_8 = arith.constant dense<0.000000e+00> : vector<64xf32>
    %14 = vector.multi_reduction <add>, %13, %cst_8 [1] : vector<64x64xf32> to vector<64xf32>
    %15 = vector.shape_cast %14 : vector<64xf32> to vector<64x1xf32>
    %16 = tpu.reciprocal %15 {approx = true} : vector<64x1xf32> -> vector<64x1xf32>
    %17 = vector.broadcast %16 : vector<64x1xf32> to vector<64x64xf32>
    %18 = arith.mulf %13, %17 : vector<64x64xf32>
    %19 = arith.truncf %18 : vector<64x64xf32> to vector<64x64xbf16>
    "tpu.trace_start"() <{level = 10 : i32, message = "qn,nd->qd"}> : () -> ()
    %cst_9 = arith.constant dense<0.000000e+00> : vector<64x64xf32>
    %20 = tpu.matmul %19, %7, %cst_9 {dimension_numbers = #tpu.dot_dimension_numbers<[1], [0], [0], [1], [0, 0, 1, 1], [], []>} : vector<64x64xbf16>, vector<64x64xbf16>, vector<64x64xf32> -> vector<64x64xf32>
    "tpu.trace_stop"() : () -> ()
    %21 = arith.truncf %20 : vector<64x64xf32> to vector<64x64xbf16>
    %c0_10 = arith.constant 0 : index
    %c0_11 = arith.constant 0 : index
    %c0_12 = arith.constant 0 : index
    %c0_13 = arith.constant 0 : index
    %22 = vector.load %arg4[%c0_10, %c0_11, %c0_12, %c0_13] : memref<1x64x1x64xbf16, #tpu.memory_space<vmem>>, vector<1x64x1x64xbf16>
    %23 = vector.shape_cast %22 : vector<1x64x1x64xbf16> to vector<64x64xbf16>
    %24 = vector.shape_cast %21 : vector<64x64xbf16> to vector<1x64x1x64xbf16>
    tpu.vector_store %arg4[%c0_10, %c0_11, %c0_12, %c0_13], %24 {strides = array<i32>} : memref<1x64x1x64xbf16, #tpu.memory_space<vmem>>, vector<1x64x1x64xbf16>,
    return
  }
  func.func @transform_0(%arg0: i32, %arg1: i32) -> (i32, i32, i32, i32) {
    %c0_i32 = arith.constant 0 : i32
    %c0_i32_0 = arith.constant 0 : i32
    %c0_i32_1 = arith.constant 0 : i32
    return %arg0, %arg1, %c0_i32, %c0_i32_0 : i32, i32, i32, i32
  }
  func.func @transform_1(%arg0: i32, %arg1: i32) -> (i32, i32, i32, i32) {
    %c0_i32 = arith.constant 0 : i32
    %c0_i32_0 = arith.constant 0 : i32
    %c0_i32_1 = arith.constant 0 : i32
    %c0_i32_2 = arith.constant 0 : i32
    return %arg0, %c0_i32, %c0_i32_0, %c0_i32_1 : i32, i32, i32, i32
  }
  func.func @transform_2(%arg0: i32, %arg1: i32) -> (i32, i32, i32, i32) {
    %c0_i32 = arith.constant 0 : i32
    %c0_i32_0 = arith.constant 0 : i32
    %c0_i32_1 = arith.constant 0 : i32
    return %arg0, %arg1, %c0_i32, %c0_i32_0 : i32, i32, i32, i32
  }
}

module attributes {stable_mosaic.version = 11 : i64} {
  func.func @_dw3x3_kernel(%arg0: i32, %arg1: i32, %arg2: memref<1x10x10x64xbf16, #tpu.memory_space<vmem>>, %arg3: memref<9x64xf32, #tpu.memory_space<vmem>>, %arg4: memref<1x64xf32, #tpu.memory_space<vmem>>, %arg5: memref<1x8x8x64xbf16, #tpu.memory_space<vmem>>, %arg6: memref<1x8x8x64xbf16, #tpu.memory_space<vmem>>) attributes {dimension_semantics = [#tpu.dimension_semantics<parallel>, #tpu.dimension_semantics<parallel>], iteration_bounds = array<i64: 2, 1>, scalar_prefetch = 0 : i64, scratch_operands = 0 : i64, tpu.core_type = #tpu.core_type<tc>, window_params = [{transform_indices = @transform_0, window_bounds = array<i64: 1, 10, 10, 64>}, {transform_indices = @transform_1, window_bounds = array<i64: 9, 64>}, {transform_indices = @transform_2, window_bounds = array<i64: 1, 64>}, {transform_indices = @transform_3, window_bounds = array<i64: 1, 8, 8, 64>}, {transform_indices = @transform_4, window_bounds = array<i64: 1, 8, 8, 64>}]} {
    %c0 = arith.constant 0 : index
    %c0_0 = arith.constant 0 : index
    %c0_1 = arith.constant 0 : index
    %c0_2 = arith.constant 0 : index
    %0 = vector.load %arg2[%c0, %c0_0, %c0_1, %c0_2] : memref<1x10x10x64xbf16, #tpu.memory_space<vmem>>, vector<1x10x10x64xbf16>
    %1 = vector.shape_cast %0 : vector<1x10x10x64xbf16> to vector<10x10x64xbf16>
    %c0_3 = arith.constant 0 : index
    %c0_4 = arith.constant 0 : index
    %2 = vector.load %arg3[%c0_3, %c0_4] : memref<9x64xf32, #tpu.memory_space<vmem>>, vector<9x64xf32>
    %c0_5 = arith.constant 0 : index
    %c0_6 = arith.constant 0 : index
    %3 = vector.load %arg4[%c0_5, %c0_6] : memref<1x64xf32, #tpu.memory_space<vmem>>, vector<1x64xf32>
    %c0_7 = arith.constant 0 : index
    %c0_8 = arith.constant 0 : index
    %c0_9 = arith.constant 0 : index
    %c0_10 = arith.constant 0 : index
    %4 = vector.load %arg5[%c0_7, %c0_8, %c0_9, %c0_10] : memref<1x8x8x64xbf16, #tpu.memory_space<vmem>>, vector<1x8x8x64xbf16>
    %5 = vector.shape_cast %4 : vector<1x8x8x64xbf16> to vector<8x8x64xbf16>
    %6 = arith.extf %5 : vector<8x8x64xbf16> to vector<8x8x64xf32>
    %7 = vector.shape_cast %3 : vector<1x64xf32> to vector<1x1x64xf32>
    %8 = vector.broadcast %7 : vector<1x1x64xf32> to vector<8x8x64xf32>
    %9 = arith.addf %8, %6 : vector<8x8x64xf32>
    %10 = vector.extract_strided_slice %1 {offsets = [0, 0, 0], sizes = [10, 8, 64], strides = [1, 1, 1]} : vector<10x10x64xbf16> to vector<10x8x64xbf16>
    %11 = vector.extract_strided_slice %1 {offsets = [0, 1, 0], sizes = [10, 8, 64], strides = [1, 1, 1]} : vector<10x10x64xbf16> to vector<10x8x64xbf16>
    %12 = vector.extract_strided_slice %1 {offsets = [0, 2, 0], sizes = [10, 8, 64], strides = [1, 1, 1]} : vector<10x10x64xbf16> to vector<10x8x64xbf16>
    %13 = vector.extract_strided_slice %10 {offsets = [0, 0, 0], sizes = [8, 8, 64], strides = [1, 1, 1]} : vector<10x8x64xbf16> to vector<8x8x64xbf16>
    %14 = vector.extract_strided_slice %2 {offsets = [0, 0], sizes = [1, 64], strides = [1, 1]} : vector<9x64xf32> to vector<1x64xf32>
    %15 = vector.shape_cast %14 : vector<1x64xf32> to vector<64xf32>
    %16 = arith.extf %13 : vector<8x8x64xbf16> to vector<8x8x64xf32>
    %17 = vector.shape_cast %15 : vector<64xf32> to vector<1x1x64xf32>
    %18 = vector.broadcast %17 : vector<1x1x64xf32> to vector<8x8x64xf32>
    %19 = arith.mulf %16, %18 : vector<8x8x64xf32>
    %20 = arith.addf %9, %19 : vector<8x8x64xf32>
    %21 = vector.extract_strided_slice %11 {offsets = [0, 0, 0], sizes = [8, 8, 64], strides = [1, 1, 1]} : vector<10x8x64xbf16> to vector<8x8x64xbf16>
    %22 = vector.extract_strided_slice %2 {offsets = [1, 0], sizes = [1, 64], strides = [1, 1]} : vector<9x64xf32> to vector<1x64xf32>
    %23 = vector.shape_cast %22 : vector<1x64xf32> to vector<64xf32>
    %24 = arith.extf %21 : vector<8x8x64xbf16> to vector<8x8x64xf32>
    %25 = vector.shape_cast %23 : vector<64xf32> to vector<1x1x64xf32>
    %26 = vector.broadcast %25 : vector<1x1x64xf32> to vector<8x8x64xf32>
    %27 = arith.mulf %24, %26 : vector<8x8x64xf32>
    %28 = arith.addf %20, %27 : vector<8x8x64xf32>
    %29 = vector.extract_strided_slice %12 {offsets = [0, 0, 0], sizes = [8, 8, 64], strides = [1, 1, 1]} : vector<10x8x64xbf16> to vector<8x8x64xbf16>
    %30 = vector.extract_strided_slice %2 {offsets = [2, 0], sizes = [1, 64], strides = [1, 1]} : vector<9x64xf32> to vector<1x64xf32>
    %31 = vector.shape_cast %30 : vector<1x64xf32> to vector<64xf32>
    %32 = arith.extf %29 : vector<8x8x64xbf16> to vector<8x8x64xf32>
    %33 = vector.shape_cast %31 : vector<64xf32> to vector<1x1x64xf32>
    %34 = vector.broadcast %33 : vector<1x1x64xf32> to vector<8x8x64xf32>
    %35 = arith.mulf %32, %34 : vector<8x8x64xf32>
    %36 = arith.addf %28, %35 : vector<8x8x64xf32>
    %37 = vector.extract_strided_slice %10 {offsets = [1, 0, 0], sizes = [8, 8, 64], strides = [1, 1, 1]} : vector<10x8x64xbf16> to vector<8x8x64xbf16>
    %38 = vector.extract_strided_slice %2 {offsets = [3, 0], sizes = [1, 64], strides = [1, 1]} : vector<9x64xf32> to vector<1x64xf32>
    %39 = vector.shape_cast %38 : vector<1x64xf32> to vector<64xf32>
    %40 = arith.extf %37 : vector<8x8x64xbf16> to vector<8x8x64xf32>
    %41 = vector.shape_cast %39 : vector<64xf32> to vector<1x1x64xf32>
    %42 = vector.broadcast %41 : vector<1x1x64xf32> to vector<8x8x64xf32>
    %43 = arith.mulf %40, %42 : vector<8x8x64xf32>
    %44 = arith.addf %36, %43 : vector<8x8x64xf32>
    %45 = vector.extract_strided_slice %11 {offsets = [1, 0, 0], sizes = [8, 8, 64], strides = [1, 1, 1]} : vector<10x8x64xbf16> to vector<8x8x64xbf16>
    %46 = vector.extract_strided_slice %2 {offsets = [4, 0], sizes = [1, 64], strides = [1, 1]} : vector<9x64xf32> to vector<1x64xf32>
    %47 = vector.shape_cast %46 : vector<1x64xf32> to vector<64xf32>
    %48 = arith.extf %45 : vector<8x8x64xbf16> to vector<8x8x64xf32>
    %49 = vector.shape_cast %47 : vector<64xf32> to vector<1x1x64xf32>
    %50 = vector.broadcast %49 : vector<1x1x64xf32> to vector<8x8x64xf32>
    %51 = arith.mulf %48, %50 : vector<8x8x64xf32>
    %52 = arith.addf %44, %51 : vector<8x8x64xf32>
    %53 = vector.extract_strided_slice %12 {offsets = [1, 0, 0], sizes = [8, 8, 64], strides = [1, 1, 1]} : vector<10x8x64xbf16> to vector<8x8x64xbf16>
    %54 = vector.extract_strided_slice %2 {offsets = [5, 0], sizes = [1, 64], strides = [1, 1]} : vector<9x64xf32> to vector<1x64xf32>
    %55 = vector.shape_cast %54 : vector<1x64xf32> to vector<64xf32>
    %56 = arith.extf %53 : vector<8x8x64xbf16> to vector<8x8x64xf32>
    %57 = vector.shape_cast %55 : vector<64xf32> to vector<1x1x64xf32>
    %58 = vector.broadcast %57 : vector<1x1x64xf32> to vector<8x8x64xf32>
    %59 = arith.mulf %56, %58 : vector<8x8x64xf32>
    %60 = arith.addf %52, %59 : vector<8x8x64xf32>
    %61 = vector.extract_strided_slice %10 {offsets = [2, 0, 0], sizes = [8, 8, 64], strides = [1, 1, 1]} : vector<10x8x64xbf16> to vector<8x8x64xbf16>
    %62 = vector.extract_strided_slice %2 {offsets = [6, 0], sizes = [1, 64], strides = [1, 1]} : vector<9x64xf32> to vector<1x64xf32>
    %63 = vector.shape_cast %62 : vector<1x64xf32> to vector<64xf32>
    %64 = arith.extf %61 : vector<8x8x64xbf16> to vector<8x8x64xf32>
    %65 = vector.shape_cast %63 : vector<64xf32> to vector<1x1x64xf32>
    %66 = vector.broadcast %65 : vector<1x1x64xf32> to vector<8x8x64xf32>
    %67 = arith.mulf %64, %66 : vector<8x8x64xf32>
    %68 = arith.addf %60, %67 : vector<8x8x64xf32>
    %69 = vector.extract_strided_slice %11 {offsets = [2, 0, 0], sizes = [8, 8, 64], strides = [1, 1, 1]} : vector<10x8x64xbf16> to vector<8x8x64xbf16>
    %70 = vector.extract_strided_slice %2 {offsets = [7, 0], sizes = [1, 64], strides = [1, 1]} : vector<9x64xf32> to vector<1x64xf32>
    %71 = vector.shape_cast %70 : vector<1x64xf32> to vector<64xf32>
    %72 = arith.extf %69 : vector<8x8x64xbf16> to vector<8x8x64xf32>
    %73 = vector.shape_cast %71 : vector<64xf32> to vector<1x1x64xf32>
    %74 = vector.broadcast %73 : vector<1x1x64xf32> to vector<8x8x64xf32>
    %75 = arith.mulf %72, %74 : vector<8x8x64xf32>
    %76 = arith.addf %68, %75 : vector<8x8x64xf32>
    %77 = vector.extract_strided_slice %12 {offsets = [2, 0, 0], sizes = [8, 8, 64], strides = [1, 1, 1]} : vector<10x8x64xbf16> to vector<8x8x64xbf16>
    %78 = vector.extract_strided_slice %2 {offsets = [8, 0], sizes = [1, 64], strides = [1, 1]} : vector<9x64xf32> to vector<1x64xf32>
    %79 = vector.shape_cast %78 : vector<1x64xf32> to vector<64xf32>
    %80 = arith.extf %77 : vector<8x8x64xbf16> to vector<8x8x64xf32>
    %81 = vector.shape_cast %79 : vector<64xf32> to vector<1x1x64xf32>
    %82 = vector.broadcast %81 : vector<1x1x64xf32> to vector<8x8x64xf32>
    %83 = arith.mulf %80, %82 : vector<8x8x64xf32>
    %84 = arith.addf %76, %83 : vector<8x8x64xf32>
    %85 = arith.truncf %84 : vector<8x8x64xf32> to vector<8x8x64xbf16>
    %c0_11 = arith.constant 0 : index
    %c0_12 = arith.constant 0 : index
    %c0_13 = arith.constant 0 : index
    %c0_14 = arith.constant 0 : index
    %86 = vector.load %arg6[%c0_11, %c0_12, %c0_13, %c0_14] : memref<1x8x8x64xbf16, #tpu.memory_space<vmem>>, vector<1x8x8x64xbf16>
    %87 = vector.shape_cast %86 : vector<1x8x8x64xbf16> to vector<8x8x64xbf16>
    %88 = vector.shape_cast %85 : vector<8x8x64xbf16> to vector<1x8x8x64xbf16>
    tpu.vector_store %arg6[%c0_11, %c0_12, %c0_13, %c0_14], %88 {strides = array<i32>} : memref<1x8x8x64xbf16, #tpu.memory_space<vmem>>, vector<1x8x8x64xbf16>,
    return
  }
  func.func @transform_0(%arg0: i32, %arg1: i32) -> (i32, i32, i32, i32) {
    %c0_i32 = arith.constant 0 : i32
    %c0_i32_0 = arith.constant 0 : i32
    %c0_i32_1 = arith.constant 0 : i32
    return %arg0, %c0_i32, %c0_i32_0, %arg1 : i32, i32, i32, i32
  }
  func.func @transform_1(%arg0: i32, %arg1: i32) -> (i32, i32) {
    %c0_i32 = arith.constant 0 : i32
    %c0_i32_0 = arith.constant 0 : i32
    return %c0_i32, %arg1 : i32, i32
  }
  func.func @transform_2(%arg0: i32, %arg1: i32) -> (i32, i32) {
    %c0_i32 = arith.constant 0 : i32
    %c0_i32_0 = arith.constant 0 : i32
    return %c0_i32, %arg1 : i32, i32
  }
  func.func @transform_3(%arg0: i32, %arg1: i32) -> (i32, i32, i32, i32) {
    %c0_i32 = arith.constant 0 : i32
    %c0_i32_0 = arith.constant 0 : i32
    %c0_i32_1 = arith.constant 0 : i32
    return %arg0, %c0_i32, %c0_i32_0, %arg1 : i32, i32, i32, i32
  }
  func.func @transform_4(%arg0: i32, %arg1: i32) -> (i32, i32, i32, i32) {
    %c0_i32 = arith.constant 0 : i32
    %c0_i32_0 = arith.constant 0 : i32
    %c0_i32_1 = arith.constant 0 : i32
    return %arg0, %c0_i32, %c0_i32_0, %arg1 : i32, i32, i32, i32
  }
}

module attributes {stable_mosaic.version = 11 : i64} {
  func.func @_proj_ffn_cv2_kernel(%arg0: i32, %arg1: memref<64x64xbf16, #tpu.memory_space<vmem>>, %arg2: memref<64x128xbf16, #tpu.memory_space<vmem>>, %arg3: memref<64x64xbf16, #tpu.memory_space<vmem>>, %arg4: memref<64x128xbf16, #tpu.memory_space<vmem>>, %arg5: memref<128x64xbf16, #tpu.memory_space<vmem>>, %arg6: memref<64x128xbf16, #tpu.memory_space<vmem>>, %arg7: memref<64x128xbf16, #tpu.memory_space<vmem>>, %arg8: memref<1x64xf32, #tpu.memory_space<vmem>>, %arg9: memref<1x128xf32, #tpu.memory_space<vmem>>, %arg10: memref<1x64xf32, #tpu.memory_space<vmem>>, %arg11: memref<1x128xf32, #tpu.memory_space<vmem>>, %arg12: memref<64x128xf32, #tpu.memory_space<vmem>>) attributes {dimension_semantics = [#tpu.dimension_semantics<parallel>], iteration_bounds = array<i64: 2>, scalar_prefetch = 0 : i64, scratch_operands = 0 : i64, tpu.core_type = #tpu.core_type<tc>, window_params = [{transform_indices = @transform_0, window_bounds = array<i64: 64, 64>}, {transform_indices = @transform_1, window_bounds = array<i64: 64, 128>}, {pipeline_mode = #tpu.pipeline_mode<synchronous>, transform_indices = @transform_2, window_bounds = array<i64: 64, 64>}, {pipeline_mode = #tpu.pipeline_mode<synchronous>, transform_indices = @transform_3, window_bounds = array<i64: 64, 128>}, {pipeline_mode = #tpu.pipeline_mode<synchronous>, transform_indices = @transform_4, window_bounds = array<i64: 128, 64>}, {pipeline_mode = #tpu.pipeline_mode<synchronous>, transform_indices = @transform_5, window_bounds = array<i64: 64, 128>}, {pipeline_mode = #tpu.pipeline_mode<synchronous>, transform_indices = @transform_6, window_bounds = array<i64: 64, 128>}, {pipeline_mode = #tpu.pipeline_mode<synchronous>, transform_indices = @transform_7, window_bounds = array<i64: 1, 64>}, {pipeline_mode = #tpu.pipeline_mode<synchronous>, transform_indices = @transform_8, window_bounds = array<i64: 1, 128>}, {pipeline_mode = #tpu.pipeline_mode<synchronous>, transform_indices = @transform_9, window_bounds = array<i64: 1, 64>}, {pipeline_mode = #tpu.pipeline_mode<synchronous>, transform_indices = @transform_10, window_bounds = array<i64: 1, 128>}, {transform_indices = @transform_11, window_bounds = array<i64: 64, 128>}]} {
    %c0 = arith.constant 0 : index
    %c0_0 = arith.constant 0 : index
    %0 = vector.load %arg2[%c0, %c0_0] : memref<64x128xbf16, #tpu.memory_space<vmem>>, vector<64x128xbf16>
    %1 = vector.extract_strided_slice %0 {offsets = [0, 0], sizes = [64, 64], strides = [1, 1]} : vector<64x128xbf16> to vector<64x64xbf16>
    %2 = vector.extract_strided_slice %0 {offsets = [0, 64], sizes = [64, 64], strides = [1, 1]} : vector<64x128xbf16> to vector<64x64xbf16>
    %3 = arith.extf %2 : vector<64x64xbf16> to vector<64x64xf32>
    %c0_1 = arith.constant 0 : index
    %c0_2 = arith.constant 0 : index
    %4 = vector.load %arg1[%c0_1, %c0_2] : memref<64x64xbf16, #tpu.memory_space<vmem>>, vector<64x64xbf16>
    %c0_3 = arith.constant 0 : index
    %c0_4 = arith.constant 0 : index
    %5 = vector.load %arg3[%c0_3, %c0_4] : memref<64x64xbf16, #tpu.memory_space<vmem>>, vector<64x64xbf16>
    %cst = arith.constant dense<0.000000e+00> : vector<64x64xf32>
    %6 = tpu.matmul %4, %5, %cst {dimension_numbers = #tpu.dot_dimension_numbers<[1], [0], [0], [1], [0, 0, 1, 1], [], []>} : vector<64x64xbf16>, vector<64x64xbf16>, vector<64x64xf32> -> vector<64x64xf32>
    %c0_5 = arith.constant 0 : index
    %c0_6 = arith.constant 0 : index
    %7 = vector.load %arg8[%c0_5, %c0_6] : memref<1x64xf32, #tpu.memory_space<vmem>>, vector<1x64xf32>
    %8 = vector.broadcast %7 : vector<1x64xf32> to vector<64x64xf32>
    %9 = arith.addf %6, %8 : vector<64x64xf32>
    %10 = arith.addf %9, %3 : vector<64x64xf32>
    %11 = arith.truncf %10 : vector<64x64xf32> to vector<64x64xbf16>
    %c0_7 = arith.constant 0 : index
    %c0_8 = arith.constant 0 : index
    %12 = vector.load %arg4[%c0_7, %c0_8] : memref<64x128xbf16, #tpu.memory_space<vmem>>, vector<64x128xbf16>
    %cst_9 = arith.constant dense<0.000000e+00> : vector<64x128xf32>
    %13 = tpu.matmul %11, %12, %cst_9 {dimension_numbers = #tpu.dot_dimension_numbers<[1], [0], [0], [1], [0, 0, 1, 1], [], []>} : vector<64x64xbf16>, vector<64x128xbf16>, vector<64x128xf32> -> vector<64x128xf32>
    %c0_10 = arith.constant 0 : index
    %c0_11 = arith.constant 0 : index
    %14 = vector.load %arg9[%c0_10, %c0_11] : memref<1x128xf32, #tpu.memory_space<vmem>>, vector<1x128xf32>
    %15 = vector.broadcast %14 : vector<1x128xf32> to vector<64x128xf32>
    %16 = arith.addf %13, %15 : vector<64x128xf32>
    %17 = arith.negf %16 : vector<64x128xf32>
    %18 = math.exp %17 : vector<64x128xf32>
    %cst_12 = arith.constant 1.000000e+00 : f32
    %19 = vector.broadcast %cst_12 : f32 to vector<64x128xf32>
    %20 = arith.addf %19, %18 : vector<64x128xf32>
    %21 = arith.divf %19, %20 : vector<64x128xf32>
    %22 = arith.mulf %16, %21 : vector<64x128xf32>
    %23 = arith.truncf %22 : vector<64x128xf32> to vector<64x128xbf16>
    %c0_13 = arith.constant 0 : index
    %c0_14 = arith.constant 0 : index
    %24 = vector.load %arg5[%c0_13, %c0_14] : memref<128x64xbf16, #tpu.memory_space<vmem>>, vector<128x64xbf16>
    %cst_15 = arith.constant dense<0.000000e+00> : vector<64x64xf32>
    %25 = tpu.matmul %23, %24, %cst_15 {dimension_numbers = #tpu.dot_dimension_numbers<[1], [0], [0], [1], [0, 0, 1, 1], [], []>} : vector<64x128xbf16>, vector<128x64xbf16>, vector<64x64xf32> -> vector<64x64xf32>
    %c0_16 = arith.constant 0 : index
    %c0_17 = arith.constant 0 : index
    %26 = vector.load %arg10[%c0_16, %c0_17] : memref<1x64xf32, #tpu.memory_space<vmem>>, vector<1x64xf32>
    %27 = vector.broadcast %26 : vector<1x64xf32> to vector<64x64xf32>
    %28 = arith.addf %25, %27 : vector<64x64xf32>
    %29 = arith.addf %28, %10 : vector<64x64xf32>
    %c0_18 = arith.constant 0 : index
    %c0_19 = arith.constant 0 : index
    %30 = vector.load %arg6[%c0_18, %c0_19] : memref<64x128xbf16, #tpu.memory_space<vmem>>, vector<64x128xbf16>
    %cst_20 = arith.constant dense<0.000000e+00> : vector<64x128xf32>
    %31 = tpu.matmul %1, %30, %cst_20 {dimension_numbers = #tpu.dot_dimension_numbers<[1], [0], [0], [1], [0, 0, 1, 1], [], []>} : vector<64x64xbf16>, vector<64x128xbf16>, vector<64x128xf32> -> vector<64x128xf32>
    %32 = arith.truncf %29 : vector<64x64xf32> to vector<64x64xbf16>
    %c0_21 = arith.constant 0 : index
    %c0_22 = arith.constant 0 : index
    %33 = vector.load %arg7[%c0_21, %c0_22] : memref<64x128xbf16, #tpu.memory_space<vmem>>, vector<64x128xbf16>
    %cst_23 = arith.constant dense<0.000000e+00> : vector<64x128xf32>
    %34 = tpu.matmul %32, %33, %cst_23 {dimension_numbers = #tpu.dot_dimension_numbers<[1], [0], [0], [1], [0, 0, 1, 1], [], []>} : vector<64x64xbf16>, vector<64x128xbf16>, vector<64x128xf32> -> vector<64x128xf32>
    %35 = arith.addf %31, %34 : vector<64x128xf32>
    %c0_24 = arith.constant 0 : index
    %c0_25 = arith.constant 0 : index
    %36 = vector.load %arg11[%c0_24, %c0_25] : memref<1x128xf32, #tpu.memory_space<vmem>>, vector<1x128xf32>
    %37 = vector.broadcast %36 : vector<1x128xf32> to vector<64x128xf32>
    %38 = arith.addf %35, %37 : vector<64x128xf32>
    %39 = arith.negf %38 : vector<64x128xf32>
    %40 = math.exp %39 : vector<64x128xf32>
    %cst_26 = arith.constant 1.000000e+00 : f32
    %41 = vector.broadcast %cst_26 : f32 to vector<64x128xf32>
    %42 = arith.addf %41, %40 : vector<64x128xf32>
    %43 = arith.divf %41, %42 : vector<64x128xf32>
    %44 = arith.mulf %38, %43 : vector<64x128xf32>
    %c0_27 = arith.constant 0 : index
    %c0_28 = arith.constant 0 : index
    %45 = vector.load %arg12[%c0_27, %c0_28] : memref<64x128xf32, #tpu.memory_space<vmem>>, vector<64x128xf32>
    tpu.vector_store %arg12[%c0_27, %c0_28], %44 {strides = array<i32>} : memref<64x128xf32, #tpu.memory_space<vmem>>, vector<64x128xf32>,
    return
  }
  func.func @transform_0(%arg0: i32) -> (i32, i32) {
    %c0_i32 = arith.constant 0 : i32
    %c0_i32_0 = arith.constant 0 : i32
    return %arg0, %c0_i32 : i32, i32
  }
  func.func @transform_1(%arg0: i32) -> (i32, i32) {
    %c0_i32 = arith.constant 0 : i32
    %c0_i32_0 = arith.constant 0 : i32
    return %arg0, %c0_i32 : i32, i32
  }
  func.func @transform_2(%arg0: i32) -> (i32, i32) {
    %c0_i32 = arith.constant 0 : i32
    %c0_i32_0 = arith.constant 0 : i32
    %c0_i32_1 = arith.constant 0 : i32
    return %c0_i32, %c0_i32_0 : i32, i32
  }
  func.func @transform_3(%arg0: i32) -> (i32, i32) {
    %c0_i32 = arith.constant 0 : i32
    %c0_i32_0 = arith.constant 0 : i32
    %c0_i32_1 = arith.constant 0 : i32
    return %c0_i32, %c0_i32_0 : i32, i32
  }
  func.func @transform_4(%arg0: i32) -> (i32, i32) {
    %c0_i32 = arith.constant 0 : i32
    %c0_i32_0 = arith.constant 0 : i32
    %c0_i32_1 = arith.constant 0 : i32
    return %c0_i32, %c0_i32_0 : i32, i32
  }
  func.func @transform_5(%arg0: i32) -> (i32, i32) {
    %c0_i32 = arith.constant 0 : i32
    %c0_i32_0 = arith.constant 0 : i32
    %c0_i32_1 = arith.constant 0 : i32
    return %c0_i32, %c0_i32_0 : i32, i32
  }
  func.func @transform_6(%arg0: i32) -> (i32, i32) {
    %c0_i32 = arith.constant 0 : i32
    %c0_i32_0 = arith.constant 0 : i32
    %c0_i32_1 = arith.constant 0 : i32
    return %c0_i32, %c0_i32_0 : i32, i32
  }
  func.func @transform_7(%arg0: i32) -> (i32, i32) {
    %c0_i32 = arith.constant 0 : i32
    %c0_i32_0 = arith.constant 0 : i32
    %c0_i32_1 = arith.constant 0 : i32
    return %c0_i32, %c0_i32_0 : i32, i32
  }
  func.func @transform_8(%arg0: i32) -> (i32, i32) {
    %c0_i32 = arith.constant 0 : i32
    %c0_i32_0 = arith.constant 0 : i32
    %c0_i32_1 = arith.constant 0 : i32
    return %c0_i32, %c0_i32_0 : i32, i32
  }
  func.func @transform_9(%arg0: i32) -> (i32, i32) {
    %c0_i32 = arith.constant 0 : i32
    %c0_i32_0 = arith.constant 0 : i32
    %c0_i32_1 = arith.constant 0 : i32
    return %c0_i32, %c0_i32_0 : i32, i32
  }
  func.func @transform_10(%arg0: i32) -> (i32, i32) {
    %c0_i32 = arith.constant 0 : i32
    %c0_i32_0 = arith.constant 0 : i32
    %c0_i32_1 = arith.constant 0 : i32
    return %c0_i32, %c0_i32_0 : i32, i32
  }
  func.func @transform_11(%arg0: i32) -> (i32, i32) {
    %c0_i32 = arith.constant 0 : i32
    %c0_i32_0 = arith.constant 0 : i32
    return %arg0, %c0_i32 : i32, i32
  }
}

</mosaic_0001>

<bundles_post_ra>
// kernel: psa_forward.4
= control target key start
LH: loop header
LB: loop body
LE: loop exit
PB: predicated region body
PF: predicated region fallthrough
CT: control target
= control target key end

     0   :  { %s1071_s21 = smov 0   ;;  %s1138_s0 = inlined_call_operand.vmem [shape: bf16[128,128], index: 0, kind: input, shape index: {}]   ;;  %s1139_s1 = inlined_call_operand.vmem [shape: bf16[128,128], index: 1, kind: input, shape index: {}]   ;;  %s1140_s2 = inlined_call_operand.vmem [shape: f32[1,128], index: 2, kind: input, shape index: {}]   ;;  %s1141_s3 = inlined_call_operand.vmem [shape: bf16[64,128], index: 3, kind: input, shape index: {}]   ;;  %s1142_s4 = inlined_call_operand.vmem [shape: f32[1,128], index: 4, kind: input, shape index: {}]   ;;  %s1143_s5 = inlined_call_operand.vmem [shape: bf16[128,128], index: 5, kind: output, shape index: {0}]   ;;  %s1144_s6 = inlined_call_operand.vmem [shape: bf16[128,128], index: 6, kind: output, shape index: {1}]  }
   0x1 LB: > { %s789_s22 = sadd.s32 4294967295, %s1033_s21   ;;  %p793_p0 = scmp.ge.s32.totalorder %s1033_s21, 1  ;;  %s1033_s21 = sphi %s1071_s21, %s17_s21  }
   0x2   : > { %p216_p1 = scmp.lt.s32.totalorder %s1033_s21, 3 }
   0x4   : > { %p217_p2 = pnand %p793_p0, %p216_p1 }
   0x5   : > { %v979_v0 = vld [vmem:[%s1139_s1] sm:$0xff] (!%p217_p2)   ;;  %s794_s25 = sshll.u32 (!%p217_p2), %s789_s22, 3  ;;  %v980_v1 = vld [vmem:[%s1139_s1 + $0x8] sm:$0xff] (!%p217_p2)   ;;  %v981_v2 = vld [vmem:[%s1139_s1 + $0x10] sm:$0xff] (!%p217_p2)   ;;  %s1035_s11 = smov (!%p217_p2), 64   ;;  %vm581_vm0 = vcmask (!%p217_p2), 523264  }
   0x6   : > { %220 = sbr.rel (%p217_p2) target bundleno = 632 (0x278), region = 40  ;;  %p252_p3 = scmp.lt.s32.totalorder (!%p217_p2), %s794_s25, 15  ;;  %930 = vmatprep.subr.bf16.mxu0 (!%p217_p2), %v979_v0  ;;  %v982_v3 = vld [vmem:[%s1139_s1 + $0x18] sm:$0xff] (!%p217_p2)   ;;  %v983_v5 = vld [vmem:[%s1139_s1 + $0x20] sm:$0xff] (!%p217_p2)   ;;  %v984_v6 = vld [vmem:[%s1139_s1 + $0x28] sm:$0xff] (!%p217_p2)  }
   0x7   : > { %931 = vmatpush3.bf16.msra.mxu0 (!%p217_p2), %v979_v0  ;;  %v985_v7 = vld [vmem:[%s1139_s1 + $0x30] sm:$0xff] (!%p217_p2)   ;;  %v986_v8 = vld [vmem:[%s1139_s1 + $0x38] sm:$0xff] (!%p217_p2)   ;;  %v991_v12 = vld [vmem:[%s1141_s3] sm:$0xff] (!%p217_p2)  }
   0x8   : > { %932 = vmatprep.subr.bf16.mxu0 (!%p217_p2), %v980_v1  ;;  %v992_v13 = vld [vmem:[%s1141_s3 + $0x8] sm:$0xff] (!%p217_p2)   ;;  %954 = vmatprep.subr.bf16.mxu1 (!%p217_p2), %v991_v12  ;;  %v993_v14 = vld [vmem:[%s1141_s3 + $0x10] sm:$0xff] (!%p217_p2)   ;;  %v800_v15 = vld [vmem:[%s1140_s2] ss:$0 sm:$0xff] (!%p217_p2) }
   0x9   : > { %955 = vmatpush3.bf16.msra.mxu1 (!%p217_p2), %v991_v12  ;;  %v994_v48 = vld [vmem:[%s1141_s3 + $0x18] sm:$0xff] (!%p217_p2)  }
   0xa   : > { %956 = vmatprep.subr.bf16.mxu1 (!%p217_p2), %v992_v13 }
   0xb   : > { %933 = vmatpush3.bf16.msra.mxu0 (!%p217_p2), %v980_v1 }
   0xc   : > { %934 = vmatprep.subr.bf16.mxu0 (!%p217_p2), %v981_v2 }
   0xd   : > { %s1146_s25 = smov (!%p252_p3, %s794_s25), 15  ;;  %957 = vmatpush3.bf16.msra.mxu1 %v992_v13 }
   0xe   : > { %s1088_s30 = sshll.u32 %s1146_s25, 2  ;;  %958 = vmatprep.subr.bf16.mxu1 %v993_v14 }
   0xf   : > { %s255_s9 = scalar_lea.vmem %s1138_s0, %s1088_s30  ;;  %935 = vmatpush3.bf16.msra.mxu0 %v981_v2  ;;  %s261_s10 = scalar_lea.vmem %s1143_s5, %s1088_s30 }
  0x10   : > { %v987_v4 = vld [vmem:[%s255_s9] sm:$0xff]   ;;  %936 = vmatprep.subr.bf16.mxu0 %v982_v3  ;;  %v988_v9 = vld [vmem:[%s255_s9 + $0x8] sm:$0xff]   ;;  %v989_v10 = vld [vmem:[%s255_s9 + $0x10] sm:$0xff]   ;;  %s267_s16 = scalar_lea.vmem %s1144_s6, %s1088_s30 }
  0x11   : > { %946 = vmatprep.mubr.bf16.mxu0 %v987_v4  ;;  %v990_v11 = vld [vmem:[%s255_s9 + $0x18] sm:$0xff]   ;;  %959 = vmatpush3.bf16.msra.mxu1 %v993_v14 }
  0x12   : > { %960 = vmatprep.subr.bf16.mxu1 %v994_v48 }
  0x13   : > { %937 = vmatpush3.bf16.msra.mxu0 %v982_v3 }
  0x14   : > { %938 = vmatprep.subr.bf16.mxu0 %v983_v5 }
  0x15   : > { %961 = vmatpush3.bf16.msra.mxu1 %v994_v48 }
  0x17   : > { %939 = vmatpush3.bf16.msra.mxu0 %v983_v5 }
  0x18   : > { %940 = vmatprep.subr.bf16.mxu0 %v984_v6 }
  0x1b   : > { %941 = vmatpush3.bf16.msra.mxu0 %v984_v6 }
  0x1c   : > { %942 = vmatprep.subr.bf16.mxu0 %v985_v7 }
  0x1f   : > { %943 = vmatpush3.bf16.msra.mxu0 %v985_v7 }
  0x20   : > { %944 = vmatprep.subr.bf16.mxu0 %v986_v8 }
  0x23   : > { %945 = vmatpush3.bf16.msra.mxu0 %v986_v8 }
  0x26   : > { %947 = vmatmul.mubr.bf16.vlgmr.msra.gmra.mrb[0].mxu0 %v988_v9 }
  0x27   : > { %950 = vmatprep.mubr.bf16.mxu0 %v989_v10 }
  0x2e   : > { %951 = vmatmul.mubr.bf16.gmra.mrb[4].mxu0 %v990_v11 }
  0xf9   : > { %v948_v16 = vpop.f32.mrb[0].mxu0 }
  0xfa   : > { %v416_v17 = vadd.f32 %v948_v16, %v800_v15  ;;  %v407_v18 = vpop.f32.mrb[1].mxu0 }
  0xfb   : > { %v408_v19 = vadd.f32 %v800_v15, %v407_v18  ;;  %v949_v20 = vpop.f32.mrb[2].mxu0  ;;  %v829_v18 = vld [vmem:[%s1142_s4] ss:$0 sm:$0xff] }
  0xfc   : > { %v815_v21 = vmul.f32 -1.442695, %v416_v17  ;;  %v419_v22 = vadd.f32 %v949_v20, %v800_v15  ;;  %v410_v23 = vpop.f32.mrb[3].mxu0 }
  0xfd   : > { %v813_v24 = vmul.f32 -1.442695, %v408_v19  ;;  %v411_v25 = vadd.f32 %v800_v15, %v410_v23 }
  0xfe   : > { %995 = vpow2.f32 %v815_v21  ;;  %v816_v26 = vmul.f32 -1.442695, %v419_v22 }
  0xff   : > { %997 = vpow2.f32 %v813_v24  ;;  %v814_v27 = vmul.f32 -1.442695, %v411_v25 }
 0x100   : > { %999 = vpow2.f32 %v816_v26 }
 0x101   : > { %1001 = vpow2.f32 %v814_v27  ;;  %v952_v28 = vpop.f32.mrb[4].mxu0 }
 0x102   : > { %v432_v29 = vadd.f32 %v952_v28, %v800_v15  ;;  %v423_v30 = vpop.f32.mrb[5].mxu0 }
 0x103   : > { %v424_v31 = vadd.f32 %v800_v15, %v423_v30  ;;  %v953_v32 = vpop.f32.mrb[6].mxu0 }
 0x104   : > { %v819_v33 = vmul.f32 -1.442695, %v432_v29  ;;  %v435_v34 = vadd.f32 %v953_v32, %v800_v15  ;;  %v426_v35 = vpop.f32.mrb[7].mxu0 }
 0x105   : > { %v817_v36 = vmul.f32 -1.442695, %v424_v31  ;;  %v427_v37 = vadd.f32 %v800_v15, %v426_v35 }
 0x106   : > { %1003 = vpow2.f32 %v819_v33  ;;  %v820_v38 = vmul.f32 -1.442695, %v435_v34 }
 0x107   : > { %1005 = vpow2.f32 %v817_v36  ;;  %v818_v39 = vmul.f32 -1.442695, %v427_v37 }
 0x108   : > { %v996_v40 = vpop.eup %995  ;;  %1007 = vpow2.f32 %v820_v38 }
 0x109   : > { %v998_v41 = vpop.eup %997  ;;  %v464_v42 = vadd.f32 1.0, %v996_v40  ;;  %1009 = vpow2.f32 %v818_v39 }
 0x10a   : > { %v1000_v43 = vpop.eup %999  ;;  %v462_v44 = vadd.f32 1.0, %v998_v41 }
 0x10b   : > { %v1002_v45 = vpop.eup %1001  ;;  %1011 = vrcp.f32 %v464_v42  ;;  %v465_v46 = vadd.f32 1.0, %v1000_v43 }
 0x10c   : > { %1013 = vrcp.f32 %v462_v44  ;;  %v463_v47 = vadd.f32 1.0, %v1002_v45 }
 0x10d   : > { %1015 = vrcp.f32 %v465_v46 }
 0x10e   : > { %1017 = vrcp.f32 %v463_v47 }
 0x110   : > { %v1004_v49 = vpop.eup %1003 }
 0x111   : > { %v1006_v50 = vpop.eup %1005  ;;  %v468_v51 = vadd.f32 1.0, %v1004_v49 }
 0x112   : > { %v1008_v52 = vpop.eup %1007  ;;  %v466_v53 = vadd.f32 1.0, %v1006_v50 }
 0x113   : > { %v1010_v54 = vpop.eup %1009  ;;  %1019 = vrcp.f32 %v468_v51  ;;  %v469_v55 = vadd.f32 1.0, %v1008_v52 }
 0x114   : > { %1021 = vrcp.f32 %v466_v53  ;;  %v467_v56 = vadd.f32 1.0, %v1010_v54 }
 0x115   : > { %v1012_v57 = vpop.eup %1011  ;;  %1023 = vrcp.f32 %v469_v55 }
 0x116   : > { %v1014_v58 = vpop.eup %1013  ;;  %1025 = vrcp.f32 %v467_v56  ;;  %v488_v61 = vmul.f32 %v1012_v57, %v416_v17 }
 0x117   : > { %v1016_v59 = vpop.eup %1015  ;;  %v486_v63 = vmul.f32 %v1014_v58, %v408_v19 }
 0x118   : > { %v1018_v60 = vpop.eup %1017  ;;  %v489_v62 = vmul.f32 %v1016_v59, %v419_v22 }
 0x119   : > { %v487_v0 = vmul.f32 %v1018_v60, %v411_v25 }
 0x11a   : > { %v495_v1 = vpack.c.bf16 %v489_v62, %v488_v61 }
 0x11b   : > { %v494_v2 = vpack.c.bf16 %v487_v0, %v486_v63 }
 0x11c   : > { %904 = vst [vmem:[%s261_s10 + $0x8] sm:$0xff] %v495_v1  }
 0x11d   : > { %v1020_v3 = vpop.eup %1019  ;;  %549 = vrot.lane.b32.xlu0 %v494_v2, %s1035_s11  ;;  %868 = vst [vmem:[%s261_s10] sm:$0xff] %v494_v2  }
 0x11e   : > { %v1022_v4 = vpop.eup %1021  ;;  %v492_v7 = vmul.f32 %v1020_v3, %v432_v29 }
 0x11f   : > { %v1024_v5 = vpop.eup %1023  ;;  %v490_v9 = vmul.f32 %v1022_v4, %v424_v31 }
 0x120   : > { %v1026_v6 = vpop.eup %1025  ;;  %v493_v8 = vmul.f32 %v1024_v5, %v435_v34 }
 0x121   : > { %v491_v10 = vmul.f32 %v1026_v6, %v427_v37  ;;  %551 = vrot.lane.b32.xlu0 %v495_v1, %s1035_s11 }
 0x122   : > { %v497_v11 = vpack.c.bf16 %v493_v8, %v492_v7 }
 0x123   : > { %v496_v12 = vpack.c.bf16 %v491_v10, %v490_v9 }
 0x124   : > { %906 = vst [vmem:[%s261_s10 + $0x18] sm:$0xff] %v497_v11  }
 0x125   : > { %553 = vrot.lane.b32.xlu1 %v496_v12, %s1035_s11  ;;  %905 = vst [vmem:[%s261_s10 + $0x10] sm:$0xff] %v496_v12  }
 0x129   : > { %555 = vrot.lane.b32.xlu1 %v497_v11, %s1035_s11 }
 0x18f   : > { %v550_v13 = vpop.permute.xlu0 %549 }
 0x190   : > { %962 = vmatprep.mubr.msk.bf16.mxu1 %vm581_vm0, %v550_v13 }
 0x193   : > { %v552_v14 = vpop.permute.xlu0 %551 }
 0x194   : > { %963 = vmatmul.mubr.msk.bf16.vlgmr.msra.gmra.mrb[0].mxu1 %vm581_vm0, %v552_v14 }
 0x197   : > { %v554_v15 = vpop.permute.xlu1 %553 }
 0x198   : > { %966 = vmatprep.mubr.msk.bf16.mxu1 %vm581_vm0, %v554_v15 }
 0x19b   : > { %v556_v16 = vpop.permute.xlu1 %555 }
 0x19c   : > { %967 = vmatmul.mubr.msk.bf16.gmra.mrb[4].mxu1 %vm581_vm0, %v556_v16 }
 0x267   : > { %v964_v17 = vpop.f32.mrb[0].mxu1 }
 0x268   : > { %v628_v19 = vpop.f32.mrb[1].mxu1  ;;  %v637_v21 = vadd.f32 %v964_v17, %v829_v18 }
 0x269   : > { %v965_v20 = vpop.f32.mrb[2].mxu1  ;;  %v629_v24 = vadd.f32 %v829_v18, %v628_v19 }
 0x26a   : > { %v640_v22 = vadd.f32 %v965_v20, %v829_v18  ;;  %v631_v23 = vpop.f32.mrb[3].mxu1 }
 0x26b   : > { %v632_v25 = vadd.f32 %v829_v18, %v631_v23 }
 0x26c   : > { %v892_v26 = vpack.c.bf16 %v640_v22, %v637_v21 }
 0x26d   : > { %v887_v27 = vpack.c.bf16 %v632_v25, %v629_v24 }
 0x26e   : > { %907 = vst [vmem:[%s267_s16 + $0x8] sm:$0xff] %v892_v26  }
 0x26f   : > { %888 = vst [vmem:[%s267_s16] sm:$0xff] %v887_v27   ;;  %v968_v28 = vpop.f32.mrb[4].mxu1 }
 0x270   : > { %v644_v29 = vpop.f32.mrb[5].mxu1  ;;  %v653_v31 = vadd.f32 %v968_v28, %v829_v18 }
 0x271   : > { %v969_v30 = vpop.f32.mrb[6].mxu1  ;;  %v645_v34 = vadd.f32 %v829_v18, %v644_v29 }
 0x272   : > { %v656_v32 = vadd.f32 %v969_v30, %v829_v18  ;;  %v647_v33 = vpop.f32.mrb[7].mxu1 }
 0x273   : > { %v648_v35 = vadd.f32 %v829_v18, %v647_v33 }
 0x274   : > { %v902_v36 = vpack.c.bf16 %v656_v32, %v653_v31 }
 0x275   : > { %v897_v37 = vpack.c.bf16 %v648_v35, %v645_v34 }
 0x276   : > { %909 = vst [vmem:[%s267_s16 + $0x18] sm:$0xff] %v902_v36  }
 0x277   : > { %908 = vst [vmem:[%s267_s16 + $0x10] sm:$0xff] %v897_v37  }
 0x278 PF: > { %s17_s21 = sadd.s32 1, %s1033_s21  }
 0x279   : > { %p14_p4 = scmp.ge.s32.totalorder %s17_s21, 4  }
 0x27b   :  { %16 = sbr.rel (!%p14_p4) target bundleno = 1 (0x1), region = 82 }

// kernel: psa_forward.6
= control target key start
LH: loop header
LB: loop body
LE: loop exit
PB: predicated region body
PF: predicated region fallthrough
CT: control target
= control target key end

     0   :  { %s1139_s15 = smov 0   ;;  %s1141_s16 = smov 0   ;;  %s1589_s0 = inlined_call_operand.vmem [shape: bf16[2,10,10,64], index: 0, kind: input, shape index: {}]   ;;  %s1590_s1 = inlined_call_operand.vmem [shape: f32[9,64], index: 1, kind: input, shape index: {}]   ;;  %s1591_s2 = inlined_call_operand.vmem [shape: f32[1,64], index: 2, kind: input, shape index: {}]   ;;  %s1592_s3 = inlined_call_operand.vmem [shape: bf16[2,8,8,64], index: 3, kind: input, shape index: {}]   ;;  %s1593_s4 = inlined_call_operand.vmem [shape: bf16[2,8,8,64], index: 4, kind: output, shape index: {}]  }
   0x1   :  { %s1143_s17 = smov 0  }
   0x2 LB: > { %s26_s18 = sadd.s32 1, %s1108_s16  ;;  %p1034_p0 = scmp.ge.s32.totalorder %s1112_s17, 1  ;;  %s1112_s17 = sphi %s1143_s17, %s14_s17   ;;  %s1108_s16 = sphi %s1141_s16, %s1595_s16   ;;  %s1104_s15 = sphi %s1139_s15, %s1594_s15  }
   0x3   : > { %p28_p1 = scmp.ge.s32.totalorder %s26_s18, 2  ;;  %p213_p2 = scmp.lt.s32.totalorder %s1112_s17, 3 }
   0x5   : > { %s1597_s18 = smov (%p28_p1, %s26_s18), 0  ;;  %p214_p3 = pnand %p1034_p0, %p213_p2 }
   0x6   : > { %p260_p4 = scmp.lt.s32.totalorder (!%p214_p3), %s1104_s15, 1  ;;  %v352_v0 = vlaneseq (!%p214_p3)  ;;  %v1164_v2 = vld [vmem:[%s1590_s1] sm:$0xff] (!%p214_p3)  ;;  %vm416_vm0 = vcmask (!%p214_p3), 1046528   ;;  %vm493_vm1 = vcmask (!%p214_p3), 1045504   ;;  %v1248_v57 = vld [vmem:[%s1590_s1 + $0x8] ss:$0 sm:$0xff] (!%p214_p3) }
   0x7   : > { %217 = sbr.rel (%p214_p3) target bundleno = 124 (0x7c), region = 36  ;;  %v1180_v7 = vld [vmem:[%s1591_s2] ss:$0 sm:$0xff] (!%p214_p3)  ;;  %vm890_vm2 = vcmask (!%p214_p3), 519168  }
   0x8   : > { %v1159_v1 = vshrl.u32 (!%p214_p3), %v352_v0, 7 }
   0xa   : > { %v354_v3 = vsub.s32 (!%p214_p3), 0, %v1159_v1  ;;  %v382_v4 = vsub.s32 (!%p214_p3), 1, %v1159_v1  ;;  %v459_v5 = vsub.s32 (!%p214_p3), 2, %v1159_v1  ;;  %v537_v6 = vsub.s32 (!%p214_p3), 3, %v1159_v1 }
   0xb   : > { %v558_v8 = vsub.s32 (!%p214_p3), 4, %v1159_v1  ;;  %v634_v9 = vsub.s32 (!%p214_p3), 5, %v1159_v1  ;;  %v711_v10 = vsub.s32 (!%p214_p3), 6, %v1159_v1  ;;  %v732_v11 = vsub.s32 (!%p214_p3), 7, %v1159_v1 }
   0xc   : > { %v1198_v15 = vrot.slane (!%p214_p3), %v1164_v2, %v354_v3  ;;  %v1201_v16 = vrot.slane (!%p214_p3), %v1164_v2, %v382_v4  ;;  %v1204_v17 = vrot.slane (!%p214_p3), %v1164_v2, %v459_v5  ;;  %v1207_v18 = vrot.slane (!%p214_p3), %v1164_v2, %v537_v6 }
   0xd   : > { %v1234_v44 = vrot.slane (!%p214_p3), %v1164_v2, %v558_v8  ;;  %v1239_v48 = vrot.slane (!%p214_p3), %v1164_v2, %v634_v9  ;;  %v1251_v60 = vrot.slane (!%p214_p3), %v1164_v2, %v711_v10  ;;  %v1254_v61 = vrot.slane (!%p214_p3), %v1164_v2, %v732_v11 }
   0xe   : > { %s1599_s15 = smov (!%p260_p4, %s1104_s15), 1 }
   0xf   : > { %s1065_s21 = smul.u32 80, %s1599_s15  ;;  %s1044_s22 = sshll.u32 %s1599_s15, 5 }
  0x10   : > { %s282_s25 = scalar_lea.vmem %s1592_s3, %s1044_s22  ;;  %s1317_s9 = scalar_lea.vmem %s1593_s4, %s1044_s22 }
  0x11   : > { %s1189_s30 = scalar_lea.vmem %s1589_s0, %s1065_s21  ;;  %v1191_v12 = vld [vmem:[%s282_s25] sm:$0xff]   ;;  %v1193_v13 = vld [vmem:[%s282_s25 + $0x8] sm:$0xff]   ;;  %v1195_v14 = vld [vmem:[%s282_s25 + $0x10] sm:$0xff]  }
  0x12   : > { %v291_v19 = vld [vmem:[%s1189_s30] ss:$8 sps:$4 sm:$0xff]   ;;  %v292_v20 = vld [vmem:[%s1189_s30 + $0x4] sm:$0x1]  ;;  %v294_v21 = vld [vmem:[%s1189_s30 + $0xc] sm:$0x1]  ;;  %v1048_v22 = vunpack.c.l.bf16 %v1191_v12  ;;  %v1049_v23 = vunpack.c.h.bf16 %v1191_v12  ;;  %v1052_v24 = vunpack.c.l.bf16 %v1193_v13  ;;  %v1053_v25 = vunpack.c.h.bf16 %v1193_v13 }
  0x13   : > { %v295_v26 = vld [vmem:[%s1189_s30 + $0x10] ss:$8 sps:$4 sm:$0xff]   ;;  %v296_v27 = vld [vmem:[%s1189_s30 + $0x14] sm:$0x1]  ;;  %v1056_v28 = vunpack.c.l.bf16 %v1195_v14  ;;  %v1057_v29 = vunpack.c.h.bf16 %v1195_v14  ;;  %v344_v31 = vunpack.c.l.bf16 %v291_v19  ;;  %v345_v32 = vunpack.c.h.bf16 %v291_v19  ;;  %v298_v11 = vld [vmem:[%s1189_s30 + $0x1c] sm:$0x1] }
  0x14   : > { %v1220_v30 = vld [vmem:[%s282_s25 + $0x18] sm:$0xff]   ;;  %v336_v35 = vadd.f32 %v1048_v22, %v1180_v7  ;;  %v1225_v36 = vunpack.c.l.bf16 %v295_v26  ;;  %v372_v38 = vunpack.c.l.bf16 %v292_v20  ;;  %v373_v39 = vunpack.c.l.bf16 %v294_v21 }
  0x15   : > { %v1060_v33 = vunpack.c.l.bf16 %v1220_v30  ;;  %v1061_v34 = vunpack.c.h.bf16 %v1220_v30  ;;  %v356_v37 = vmul.f32 %v1198_v15, %v344_v31  ;;  %v1228_v40 = vunpack.c.l.bf16 %v296_v27 }
  0x16   : > { %v384_v41 = vmul.f32 %v1201_v16, %v344_v31  ;;  %v461_v42 = vmul.f32 %v1204_v17, %v344_v31  ;;  %v539_v43 = vmul.f32 %v1207_v18, %v345_v32  ;;  %v385_v46 = vmul.f32 %v1201_v16, %v372_v38 }
  0x17   : > { %v364_v45 = vadd.f32 %v356_v37, %v336_v35  ;;  %v462_v47 = vmul.f32 %v1204_v17, %v372_v38  ;;  %v560_v51 = vmul.f32 %v1234_v44, %v345_v32  ;;  %v561_v52 = vmul.f32 %v1234_v44, %v373_v39 }
  0x18   : > { %v417_v49 = vrot.slane %v384_v41, 1  ;;  %v494_v50 = vrot.slane %v461_v42, 2  ;;  %v418_v53 = vrot.slane %v385_v46, 1  ;;  %v636_v55 = vmul.f32 %v1239_v48, %v345_v32 }
  0x19   : > { %v495_v54 = vrot.slane %v462_v47, 2  ;;  %v637_v56 = vmul.f32 %v1239_v48, %v373_v39  ;;  %v592_v58 = vrot.slane %v560_v51, 1  ;;  %v593_v59 = vrot.slane %v561_v52, 1 }
  0x1a   : > { %v419_v62 = vsel %vm416_vm0, %v417_v49, %v418_v53  ;;  %v668_v0 = vrot.slane %v636_v55, 2  ;;  %v713_v5 = vmul.f32 %v1251_v60, %v1225_v36  ;;  %v734_v6 = vmul.f32 %v1254_v61, %v1225_v36 }
  0x1b   : > { %v496_v63 = vsel %vm493_vm1, %v494_v50, %v495_v54  ;;  %v669_v1 = vrot.slane %v637_v56, 2  ;;  %v449_v3 = vadd.f32 %v419_v62, %v364_v45  ;;  %v594_v4 = vsel %vm416_vm0, %v592_v58, %v593_v59 }
  0x1c   : > { %v735_v2 = vmul.f32 %v1254_v61, %v1228_v40  ;;  %v810_v9 = vmul.f32 %v1248_v57, %v1225_v36  ;;  %v811_v10 = vmul.f32 %v1248_v57, %v1228_v40  ;;  %v766_v19 = vrot.slane %v734_v6, 1 }
  0x1d   : > { %v670_v8 = vsel %vm493_vm1, %v668_v0, %v669_v1  ;;  %v526_v12 = vadd.f32 %v496_v63, %v449_v3  ;;  %v337_v20 = vadd.f32 %v1049_v23, %v1180_v7  ;;  %v1272_v21 = vunpack.c.h.bf16 %v295_v26 }
  0x1e   : > { %v767_v22 = vrot.slane %v735_v2, 1  ;;  %v842_v27 = vrot.slane %v810_v9, 2  ;;  %v843_v31 = vrot.slane %v811_v10, 2  ;;  %v357_v35 = vmul.f32 %v1198_v15, %v345_v32 }
  0x1f   : > { %v547_v37 = vadd.f32 %v539_v43, %v526_v12  ;;  %v1275_v38 = vunpack.c.l.bf16 %v298_v11  ;;  %v386_v41 = vmul.f32 %v1201_v16, %v345_v32  ;;  %v387_v42 = vmul.f32 %v1201_v16, %v373_v39 }
  0x20   : > { %v768_v45 = vsel %vm416_vm0, %v766_v19, %v767_v22  ;;  %v844_v46 = vsel %vm493_vm1, %v842_v27, %v843_v31  ;;  %v365_v47 = vadd.f32 %v357_v35, %v337_v20  ;;  %v463_v23 = vmul.f32 %v1204_v17, %v345_v32  ;;  %v299_v19 = vld [vmem:[%s1189_s30 + $0x20] ss:$8 sps:$4 sm:$0xff]   ;;  %v300_v20 = vld [vmem:[%s1189_s30 + $0x24] sm:$0x1] }
  0x21   : > { %v624_v26 = vadd.f32 %v594_v4, %v547_v37  ;;  %v420_v49 = vrot.slane %v386_v41, 1  ;;  %v421_v50 = vrot.slane %v387_v42, 1  ;;  %v464_v51 = vmul.f32 %v1204_v17, %v373_v39 }
  0x22   : > { %v497_v43 = vrot.slane %v463_v23, 2  ;;  %v540_v52 = vmul.f32 %v1207_v18, %v1225_v36  ;;  %v562_v53 = vmul.f32 %v1234_v44, %v1225_v36  ;;  %v563_v54 = vmul.f32 %v1234_v44, %v1228_v40 }
  0x23   : > { %v700_v55 = vadd.f32 %v670_v8, %v624_v26  ;;  %v422_v56 = vsel %vm416_vm0, %v420_v49, %v421_v50  ;;  %v498_v32 = vrot.slane %v464_v51, 2  ;;  %v638_v58 = vmul.f32 %v1239_v48, %v1225_v36 }
  0x24   : > { %v450_v59 = vadd.f32 %v422_v56, %v365_v47  ;;  %v595_v39 = vrot.slane %v562_v53, 1  ;;  %v596_v62 = vrot.slane %v563_v54, 1  ;;  %v639_v63 = vmul.f32 %v1239_v48, %v1228_v40 }
  0x25   : > { %v721_v0 = vadd.f32 %v713_v5, %v700_v55  ;;  %v499_v1 = vsel %vm493_vm1, %v497_v43, %v498_v32  ;;  %v671_v3 = vrot.slane %v638_v58, 2  ;;  %v714_v4 = vmul.f32 %v1251_v60, %v1272_v21 }
  0x26   : > { %v527_v6 = vadd.f32 %v499_v1, %v450_v59  ;;  %v597_v8 = vsel %vm416_vm0, %v595_v39, %v596_v62  ;;  %v672_v2 = vrot.slane %v639_v63, 2  ;;  %v736_v9 = vmul.f32 %v1254_v61, %v1272_v21 }
  0x27   : > { %v798_v10 = vadd.f32 %v768_v45, %v721_v0  ;;  %v737_v11 = vmul.f32 %v1254_v61, %v1275_v38  ;;  %v812_v5 = vmul.f32 %v1248_v57, %v1272_v21  ;;  %v813_v12 = vmul.f32 %v1248_v57, %v1275_v38 }
  0x28   : > { %v548_v22 = vadd.f32 %v540_v52, %v527_v6  ;;  %v673_v27 = vsel %vm493_vm1, %v671_v3, %v672_v2  ;;  %v769_v31 = vrot.slane %v736_v9, 1  ;;  %v338_v35 = vadd.f32 %v1052_v24, %v1180_v7 }
  0x29   : > { %v874_v37 = vadd.f32 %v844_v46, %v798_v10  ;;  %v770_v41 = vrot.slane %v737_v11, 1  ;;  %v845_v42 = vrot.slane %v812_v5, 2  ;;  %v846_v45 = vrot.slane %v813_v12, 2 }
  0x2a   : > { %v625_v47 = vadd.f32 %v597_v8, %v548_v22  ;;  %v1319_v23 = vunpack.c.l.bf16 %v299_v19  ;;  %v358_v26 = vmul.f32 %v1198_v15, %v1225_v36  ;;  %v1323_v49 = vunpack.c.l.bf16 %v300_v20 }
  0x2b   : > { %v882_v24 = vpack.c.bf16 %v874_v37, %v874_v37  ;;  %v771_v46 = vsel %vm416_vm0, %v769_v31, %v770_v41  ;;  %v847_v50 = vsel %vm493_vm1, %v845_v42, %v846_v45  ;;  %v388_v51 = vmul.f32 %v1201_v16, %v1225_v36  ;;  %v302_v41 = vld [vmem:[%s1189_s30 + $0x2c] sm:$0x1] }
  0x2c   : > { %v701_v43 = vadd.f32 %v673_v27, %v625_v47  ;;  %v366_v52 = vadd.f32 %v358_v26, %v338_v35  ;;  %v389_v53 = vmul.f32 %v1201_v16, %v1228_v40  ;;  %v465_v54 = vmul.f32 %v1204_v17, %v1225_v36 }
  0x2d   : > { %891 = vst.msk [vmem:[%s1317_s9] sm:$0xf] %vm890_vm2, %v882_v24  ;;  %v423_v55 = vrot.slane %v388_v51, 1  ;;  %v466_v56 = vmul.f32 %v1204_v17, %v1228_v40  ;;  %v541_v32 = vmul.f32 %v1207_v18, %v1272_v21  ;;  %v564_v58 = vmul.f32 %v1234_v44, %v1272_v21 }
  0x2e   : > { %v722_v59 = vadd.f32 %v714_v4, %v701_v43  ;;  %v424_v39 = vrot.slane %v389_v53, 1  ;;  %v500_v62 = vrot.slane %v465_v54, 2  ;;  %v565_v63 = vmul.f32 %v1234_v44, %v1275_v38 }
  0x2f   : > { %v501_v0 = vrot.slane %v466_v56, 2  ;;  %v598_v36 = vrot.slane %v564_v58, 1  ;;  %v640_v1 = vmul.f32 %v1239_v48, %v1272_v21  ;;  %v641_v40 = vmul.f32 %v1239_v48, %v1275_v38 }
  0x30   : > { %v799_v3 = vadd.f32 %v771_v46, %v722_v59  ;;  %v425_v6 = vsel %vm416_vm0, %v423_v55, %v424_v39  ;;  %v599_v8 = vrot.slane %v565_v63, 1  ;;  %v715_v4 = vmul.f32 %v1251_v60, %v1319_v23 }
  0x31   : > { %v451_v2 = vadd.f32 %v425_v6, %v366_v52  ;;  %v502_v9 = vsel %vm493_vm1, %v500_v62, %v501_v0  ;;  %v674_v10 = vrot.slane %v640_v1, 2  ;;  %v675_v11 = vrot.slane %v641_v40, 2 }
  0x32   : > { %v875_v5 = vadd.f32 %v847_v50, %v799_v3  ;;  %v600_v12 = vsel %vm416_vm0, %v598_v36, %v599_v8  ;;  %v738_v20 = vmul.f32 %v1254_v61, %v1319_v23  ;;  %v739_v22 = vmul.f32 %v1254_v61, %v1323_v49 }
  0x33   : > { %v528_v27 = vadd.f32 %v502_v9, %v451_v2  ;;  %v676_v31 = vsel %vm493_vm1, %v674_v10, %v675_v11  ;;  %v814_v35 = vmul.f32 %v1248_v57, %v1319_v23  ;;  %v815_v37 = vmul.f32 %v1248_v57, %v1323_v49 }
  0x34   : > { %v883_v42 = vpack.c.bf16 %v875_v5, %v875_v5  ;;  %v772_v45 = vrot.slane %v738_v20, 1  ;;  %v773_v47 = vrot.slane %v739_v22, 1  ;;  %v339_v26 = vadd.f32 %v1053_v25, %v1180_v7 }
  0x35   : > { %v549_v24 = vadd.f32 %v541_v32, %v528_v27  ;;  %v848_v46 = vrot.slane %v814_v35, 2  ;;  %v849_v50 = vrot.slane %v815_v37, 2  ;;  %v1365_v51 = vunpack.c.h.bf16 %v299_v19  ;;  %v303_v37 = vld [vmem:[%s1189_s30 + $0x30] ss:$8 sps:$4 sm:$0xff]  }
  0x36   : > { %892 = vst.msk [vmem:[%s1317_s9 + $0x4] sm:$0xf] %vm890_vm2, %v883_v42  ;;  %v774_v43 = vsel %vm416_vm0, %v772_v45, %v773_v47  ;;  %v359_v52 = vmul.f32 %v1198_v15, %v1272_v21  ;;  %v1372_v53 = vunpack.c.l.bf16 %v302_v41  ;;  %v390_v54 = vmul.f32 %v1201_v16, %v1272_v21 }
  0x37   : > { %v626_v55 = vadd.f32 %v600_v12, %v549_v24  ;;  %v850_v13 = vsel %vm493_vm1, %v848_v46, %v849_v50  ;;  %v391_v25 = vmul.f32 %v1201_v16, %v1275_v38  ;;  %v467_v19 = vmul.f32 %v1204_v17, %v1272_v21 }
  0x38   : > { %v367_v56 = vadd.f32 %v359_v52, %v339_v26  ;;  %v426_v32 = vrot.slane %v390_v54, 1  ;;  %v468_v58 = vmul.f32 %v1204_v17, %v1275_v38  ;;  %v542_v59 = vmul.f32 %v1207_v18, %v1319_v23  ;;  %v304_v26 = vld [vmem:[%s1189_s30 + $0x34] sm:$0x1] }
  0x39   : > { %v702_v39 = vadd.f32 %v676_v31, %v626_v55  ;;  %v427_v62 = vrot.slane %v391_v25, 1  ;;  %v503_v63 = vrot.slane %v467_v19, 2  ;;  %v566_v0 = vmul.f32 %v1234_v44, %v1319_v23 }
  0x3a   : > { %v504_v36 = vrot.slane %v468_v58, 2  ;;  %v567_v1 = vmul.f32 %v1234_v44, %v1323_v49  ;;  %v642_v21 = vmul.f32 %v1239_v48, %v1319_v23  ;;  %v643_v40 = vmul.f32 %v1239_v48, %v1323_v49 }
  0x3b   : > { %v723_v38 = vadd.f32 %v715_v4, %v702_v39  ;;  %v428_v3 = vsel %vm416_vm0, %v426_v32, %v427_v62  ;;  %v601_v6 = vrot.slane %v566_v0, 1  ;;  %v716_v8 = vmul.f32 %v1251_v60, %v1365_v51 }
  0x3c   : > { %v452_v2 = vadd.f32 %v428_v3, %v367_v56  ;;  %v505_v9 = vsel %vm493_vm1, %v503_v63, %v504_v36  ;;  %v602_v10 = vrot.slane %v567_v1, 1  ;;  %v677_v11 = vrot.slane %v642_v21, 2 }
  0x3d   : > { %v800_v5 = vadd.f32 %v774_v43, %v723_v38  ;;  %v678_v12 = vrot.slane %v643_v40, 2  ;;  %v740_v20 = vmul.f32 %v1254_v61, %v1365_v51  ;;  %v741_v4 = vmul.f32 %v1254_v61, %v1372_v53 }
  0x3e   : > { %v529_v22 = vadd.f32 %v505_v9, %v452_v2  ;;  %v603_v27 = vsel %vm416_vm0, %v601_v6, %v602_v10  ;;  %v816_v31 = vmul.f32 %v1248_v57, %v1365_v51  ;;  %v817_v35 = vmul.f32 %v1248_v57, %v1372_v53 }
  0x3f   : > { %v876_v41 = vadd.f32 %v850_v13, %v800_v5  ;;  %v679_v42 = vsel %vm493_vm1, %v677_v11, %v678_v12  ;;  %v775_v45 = vrot.slane %v740_v20, 1  ;;  %v776_v47 = vrot.slane %v741_v4, 1 }
  0x40   : > { %v550_v24 = vadd.f32 %v542_v59, %v529_v22  ;;  %v851_v46 = vrot.slane %v816_v31, 2  ;;  %v852_v50 = vrot.slane %v817_v35, 2  ;;  %v340_v43 = vadd.f32 %v1056_v28, %v1180_v7 }
  0x41   : > { %v884_v52 = vpack.c.bf16 %v876_v41, %v876_v41  ;;  %v777_v54 = vsel %vm416_vm0, %v775_v45, %v776_v47  ;;  %v1413_v55 = vunpack.c.l.bf16 %v303_v37  ;;  %v360_v13 = vmul.f32 %v1198_v15, %v1319_v23  ;;  %v306_v47 = vld [vmem:[%s1189_s30 + $0x3c] sm:$0x1] }
  0x42   : > { %v627_v25 = vadd.f32 %v603_v27, %v550_v24  ;;  %v853_v19 = vsel %vm493_vm1, %v851_v46, %v852_v50  ;;  %v1418_v56 = vunpack.c.l.bf16 %v304_v26  ;;  %v392_v32 = vmul.f32 %v1201_v16, %v1319_v23 }
  0x43   : > { %893 = vst.msk [vmem:[%s1317_s9 + $0x8] sm:$0xf] %vm890_vm2, %v884_v52  ;;  %v368_v58 = vadd.f32 %v360_v13, %v340_v43  ;;  %v393_v28 = vmul.f32 %v1201_v16, %v1323_v49  ;;  %v469_v59 = vmul.f32 %v1204_v17, %v1319_v23  ;;  %v470_v39 = vmul.f32 %v1204_v17, %v1323_v49 }
  0x44   : > { %v703_v62 = vadd.f32 %v679_v42, %v627_v25  ;;  %v429_v63 = vrot.slane %v392_v32, 1  ;;  %v543_v0 = vmul.f32 %v1207_v18, %v1365_v51  ;;  %v568_v36 = vmul.f32 %v1234_v44, %v1365_v51 }
  0x45   : > { %v430_v1 = vrot.slane %v393_v28, 1  ;;  %v506_v21 = vrot.slane %v469_v59, 2  ;;  %v507_v40 = vrot.slane %v470_v39, 2  ;;  %v569_v38 = vmul.f32 %v1234_v44, %v1372_v53 }
  0x46   : > { %v724_v3 = vadd.f32 %v716_v8, %v703_v62  ;;  %v604_v6 = vrot.slane %v568_v36, 1  ;;  %v644_v23 = vmul.f32 %v1239_v48, %v1365_v51  ;;  %v645_v49 = vmul.f32 %v1239_v48, %v1372_v53 }
  0x47   : > { %v431_v2 = vsel %vm416_vm0, %v429_v63, %v430_v1  ;;  %v508_v9 = vsel %vm493_vm1, %v506_v21, %v507_v40  ;;  %v605_v10 = vrot.slane %v569_v38, 1  ;;  %v717_v11 = vmul.f32 %v1251_v60, %v1413_v55 }
  0x48   : > { %v801_v5 = vadd.f32 %v777_v54, %v724_v3  ;;  %v453_v12 = vadd.f32 %v431_v2, %v368_v58  ;;  %v680_v20 = vrot.slane %v644_v23, 2  ;;  %v681_v8 = vrot.slane %v645_v49, 2 }
  0x49   : > { %v606_v4 = vsel %vm416_vm0, %v604_v6, %v605_v10  ;;  %v742_v22 = vmul.f32 %v1254_v61, %v1413_v55  ;;  %v743_v27 = vmul.f32 %v1254_v61, %v1418_v56  ;;  %v818_v31 = vmul.f32 %v1248_v57, %v1413_v55 }
  0x4a   : > { %v877_v35 = vadd.f32 %v853_v19, %v801_v5  ;;  %v530_v41 = vadd.f32 %v508_v9, %v453_v12  ;;  %v682_v42 = vsel %vm493_vm1, %v680_v20, %v681_v8  ;;  %v819_v45 = vmul.f32 %v1248_v57, %v1418_v56 }
  0x4b   : > { %v778_v26 = vrot.slane %v742_v22, 1  ;;  %v779_v24 = vrot.slane %v743_v27, 1  ;;  %v854_v46 = vrot.slane %v818_v31, 2  ;;  %v341_v50 = vadd.f32 %v1057_v29, %v1180_v7 }
  0x4c   : > { %v885_v43 = vpack.c.bf16 %v877_v35, %v877_v35  ;;  %v551_v52 = vadd.f32 %v543_v0, %v530_v41  ;;  %v855_v54 = vrot.slane %v819_v45, 2  ;;  %v1458_v13 = vunpack.c.h.bf16 %v303_v37 }
  0x4d   : > { %v780_v25 = vsel %vm416_vm0, %v778_v26, %v779_v24  ;;  %v361_v19 = vmul.f32 %v1198_v15, %v1365_v51  ;;  %v1463_v32 = vunpack.c.l.bf16 %v306_v47  ;;  %v394_v58 = vmul.f32 %v1201_v16, %v1365_v51 }
  0x4e   : > { %894 = vst.msk [vmem:[%s1317_s9 + $0xc] sm:$0xf] %vm890_vm2, %v885_v43  ;;  %v628_v28 = vadd.f32 %v606_v4, %v551_v52  ;;  %v856_v14 = vsel %vm493_vm1, %v854_v46, %v855_v54  ;;  %v395_v29 = vmul.f32 %v1201_v16, %v1372_v53  ;;  %v471_v37 = vmul.f32 %v1204_v17, %v1365_v51  ;;  %v1501_v46 = vld [vmem:[%s1189_s30 + $0x40] ss:$8 sps:$4 sm:$0xff]  }
  0x4f   : > { %v369_v59 = vadd.f32 %v361_v19, %v341_v50  ;;  %v432_v39 = vrot.slane %v394_v58, 1  ;;  %v472_v62 = vmul.f32 %v1204_v17, %v1372_v53  ;;  %v544_v63 = vmul.f32 %v1207_v18, %v1413_v55 }
  0x50   : > { %v704_v0 = vadd.f32 %v682_v42, %v628_v28  ;;  %v433_v36 = vrot.slane %v395_v29, 1  ;;  %v509_v1 = vrot.slane %v471_v37, 2  ;;  %v570_v21 = vmul.f32 %v1234_v44, %v1413_v55  ;;  %v308_v28 = vld [vmem:[%s1189_s30 + $0x44] sm:$0x1] }
  0x51   : > { %v510_v40 = vrot.slane %v472_v62, 2  ;;  %v571_v38 = vmul.f32 %v1234_v44, %v1418_v56  ;;  %v646_v51 = vmul.f32 %v1239_v48, %v1413_v55  ;;  %v647_v3 = vmul.f32 %v1239_v48, %v1418_v56 }
  0x52   : > { %v725_v53 = vadd.f32 %v717_v11, %v704_v0  ;;  %v434_v6 = vsel %vm416_vm0, %v432_v39, %v433_v36  ;;  %v607_v23 = vrot.slane %v570_v21, 1  ;;  %v718_v49 = vmul.f32 %v1251_v60, %v1458_v13 }
  0x53   : > { %v454_v2 = vadd.f32 %v434_v6, %v369_v59  ;;  %v511_v9 = vsel %vm493_vm1, %v509_v1, %v510_v40  ;;  %v608_v10 = vrot.slane %v571_v38, 1  ;;  %v683_v5 = vrot.slane %v646_v51, 2 }
  0x54   : > { %v802_v12 = vadd.f32 %v780_v25, %v725_v53  ;;  %v684_v20 = vrot.slane %v647_v3, 2  ;;  %v744_v8 = vmul.f32 %v1254_v61, %v1458_v13  ;;  %v745_v11 = vmul.f32 %v1254_v61, %v1463_v32 }
  0x55   : > { %v531_v4 = vadd.f32 %v511_v9, %v454_v2  ;;  %v609_v22 = vsel %vm416_vm0, %v607_v23, %v608_v10  ;;  %v820_v27 = vmul.f32 %v1248_v57, %v1458_v13  ;;  %v821_v31 = vmul.f32 %v1248_v57, %v1463_v32 }
  0x56   : > { %v878_v35 = vadd.f32 %v856_v14, %v802_v12  ;;  %v685_v41 = vsel %vm493_vm1, %v683_v5, %v684_v20  ;;  %v781_v42 = vrot.slane %v744_v8, 1  ;;  %v782_v45 = vrot.slane %v745_v11, 1 }
  0x57   : > { %v552_v47 = vadd.f32 %v544_v63, %v531_v4  ;;  %v857_v26 = vrot.slane %v820_v27, 2  ;;  %v858_v24 = vrot.slane %v821_v31, 2  ;;  %v342_v50 = vadd.f32 %v1060_v33, %v1180_v7 }
  0x58   : > { %v886_v43 = vpack.c.bf16 %v878_v35, %v878_v35  ;;  %v783_v52 = vsel %vm416_vm0, %v781_v42, %v782_v45  ;;  %v362_v54 = vmul.f32 %v1198_v15, %v1413_v55  ;;  %v396_v25 = vmul.f32 %v1201_v16, %v1413_v55 }
  0x59   : > { %v629_v19 = vadd.f32 %v609_v22, %v552_v47  ;;  %v859_v58 = vsel %vm493_vm1, %v857_v26, %v858_v24  ;;  %v397_v14 = vmul.f32 %v1201_v16, %v1418_v56  ;;  %v473_v29 = vmul.f32 %v1204_v17, %v1413_v55 }
  0x5a   : > { %895 = vst.msk [vmem:[%s1317_s9 + $0x10] sm:$0xf] %vm890_vm2, %v886_v43  ;;  %v370_v33 = vadd.f32 %v362_v54, %v342_v50  ;;  %v435_v37 = vrot.slane %v396_v25, 1  ;;  %v474_v59 = vmul.f32 %v1204_v17, %v1418_v56  ;;  %v534_v39 = vunpack.c.l.bf16 %v1501_v46 }
  0x5b   : > { %v705_v62 = vadd.f32 %v685_v41, %v629_v19  ;;  %v436_v63 = vrot.slane %v397_v14, 1  ;;  %v512_v0 = vrot.slane %v473_v29, 2  ;;  %v545_v36 = vmul.f32 %v1207_v18, %v1458_v13 }
  0x5c   : > { %v513_v1 = vrot.slane %v474_v59, 2  ;;  %v555_v21 = vunpack.c.l.bf16 %v308_v28  ;;  %v572_v55 = vmul.f32 %v1234_v44, %v1458_v13  ;;  %v573_v40 = vmul.f32 %v1234_v44, %v1463_v32 }
  0x5d   : > { %v726_v38 = vadd.f32 %v718_v49, %v705_v62  ;;  %v437_v51 = vsel %vm416_vm0, %v435_v37, %v436_v63  ;;  %v648_v56 = vmul.f32 %v1239_v48, %v1458_v13  ;;  %v649_v3 = vmul.f32 %v1239_v48, %v1463_v32  ;;  %v310_v62 = vld [vmem:[%s1189_s30 + $0x4c] sm:$0x1] }
  0x5e   : > { %v455_v53 = vadd.f32 %v437_v51, %v370_v33  ;;  %v514_v6 = vsel %vm493_vm1, %v512_v0, %v513_v1  ;;  %v610_v23 = vrot.slane %v572_v55, 1  ;;  %v611_v2 = vrot.slane %v573_v40, 1 }
  0x5f   : > { %v803_v9 = vadd.f32 %v783_v52, %v726_v38  ;;  %v686_v10 = vrot.slane %v648_v56, 2  ;;  %v687_v5 = vrot.slane %v649_v3, 2  ;;  %v719_v12 = vmul.f32 %v1251_v60, %v534_v39 }
  0x60   : > { %v532_v20 = vadd.f32 %v514_v6, %v455_v53  ;;  %v612_v49 = vsel %vm416_vm0, %v610_v23, %v611_v2  ;;  %v746_v8 = vmul.f32 %v1254_v61, %v534_v39  ;;  %v747_v11 = vmul.f32 %v1254_v61, %v555_v21 }
  0x61   : > { %v879_v4 = vadd.f32 %v859_v58, %v803_v9  ;;  %v688_v22 = vsel %vm493_vm1, %v686_v10, %v687_v5  ;;  %v822_v27 = vmul.f32 %v1248_v57, %v534_v39  ;;  %v823_v31 = vmul.f32 %v1248_v57, %v555_v21 }
  0x62   : > { %v553_v35 = vadd.f32 %v545_v36, %v532_v20  ;;  %v784_v41 = vrot.slane %v746_v8, 1  ;;  %v785_v42 = vrot.slane %v747_v11, 1  ;;  %v343_v45 = vadd.f32 %v1061_v34, %v1180_v7 }
  0x63   : > { %v887_v47 = vpack.c.bf16 %v879_v4, %v879_v4  ;;  %v860_v26 = vrot.slane %v822_v27, 2  ;;  %v861_v24 = vrot.slane %v823_v31, 2  ;;  %v363_v50 = vmul.f32 %v1198_v15, %v1458_v13 }
  0x64   : > { %v630_v43 = vadd.f32 %v612_v49, %v553_v35  ;;  %v786_v52 = vsel %vm416_vm0, %v784_v41, %v785_v42  ;;  %v398_v54 = vmul.f32 %v1201_v16, %v1458_v13  ;;  %v399_v25 = vmul.f32 %v1201_v16, %v1463_v32 }
  0x65   : > { %896 = vst.msk [vmem:[%s1317_s9 + $0x14] sm:$0xf] %vm890_vm2, %v887_v47  ;;  %v862_v7 = vsel %vm493_vm1, %v860_v26, %v861_v24  ;;  %v371_v30 = vadd.f32 %v363_v50, %v343_v45  ;;  %v475_v34 = vmul.f32 %v1204_v17, %v1458_v13  ;;  %v476_v15 = vmul.f32 %v1204_v17, %v1463_v32 }
  0x66   : > { %v706_v19 = vadd.f32 %v688_v22, %v630_v43  ;;  %v438_v58 = vrot.slane %v398_v54, 1  ;;  %v439_v28 = vrot.slane %v399_v25, 1  ;;  %v546_v14 = vmul.f32 %v1207_v18, %v534_v39 }
  0x67   : > { %v515_v29 = vrot.slane %v475_v34, 2  ;;  %v516_v33 = vrot.slane %v476_v15, 2  ;;  %v574_v16 = vmul.f32 %v1234_v44, %v534_v39  ;;  %v575_v37 = vmul.f32 %v1234_v44, %v555_v21 }
  0x68   : > { %v727_v59 = vadd.f32 %v719_v12, %v706_v19  ;;  %v440_v63 = vsel %vm416_vm0, %v438_v58, %v439_v28  ;;  %v650_v13 = vmul.f32 %v1239_v48, %v534_v39  ;;  %v651_v0 = vmul.f32 %v1239_v48, %v555_v21 }
  0x69   : > { %v456_v17 = vadd.f32 %v440_v63, %v371_v30  ;;  %v517_v32 = vsel %vm493_vm1, %v515_v29, %v516_v33  ;;  %v613_v36 = vrot.slane %v574_v16, 1  ;;  %v614_v1 = vrot.slane %v575_v37, 1 }
  0x6a   : > { %v804_v18 = vadd.f32 %v786_v52, %v727_v59  ;;  %v689_v55 = vrot.slane %v650_v13, 2  ;;  %v690_v40 = vrot.slane %v651_v0, 2  ;;  %v708_v38 = vunpack.c.h.bf16 %v1501_v46 }
  0x6b   : > { %v533_v44 = vadd.f32 %v517_v32, %v456_v17  ;;  %v729_v51 = vunpack.c.l.bf16 %v310_v62  ;;  %v615_v3 = vsel %vm416_vm0, %v613_v36, %v614_v1 }
  0x6c   : > { %v880_v56 = vadd.f32 %v862_v7, %v804_v18  ;;  %v748_v39 = vmul.f32 %v1254_v61, %v708_v38  ;;  %v824_v21 = vmul.f32 %v1248_v57, %v708_v38  ;;  %v691_v2 = vsel %vm493_vm1, %v689_v55, %v690_v40 }
  0x6d   : > { %v554_v53 = vadd.f32 %v546_v14, %v533_v44  ;;  %v749_v48 = vmul.f32 %v1254_v61, %v729_v51  ;;  %v825_v6 = vmul.f32 %v1248_v57, %v729_v51  ;;  %v720_v10 = vmul.f32 %v1251_v60, %v708_v38 }
  0x6e   : > { %v888_v23 = vpack.c.bf16 %v880_v56, %v880_v56  ;;  %v787_v46 = vrot.slane %v748_v39, 1  ;;  %v863_v12 = vrot.slane %v824_v21, 2 }
  0x6f   : > { %v631_v9 = vadd.f32 %v615_v3, %v554_v53  ;;  %v788_v5 = vrot.slane %v749_v48, 1  ;;  %v864_v20 = vrot.slane %v825_v6, 2 }
  0x70   : > { %897 = vst.msk [vmem:[%s1317_s9 + $0x18] sm:$0xf] %vm890_vm2, %v888_v23 }
  0x71   : > { %v707_v49 = vadd.f32 %v691_v2, %v631_v9  ;;  %v789_v61 = vsel %vm416_vm0, %v787_v46, %v788_v5  ;;  %v865_v11 = vsel %vm493_vm1, %v863_v12, %v864_v20 }
  0x73   : > { %v728_v8 = vadd.f32 %v720_v10, %v707_v49 }
  0x75   : > { %v805_v57 = vadd.f32 %v789_v61, %v728_v8 }
  0x77   : > { %v881_v4 = vadd.f32 %v865_v11, %v805_v57 }
  0x79   : > { %v889_v22 = vpack.c.bf16 %v881_v4, %v881_v4 }
  0x7b   : > { %898 = vst.msk [vmem:[%s1317_s9 + $0x1c] sm:$0xf] %vm890_vm2, %v889_v22 }
  0x7c PF: > { %s14_s17 = sadd.s32 1, %s1112_s17   ;;  %s1594_s15 = smov %s1108_s16 }
  0x7d   : > { %p11_p5 = scmp.ge.s32.totalorder %s14_s17, 4   ;;  %s1595_s16 = smov %s1597_s18 }
  0x7f   :  { %13 = sbr.rel (!%p11_p5) target bundleno = 2 (0x2), region = 75 }

// kernel: psa_forward.7
= control target key start
LH: loop header
LB: loop body
LE: loop exit
PB: predicated region body
PF: predicated region fallthrough
CT: control target
= control target key end

     0   :  { %16 = vsyncpa [#allocation3], 0  ;;  %s2133_s0 = inlined_call_operand.vmem [shape: bf16[128,64], index: 0, kind: input, shape index: {}]   ;;  %s2134_s1 = inlined_call_operand.vmem [shape: bf16[128,128], index: 1, kind: input, shape index: {}]   ;;  %s2135_s2 = inlined_call_operand.vmem [shape: bf16[64,64], index: 2, kind: input, shape index: {}]   ;;  %s2136_s3 = inlined_call_operand.vmem [shape: bf16[64,128], index: 3, kind: input, shape index: {}]   ;;  %s2137_s4 = inlined_call_operand.vmem [shape: bf16[128,64], index: 4, kind: input, shape index: {}]   ;;  %s2138_s5 = inlined_call_operand.vmem [shape: bf16[64,128], index: 5, kind: input, shape index: {}]   ;;  %s2139_s6 = inlined_call_operand.vmem [shape: bf16[64,128], index: 6, kind: input, shape index: {}]   ;;  %s2140_s7 = inlined_call_operand.vmem [shape: f32[1,64], index: 7, kind: input, shape index: {}]   ;;  %s2141_s8 = inlined_call_operand.vmem [shape: f32[1,128], index: 8, kind: input, shape index: {}]   ;;  %s2142_s9 = inlined_call_operand.vmem [shape: f32[1,64], index: 9, kind: input, shape index: {}]   ;;  %s2143_s10 = inlined_call_operand.vmem [shape: f32[1,128], index: 10, kind: input, shape index: {}]   ;;  %s2144_s11 = inlined_call_operand.hbm [shape: f32[128,128], index: 11, kind: output, shape index: {}]  }
   0x1   :  { %18 = vsyncpa [#allocation3 + $0x1], 0  ;;  %s1866_s17 = smov 0   ;;  %s1868_s18 = smov 0  }
   0x2   :  { %s1870_s19 = smov 0   ;;  %s1872_s20 = smov 0  }
   0x3 LB: > { %s1887_s21 = sadd.s32 4294967295, %s1800_s20   ;;  %s1345_s22 = sadd.s32 4294967294, %s1800_s20   ;;  %s1800_s20 = sphi %s1872_s20, %s2152_s20   ;;  %s1796_s19 = sphi %s1870_s19, %s2151_s19   ;;  %s1792_s18 = sphi %s1868_s18, %s2150_s18   ;;  %s1788_s17 = sphi %s1866_s17, %s2149_s17  }
   0x4   : > { %s1891_s23 = sadd.s32 1, %s1800_s20   ;;  %s272_s24 = sadd.s32 1, %s1796_s19 }
   0x5   : > { %s269_s25 = ssub.s32 %s1800_s20, %s1891_s23  ;;  %p282_p0 = scmp.ne.s32.totalorder %s1796_s19, %s1792_s18 }
   0x6   : > { %p270_p1 = scmp.eq.s32.totalorder %s269_s25, 0  ;;  %p283_p2 = scmp.eq.s32.totalorder %s1887_s21, 1 }
   0x7   : > { %p288_p3 = scmp.ne.s32.totalorder %s1792_s18, %s1788_s17  ;;  %p289_p4 = scmp.eq.s32.totalorder %s1345_s22, 1 }
   0x8   : > { %s1902_s26 = scalar_select %p270_p1, %s1796_s19, %s272_s24  }
   0x9   : > { %p1904_p5 = por %p283_p2, %p282_p0  ;;  %p1908_p6 = por %p289_p4, %p288_p3 }
   0xa   : > { %2145 = sst [smem:[#allocation5_spill]] %s1902_s26  ;;  %p1348_p7 = scmp.ge.s32.totalorder %s1800_s20, 1 }
   0xb   : > { %p352_p8 = scmp.lt.s32.totalorder %s1800_s20, 3 }
   0xd   : > { %p353_p9 = pnand %p1348_p7, %p352_p8 }
   0xe   : > { %v1630_v0 = vld [vmem:[%s2135_s2] sm:$0xff] (!%p353_p9)   ;;  %s1350_s12 = sshll.u32 (!%p353_p9), %s1887_s21, 3  ;;  %v1631_v1 = vld [vmem:[%s2135_s2 + $0x8] sm:$0xff] (!%p353_p9)   ;;  %v1632_v2 = vld [vmem:[%s2135_s2 + $0x10] sm:$0xff] (!%p353_p9)   ;;  %vm494_vm0 = vcmask (!%p353_p9), 523264   ;;  %s394_s29 = sand.u32 (!%p353_p9), 1, %s1792_s18  }
   0xf   : > { %356 = sbr.rel (%p353_p9) target bundleno = 1007 (0x3ef), region = 64  ;;  %p398_p10 = scmp.lt.s32.totalorder (!%p353_p9), %s1350_s12, 15  ;;  %1472 = vmatprep.subr.bf16.mxu0 (!%p353_p9), %v1630_v0  ;;  %v1641_v3 = vld [vmem:[%s2136_s3] sm:$0xff] (!%p353_p9)   ;;  %v1642_v4 = vld [vmem:[%s2136_s3 + $0x8] sm:$0xff] (!%p353_p9)   ;;  %v1633_v6 = vld [vmem:[%s2135_s2 + $0x18] sm:$0xff] (!%p353_p9)  }
  0x10   : > { %1473 = vmatpush3.bf16.msra.mxu0 (!%p353_p9), %v1630_v0  ;;  %1488 = vmatprep.subr.bf16.mxu1 (!%p353_p9), %v1641_v3  ;;  %v1643_v26 = vld [vmem:[%s2136_s3 + $0x10] sm:$0xff] (!%p353_p9)   ;;  %v1644_v27 = vld [vmem:[%s2136_s3 + $0x18] sm:$0xff] (!%p353_p9)   ;;  %v1354_v29 = vld [vmem:[%s2140_s7] ss:$0 sm:$0xff] (!%p353_p9)  ;;  %s1349_s30 = sshll.u32 (!%p353_p9), %s394_s29, 6  ;;  %s1427_s14 = sshll.u32 (!%p353_p9), %s1887_s21, 10 }
  0x11   : > { %1474 = vmatprep.subr.bf16.mxu0 (!%p353_p9), %v1631_v1  ;;  %1489 = vmatpush3.bf16.msra.mxu1 (!%p353_p9), %v1641_v3  ;;  %v1645_v61 = vld [vmem:[%s2137_s4] sm:$0xff] (!%p353_p9)   ;;  %v1646_v62 = vld [vmem:[%s2137_s4 + $0x8] sm:$0xff] (!%p353_p9)   ;;  %v1647_v63 = vld [vmem:[%s2137_s4 + $0x10] sm:$0xff] (!%p353_p9)   ;;  %s396_s13 = scalar_lea.vmem (!%p353_p9), [#allocation2], %s1349_s30  ;;  %s2092_s21 = scalar_lea.sflag (!%p353_p9), [#allocation3], %s394_s29 }
  0x12   : > { %1490 = vmatprep.subr.bf16.mxu1 (!%p353_p9), %v1642_v4  ;;  %v1648_v0 = vld [vmem:[%s2137_s4 + $0x18] sm:$0xff] (!%p353_p9)   ;;  %v1651_v3 = vld [vmem:[%s2137_s4 + $0x30] sm:$0xff] (!%p353_p9)   ;;  %s1271_s15 = sshll.u32 (!%p353_p9), %s396_s13, 4  ;;  %s2088_s15 = int_to_ptr.vmem [resolvable:$true] %s1271_s15 }
  0x13   : > { %s1738_s22 = scalar_lea.vmem (!%p353_p9), %s2088_s15, 1024 }
  0x14   : > { %1475 = vmatpush3.bf16.msra.mxu0 (!%p353_p9), %v1631_v1  ;;  %v1649_v1 = vld [vmem:[%s2137_s4 + $0x20] sm:$0xff] (!%p353_p9)   ;;  %p1739_p11 = scmp.ne.s32.totalorder (!%p353_p9), %s2088_s15, %s1738_s22 }
  0x15   : > { %1476 = vmatprep.subr.bf16.mxu0 (!%p353_p9), %v1632_v2  ;;  %1491 = vmatpush3.bf16.msra.mxu1 (!%p353_p9), %v1642_v4  ;;  %v1652_v4 = vld [vmem:[%s2137_s4 + $0x38] sm:$0xff] (!%p353_p9)  }
  0x16   : > { %s2154_s12 = smov (!%p398_p10, %s1350_s12), 15  ;;  %1492 = vmatprep.subr.bf16.mxu1 %v1643_v26  ;;  %p1740_p12 = pnand %p1739_p11, %p1904_p5 }
  0x17   : > { %s1351_s25 = sshll.u32 %s2154_s12, 2  ;;  %s2086_s12 = scalar_lea.hbm %s2144_s11, %s1427_s14 }
  0x18   : > { %s1933_s26 = scalar_lea.vmem %s2133_s0, %s1351_s25  ;;  %s407_s24 = scalar_lea.vmem %s2134_s1, %s1351_s25  ;;  %1477 = vmatpush3.bf16.msra.mxu0 %v1632_v2  ;;  %v1650_v2 = vld [vmem:[%s2137_s4 + $0x28] sm:$0xff]  }
  0x19   : > { %v1634_v5 = vld [vmem:[%s1933_s26] sm:$0xff]   ;;  %v1945_v8 = vld [vmem:[%s407_s24 + $0x8] sm:$0xff]   ;;  %v1947_v9 = vld [vmem:[%s407_s24 + $0x10] sm:$0xff]   ;;  %1478 = vmatprep.subr.bf16.mxu0 %v1633_v6  ;;  %s1802_s25 = smov 64   ;;  %1493 = vmatpush3.bf16.msra.mxu1 %v1643_v26  ;;  %p1741_p13 = pneg %p1740_p12 }
  0x1a   : > { %1480 = vmatprep.mubr.msk.bf16.mxu0 %vm494_vm0, %v1634_v5  ;;  %v1943_v7 = vld [vmem:[%s407_s24] sm:$0xff]   ;;  %v1635_v10 = vld [vmem:[%s1933_s26 + $0x8] sm:$0xff]   ;;  %v421_v13 = vunpack.c.l.bf16 %v1945_v8  ;;  %v1953_v14 = vld [vmem:[%s407_s24 + $0x18] sm:$0xff]   ;;  %v422_v16 = vunpack.c.h.bf16 %v1945_v8  ;;  %v423_v17 = vunpack.c.l.bf16 %v1947_v9  ;;  %v424_v18 = vunpack.c.h.bf16 %v1947_v9  ;;  %1494 = vmatprep.subr.bf16.mxu1 %v1644_v27  ;;  %s1803_s24 = smov [#allocation2]  }
  0x1b   : > { %v419_v11 = vunpack.c.l.bf16 %v1943_v7  ;;  %v420_v12 = vunpack.c.h.bf16 %v1943_v7  ;;  %v1636_v15 = vld [vmem:[%s1933_s26 + $0x10] sm:$0xff]   ;;  %v425_v20 = vunpack.c.l.bf16 %v1953_v14  ;;  %v426_v21 = vunpack.c.h.bf16 %v1953_v14  ;;  %v1637_v25 = vld [vmem:[%s1933_s26 + $0x18] sm:$0xff]   ;;  %v1653_v5 = vld [vmem:[%s2139_s6] sm:$0xff]  }
  0x1c   : > { %1479 = vmatpush3.bf16.msra.mxu0 %v1633_v6  ;;  %v1620_v22 = vpack.i.bf16 %v424_v18, %v423_v17  ;;  %v1615_v23 = vpack.i.bf16 %v422_v16, %v421_v13  ;;  %v1654_v6 = vld [vmem:[%s2139_s6 + $0x8] sm:$0xff]  }
  0x1d   : > { %v1610_v19 = vpack.i.bf16 %v420_v12, %v419_v11  ;;  %v1625_v24 = vpack.i.bf16 %v426_v21, %v425_v20  ;;  %1495 = vmatpush3.bf16.msra.mxu1 %v1644_v27  ;;  %1504 = vmatprep.subr.bf16.mxu0 %v1645_v61 }
  0x1e   : > { %1621 = vrot.lane.b32.xlu1 %v1620_v22, %s1802_s25  ;;  %1528 = vmatprep.subr.bf16.mxu1 %v1653_v5 }
  0x1f   : > { %1611 = vrot.lane.b32.xlu0 %v1610_v19, %s1802_s25  ;;  %1481 = vmatmul.mubr.msk.bf16.vlgmr.msra.gmra.mrb[0].mxu0 %vm494_vm0, %v1635_v10  ;;  %v1367_v10 = vld [vmem:[%s2141_s8] ss:$0 sm:$0xff] }
  0x20   : > { %1484 = vmatprep.mubr.msk.bf16.mxu0 %vm494_vm0, %v1636_v15  ;;  %1505 = vmatpush3.bf16.msra.mxu0 %v1645_v61 }
  0x21   : > { %1506 = vmatprep.subr.bf16.mxu0 %v1646_v62 }
  0x22   : > { %1626 = vrot.lane.b32.xlu1 %v1625_v24, %s1802_s25 }
  0x23   : > { %1616 = vrot.lane.b32.xlu0 %v1615_v23, %s1802_s25  ;;  %s1742_s25 = sshll.u32 %s1803_s24, 4  ;;  %s1743_s25 = int_to_ptr.vmem [resolvable:$false] %s1742_s25 }
  0x24   : > { %1507 = vmatpush3.bf16.msra.mxu0 %v1646_v62  ;;  %s1744_s30 = scalar_lea.vmem %s1743_s25, 2048  ;;  %p1745_p0 = scmp.lt.s32.totalorder %s2088_s15, %s1743_s25 }
  0x25   : > { %1508 = vmatprep.subr.bf16.mxu0 %v1647_v63  ;;  %p1746_p1 = scmp.lt.s32.totalorder %s1744_s30, %s1738_s22 }
  0x27   : > { %1485 = vmatmul.mubr.msk.bf16.gmra.mrb[4].mxu0 %vm494_vm0, %v1637_v25  ;;  %p1747_p2 = por %p1746_p1, %p1745_p0 }
  0x28   : > { %1509 = vmatpush3.bf16.msra.mxu0 %v1647_v63 }
  0x29   : > { %1510 = vmatprep.subr.bf16.mxu0 %v1648_v0  ;;  %p1748_p3 = pnand %p1747_p2, %p1741_p13 }
  0x2c   : > { %1511 = vmatpush3.bf16.msra.mxu0 %v1648_v0 }
  0x2d   : > { %1512 = vmatprep.subr.bf16.mxu0 %v1649_v1 }
  0x30   : > { %1513 = vmatpush3.bf16.msra.mxu0 %v1649_v1 }
  0x31   : > { %1514 = vmatprep.subr.bf16.mxu0 %v1650_v2 }
  0x34   : > { %1515 = vmatpush3.bf16.msra.mxu0 %v1650_v2 }
  0x35   : > { %1516 = vmatprep.subr.bf16.mxu0 %v1651_v3 }
  0x38   : > { %1517 = vmatpush3.bf16.msra.mxu0 %v1651_v3 }
  0x39   : > { %1518 = vmatprep.subr.bf16.mxu0 %v1652_v4 }
  0x3c   : > { %1519 = vmatpush3.bf16.msra.mxu0 %v1652_v4 }
  0x90   : > { %v1622_v35 = vpop.permute.xlu1 %1621 }
  0x91   : > { %v1612_v28 = vpop.permute.xlu0 %1611 }
  0x94   : > { %v1627_v44 = vpop.permute.xlu1 %1626 }
  0x95   : > { %v1617_v30 = vpop.permute.xlu0 %1616 }
  0xf2   : > { %v1482_v31 = vpop.f32.mrb[0].mxu0 }
  0xf3   : > { %v541_v32 = vpop.f32.mrb[1].mxu0  ;;  %v550_v36 = vadd.f32 %v1482_v31, %v1354_v29 }
  0xf4   : > { %v542_v33 = vadd.f32 %v1354_v29, %v541_v32  ;;  %v1483_v34 = vpop.f32.mrb[2].mxu0 }
  0xf5   : > { %v553_v37 = vadd.f32 %v1483_v34, %v1354_v29  ;;  %v544_v38 = vpop.f32.mrb[3].mxu0  ;;  %v1980_v43 = vadd.low.f32.bf16 %v550_v36, %v1617_v30 }
  0xf6   : > { %v545_v39 = vadd.f32 %v1354_v29, %v544_v38  ;;  %v1976_v41 = vadd.low.f32.bf16 %v542_v33, %v1612_v28 }
  0xf7   : > { %v1974_v40 = vadd.high.f32.bf16 %v553_v37, %v1617_v30 }
  0xf8   : > { %v1978_v42 = vadd.high.f32.bf16 %v545_v39, %v1612_v28 }
  0xf9   : > { %v613_v47 = vpack.c.bf16 %v1974_v40, %v1980_v43 }
  0xfa   : > { %v1486_v45 = vpop.f32.mrb[4].mxu0  ;;  %v612_v46 = vpack.c.bf16 %v1978_v42, %v1976_v41 }
  0xfb   : > { %v557_v48 = vpop.f32.mrb[5].mxu0  ;;  %v566_v51 = vadd.f32 %v1486_v45, %v1354_v29 }
  0xfc   : > { %v558_v49 = vadd.f32 %v1354_v29, %v557_v48  ;;  %v1487_v50 = vpop.f32.mrb[6].mxu0  ;;  %1496 = vmatprep.mubr.msk.bf16.mxu1 %vm494_vm0, %v612_v46 }
  0xfd   : > { %v569_v52 = vadd.f32 %v1487_v50, %v1354_v29  ;;  %v560_v53 = vpop.f32.mrb[7].mxu0  ;;  %1497 = vmatmul.mubr.msk.bf16.vlgmr.msra.gmra.mrb[0].mxu1 %vm494_vm0, %v613_v47  ;;  %v1994_v58 = vadd.low.f32.bf16 %v566_v51, %v1627_v44 }
  0xfe   : > { %v561_v54 = vadd.f32 %v1354_v29, %v560_v53  ;;  %v1990_v56 = vadd.low.f32.bf16 %v558_v49, %v1622_v35  ;;  %1529 = vmatpush3.bf16.msra.mxu1 %v1653_v5 }
  0xff   : > { %v1988_v55 = vadd.high.f32.bf16 %v569_v52, %v1627_v44  ;;  %1530 = vmatprep.subr.bf16.mxu1 %v1654_v6 }
 0x100   : > { %v1992_v57 = vadd.high.f32.bf16 %v561_v54, %v1622_v35 }
 0x101   : > { %v615_v60 = vpack.c.bf16 %v1988_v55, %v1994_v58 }
 0x102   : > { %v614_v59 = vpack.c.bf16 %v1992_v57, %v1990_v56  ;;  %1531 = vmatpush3.bf16.msra.mxu1 %v1654_v6 }
 0x104   : > { %1500 = vmatprep.mubr.msk.bf16.mxu1 %vm494_vm0, %v614_v59 }
 0x105   : > { %1501 = vmatmul.mubr.msk.bf16.gmra.mrb[4].mxu1 %vm494_vm0, %v615_v60 }
 0x1d0   : > { %v1498_v11 = vpop.f32.mrb[0].mxu1 }
 0x1d1   : > { %v710_v12 = vadd.f32 %v1498_v11, %v1367_v10  ;;  %v701_v13 = vpop.f32.mrb[1].mxu1 }
 0x1d2   : > { %v702_v15 = vadd.f32 %v1367_v10, %v701_v13  ;;  %v1499_v16 = vpop.f32.mrb[2].mxu1 }
 0x1d3   : > { %v1378_v17 = vmul.f32 -1.442695, %v710_v12  ;;  %v713_v18 = vadd.f32 %v1499_v16, %v1367_v10  ;;  %v704_v19 = vpop.f32.mrb[3].mxu1 }
 0x1d4   : > { %v1376_v20 = vmul.f32 -1.442695, %v702_v15  ;;  %v705_v21 = vadd.f32 %v1367_v10, %v704_v19 }
 0x1d5   : > { %1666 = vpow2.f32 %v1378_v17  ;;  %v1379_v22 = vmul.f32 -1.442695, %v713_v18 }
 0x1d6   : > { %1668 = vpow2.f32 %v1376_v20  ;;  %v1377_v23 = vmul.f32 -1.442695, %v705_v21 }
 0x1d7   : > { %1670 = vpow2.f32 %v1379_v22 }
 0x1d8   : > { %1672 = vpow2.f32 %v1377_v23  ;;  %v1502_v24 = vpop.f32.mrb[4].mxu1 }
 0x1d9   : > { %v726_v25 = vadd.f32 %v1502_v24, %v1367_v10  ;;  %v717_v26 = vpop.f32.mrb[5].mxu1 }
 0x1da   : > { %v718_v27 = vadd.f32 %v1367_v10, %v717_v26  ;;  %v1503_v28 = vpop.f32.mrb[6].mxu1 }
 0x1db   : > { %v1382_v29 = vmul.f32 -1.442695, %v726_v25  ;;  %v729_v30 = vadd.f32 %v1503_v28, %v1367_v10  ;;  %v720_v31 = vpop.f32.mrb[7].mxu1 }
 0x1dc   : > { %v1380_v32 = vmul.f32 -1.442695, %v718_v27  ;;  %v721_v33 = vadd.f32 %v1367_v10, %v720_v31 }
 0x1dd   : > { %1674 = vpow2.f32 %v1382_v29  ;;  %v1383_v34 = vmul.f32 -1.442695, %v729_v30 }
 0x1de   : > { %1676 = vpow2.f32 %v1380_v32  ;;  %v1381_v35 = vmul.f32 -1.442695, %v721_v33 }
 0x1df   : > { %v1667_v36 = vpop.eup %1666  ;;  %1678 = vpow2.f32 %v1383_v34 }
 0x1e0   : > { %v1669_v37 = vpop.eup %1668  ;;  %v758_v38 = vadd.f32 1.0, %v1667_v36  ;;  %1680 = vpow2.f32 %v1381_v35 }
 0x1e1   : > { %v1671_v39 = vpop.eup %1670  ;;  %v756_v44 = vadd.f32 1.0, %v1669_v37 }
 0x1e2   : > { %v1673_v45 = vpop.eup %1672  ;;  %1682 = vrcp.f32 %v758_v38  ;;  %v759_v46 = vadd.f32 1.0, %v1671_v39 }
 0x1e3   : > { %1684 = vrcp.f32 %v756_v44  ;;  %v757_v47 = vadd.f32 1.0, %v1673_v45  ;;  %v1658_v45 = vld [vmem:[%s2138_s5 + $0x8] sm:$0xff]  }
 0x1e4   : > { %1686 = vrcp.f32 %v759_v46 }
 0x1e5   : > { %1688 = vrcp.f32 %v757_v47 }
 0x1e7   : > { %v1675_v48 = vpop.eup %1674 }
 0x1e8   : > { %v1677_v49 = vpop.eup %1676  ;;  %v762_v50 = vadd.f32 1.0, %v1675_v48 }
 0x1e9   : > { %v1679_v51 = vpop.eup %1678  ;;  %v760_v52 = vadd.f32 1.0, %v1677_v49  ;;  %v1659_v49 = vld [vmem:[%s2138_s5 + $0x10] sm:$0xff]  }
 0x1ea   : > { %v1681_v53 = vpop.eup %1680  ;;  %1690 = vrcp.f32 %v762_v50  ;;  %v763_v54 = vadd.f32 1.0, %v1679_v51 }
 0x1eb   : > { %1692 = vrcp.f32 %v760_v52  ;;  %v761_v59 = vadd.f32 1.0, %v1681_v53 }
 0x1ec   : > { %v1683_v60 = vpop.eup %1682  ;;  %1694 = vrcp.f32 %v763_v54  ;;  %v1660_v54 = vld [vmem:[%s2138_s5 + $0x18] sm:$0xff]  }
 0x1ed   : > { %v1685_v61 = vpop.eup %1684  ;;  %1696 = vrcp.f32 %v761_v59  ;;  %v782_v0 = vmul.f32 %v1683_v60, %v710_v12  ;;  %v1655_v12 = vld [vmem:[%s2139_s6 + $0x10] sm:$0xff]  }
 0x1ee   : > { %v1687_v62 = vpop.eup %1686  ;;  %v780_v2 = vmul.f32 %v1685_v61, %v702_v15  ;;  %1532 = vmatprep.subr.bf16.mxu1 %v1655_v12  ;;  %v1656_v15 = vld [vmem:[%s2139_s6 + $0x18] sm:$0xff]  }
 0x1ef   : > { %v1689_v63 = vpop.eup %1688  ;;  %v783_v1 = vmul.f32 %v1687_v62, %v713_v18  ;;  %1533 = vmatpush3.bf16.msra.mxu1 %v1655_v12  ;;  %v1657_v18 = vld [vmem:[%s2138_s5] sm:$0xff]  }
 0x1f0   : > { %v781_v3 = vmul.f32 %v1689_v63, %v705_v21  ;;  %1534 = vmatprep.subr.bf16.mxu1 %v1656_v15  ;;  %v1384_v21 = vld [vmem:[%s2142_s9] ss:$0 sm:$0xff] }
 0x1f1   : > { %v789_v4 = vpack.c.bf16 %v783_v1, %v782_v0 }
 0x1f2   : > { %v788_v5 = vpack.c.bf16 %v781_v3, %v780_v2 }
 0x1f3   : > { %1535 = vmatpush3.bf16.msra.mxu1 %v1656_v15 }
 0x1f4   : > { %v1691_v6 = vpop.eup %1690  ;;  %1520 = vmatprep.mubr.bf16.mxu0 %v788_v5  ;;  %1544 = vmatprep.subr.bf16.mxu1 %v1657_v18 }
 0x1f5   : > { %v1693_v10 = vpop.eup %1692  ;;  %1521 = vmatmul.mubr.bf16.vlgmr.msra.gmra.mrb[8].mxu0 %v789_v4  ;;  %v786_v16 = vmul.f32 %v1691_v6, %v726_v25 }
 0x1f6   : > { %v1695_v11 = vpop.eup %1694  ;;  %v784_v19 = vmul.f32 %v1693_v10, %v718_v27 }
 0x1f7   : > { %v1697_v13 = vpop.eup %1696  ;;  %v787_v17 = vmul.f32 %v1695_v11, %v729_v30 }
 0x1f8   : > { %v785_v20 = vmul.f32 %v1697_v13, %v721_v33 }
 0x1f9   : > { %v791_v22 = vpack.c.bf16 %v787_v17, %v786_v16 }
 0x1fa   : > { %v790_v23 = vpack.c.bf16 %v785_v20, %v784_v19 }
 0x1fc   : > { %1524 = vmatprep.mubr.bf16.mxu0 %v790_v23 }
 0x1fd   : > { %1525 = vmatmul.mubr.bf16.gmra.mrb[12].mxu0 %v791_v22 }
 0x2c8   : > { %v1522_v24 = vpop.f32.mrb[8].mxu0 }
 0x2c9   : > { %v906_v25 = vadd.f32 %v1522_v24, %v1384_v21  ;;  %v897_v26 = vpop.f32.mrb[9].mxu0 }
 0x2ca   : > { %v898_v27 = vadd.f32 %v1384_v21, %v897_v26  ;;  %v1523_v28 = vpop.f32.mrb[10].mxu0 }
 0x2cb   : > { %v909_v29 = vadd.f32 %v1523_v28, %v1384_v21  ;;  %v900_v30 = vpop.f32.mrb[11].mxu0  ;;  %v930_v32 = vadd.f32 %v1980_v43, %v906_v25 }
 0x2cc   : > { %v901_v31 = vadd.f32 %v1384_v21, %v900_v30  ;;  %v928_v34 = vadd.f32 %v1976_v41, %v898_v27 }
 0x2cd   : > { %v931_v33 = vadd.f32 %v1974_v40, %v909_v29 }
 0x2ce   : > { %v929_v35 = vadd.f32 %v1978_v42, %v901_v31 }
 0x2cf   : > { %v945_v36 = vpack.c.bf16 %v931_v33, %v930_v32 }
 0x2d0   : > { %v944_v37 = vpack.c.bf16 %v929_v35, %v928_v34  ;;  %v1526_v38 = vpop.f32.mrb[12].mxu0 }
 0x2d1   : > { %v922_v39 = vadd.f32 %v1526_v38, %v1384_v21  ;;  %v913_v44 = vpop.f32.mrb[13].mxu0 }
 0x2d2   : > { %v914_v46 = vadd.f32 %v1384_v21, %v913_v44  ;;  %v1527_v47 = vpop.f32.mrb[14].mxu0  ;;  %1536 = vmatprep.mubr.msk.bf16.mxu1 %vm494_vm0, %v944_v37 }
 0x2d3   : > { %v925_v43 = vadd.f32 %v1527_v47, %v1384_v21  ;;  %v916_v48 = vpop.f32.mrb[15].mxu0  ;;  %1537 = vmatmul.mubr.msk.bf16.vlgmr.msra.gmra.mrb[8].mxu1 %vm494_vm0, %v945_v36  ;;  %v934_v41 = vadd.f32 %v1994_v58, %v922_v39 }
 0x2d4   : > { %v917_v40 = vadd.f32 %v1384_v21, %v916_v48  ;;  %1545 = vmatpush3.bf16.msra.mxu1 %v1657_v18  ;;  %v932_v50 = vadd.f32 %v1990_v56, %v914_v46 }
 0x2d5   : > { %v935_v42 = vadd.f32 %v1988_v55, %v925_v43  ;;  %1546 = vmatprep.subr.bf16.mxu1 %v1658_v45  ;;  %v1413_v55 = vld [vmem:[%s2143_s10] ss:$0 sm:$0xff] }
 0x2d6   : > { %v933_v51 = vadd.f32 %v1992_v57, %v917_v40 }
 0x2d7   : > { %v947_v52 = vpack.c.bf16 %v935_v42, %v934_v41 }
 0x2d8   : > { %v946_v53 = vpack.c.bf16 %v933_v51, %v932_v50  ;;  %1547 = vmatpush3.bf16.msra.mxu1 %v1658_v45 }
 0x2d9   : > { %1548 = vmatprep.subr.bf16.mxu1 %v1659_v49 }
 0x2da   : > { %1540 = vmatprep.mubr.msk.bf16.mxu1 %vm494_vm0, %v946_v53 }
 0x2db   : > { %1541 = vmatmul.mubr.msk.bf16.gmra.mrb[12].mxu1 %vm494_vm0, %v947_v52 }
 0x2dc   : > { %1549 = vmatpush3.bf16.msra.mxu1 %v1659_v49  ;;  %1552 = vmatprep.mubr.msk.bf16.mxu1 %vm494_vm0, %v1943_v7 }
 0x2dd   : > { %1550 = vmatprep.subr.bf16.mxu1 %v1660_v54 }
 0x2e0   : > { %1551 = vmatpush3.bf16.msra.mxu1 %v1660_v54 }
 0x2e3   : > { %1553 = vmatmul.mubr.msk.bf16.vlgmr.msra.gmra.mrb[8].mxu1 %vm494_vm0, %v1945_v8 }
 0x2e4   : > { %1556 = vmatprep.mubr.msk.bf16.mxu1 %vm494_vm0, %v1947_v9 }
 0x2eb   : > { %1557 = vmatmul.mubr.msk.bf16.gmra.mrb[12].mxu1 %vm494_vm0, %v1953_v14 }
 0x3b6   : > { %v1554_v56 = vpop.f32.mrb[8].mxu1 }
 0x3b7   : > { %v1187_v57 = vadd.f32 %v1554_v56, %v1413_v55  ;;  %v1147_v58 = vpop.f32.mrb[9].mxu1 }
 0x3b8   : > { %v1185_v59 = vadd.f32 %v1413_v55, %v1147_v58  ;;  %v1555_v7 = vpop.f32.mrb[10].mxu1 }
 0x3b9   : > { %v1416_v60 = vmul.f32 -1.442695, %v1187_v57  ;;  %v1188_v61 = vadd.f32 %v1555_v7, %v1413_v55  ;;  %v1150_v62 = vpop.f32.mrb[11].mxu1 }
 0x3ba   : > { %v1414_v63 = vmul.f32 -1.442695, %v1185_v59  ;;  %v1186_v8 = vadd.f32 %v1413_v55, %v1150_v62 }
 0x3bb   : > { %1698 = vpow2.f32 %v1416_v60  ;;  %v1417_v0 = vmul.f32 -1.442695, %v1188_v61 }
 0x3bc   : > { %1700 = vpow2.f32 %v1414_v63  ;;  %v1415_v9 = vmul.f32 -1.442695, %v1186_v8 }
 0x3bd   : > { %1702 = vpow2.f32 %v1417_v0 }
 0x3be   : > { %1704 = vpow2.f32 %v1415_v9  ;;  %v1558_v14 = vpop.f32.mrb[12].mxu1 }
 0x3bf   : > { %v1191_v1 = vadd.f32 %v1558_v14, %v1413_v55  ;;  %v1163_v2 = vpop.f32.mrb[13].mxu1 }
 0x3c0   : > { %v1189_v3 = vadd.f32 %v1413_v55, %v1163_v2  ;;  %v1559_v4 = vpop.f32.mrb[14].mxu1 }
 0x3c1   : > { %v1420_v5 = vmul.f32 -1.442695, %v1191_v1  ;;  %v1192_v6 = vadd.f32 %v1559_v4, %v1413_v55  ;;  %v1166_v10 = vpop.f32.mrb[15].mxu1 }
 0x3c2   : > { %v1418_v11 = vmul.f32 -1.442695, %v1189_v3  ;;  %v1190_v13 = vadd.f32 %v1413_v55, %v1166_v10 }
 0x3c3   : > { %1706 = vpow2.f32 %v1420_v5  ;;  %v1421_v16 = vmul.f32 -1.442695, %v1192_v6 }
 0x3c4   : > { %1708 = vpow2.f32 %v1418_v11  ;;  %v1419_v17 = vmul.f32 -1.442695, %v1190_v13 }
 0x3c5   : > { %v1699_v19 = vpop.eup %1698  ;;  %1710 = vpow2.f32 %v1421_v16 }
 0x3c6   : > { %v1701_v20 = vpop.eup %1700  ;;  %v1219_v22 = vadd.f32 1.0, %v1699_v19  ;;  %1712 = vpow2.f32 %v1419_v17 }
 0x3c7   : > { %v1703_v23 = vpop.eup %1702  ;;  %v1217_v12 = vadd.f32 1.0, %v1701_v20 }
 0x3c8   : > { %v1705_v15 = vpop.eup %1704  ;;  %1714 = vrcp.f32 %v1219_v22  ;;  %v1220_v18 = vadd.f32 1.0, %v1703_v23 }
 0x3c9   : > { %1716 = vrcp.f32 %v1217_v12  ;;  %v1218_v21 = vadd.f32 1.0, %v1705_v15 }
 0x3ca   : > { %1718 = vrcp.f32 %v1220_v18 }
 0x3cb   : > { %1720 = vrcp.f32 %v1218_v21 }
 0x3cd   : > { %v1707_v24 = vpop.eup %1706 }
 0x3ce   : > { %v1709_v25 = vpop.eup %1708  ;;  %v1223_v26 = vadd.f32 1.0, %v1707_v24 }
 0x3cf   : > { %v1711_v27 = vpop.eup %1710  ;;  %v1221_v28 = vadd.f32 1.0, %v1709_v25 }
 0x3d0   : > { %v1713_v29 = vpop.eup %1712  ;;  %1722 = vrcp.f32 %v1223_v26  ;;  %v1224_v30 = vadd.f32 1.0, %v1711_v27 }
 0x3d1   : > { %1724 = vrcp.f32 %v1221_v28  ;;  %v1222_v31 = vadd.f32 1.0, %v1713_v29 }
 0x3d2   : > { %v1715_v32 = vpop.eup %1714  ;;  %1726 = vrcp.f32 %v1224_v30 }
 0x3d3   : > { %v1717_v33 = vpop.eup %1716  ;;  %v1243_v34 = vmul.f32 %v1715_v32, %v1187_v57  ;;  %1728 = vrcp.f32 %v1222_v31 }
 0x3d4   : > { %v1719_v35 = vpop.eup %1718  ;;  %v1241_v36 = vmul.f32 %v1717_v33, %v1185_v59 }
 0x3d5   : > { %v1721_v37 = vpop.eup %1720  ;;  %1251 = vst [vmem:[%s396_s13 + $0x10] sm:$0xff] %v1243_v34  ;;  %v1244_v38 = vmul.f32 %v1719_v35, %v1188_v61 }
 0x3d6   : > { %1249 = vst [vmem:[%s396_s13] sm:$0xff] %v1241_v36  ;;  %v1242_v39 = vmul.f32 %v1721_v37, %v1186_v8 }
 0x3d7   : > { %1252 = vst [vmem:[%s396_s13 + $0x18] sm:$0xff] %v1244_v38 }
 0x3d8   : > { %1250 = vst [vmem:[%s396_s13 + $0x8] sm:$0xff] %v1242_v39 }
 0x3da   : > { %v1723_v44 = vpop.eup %1722 }
 0x3db   : > { %v1725_v45 = vpop.eup %1724  ;;  %v1247_v46 = vmul.f32 %v1723_v44, %v1191_v1 }
 0x3dc   : > { %v1727_v47 = vpop.eup %1726  ;;  %v1245_v43 = vmul.f32 %v1725_v45, %v1189_v3 }
 0x3dd   : > { %v1729_v48 = vpop.eup %1728  ;;  %1255 = vst [vmem:[%s396_s13 + $0x30] sm:$0xff] %v1247_v46  ;;  %v1248_v40 = vmul.f32 %v1727_v47, %v1192_v6 }
 0x3de   : > { %1253 = vst [vmem:[%s396_s13 + $0x20] sm:$0xff] %v1245_v43  ;;  %v1246_v41 = vmul.f32 %v1729_v48, %v1190_v13 }
 0x3df   : > { %1256 = vst [vmem:[%s396_s13 + $0x38] sm:$0xff] %v1248_v40 }
 0x3e0   : > { %1254 = vst [vmem:[%s396_s13 + $0x28] sm:$0xff] %v1246_v41 }
 0x3e1   : > { %1751 = shalt.err (!%p1748_p3)
}
 0x3e2   : > { %s1752_s29 = scalar_lea.hbm %s2086_s12, 1024  ;;  %s1756_s16 = scalar_lea.hbm %s2144_s11, 2048 }
 0x3e3   : > { %p1753_p4 = scmp.ne.s32.totalorder %s2086_s12, %s1752_s29  ;;  %p1757_p9 = scmp.lt.u32.totalorder %s2086_s12, %s2144_s11 }
 0x3e4   : > { %p1758_p10 = scmp.lt.u32.totalorder %s1756_s16, %s1752_s29  ;;  %p1760_p12 = scmp.lt.u32.totalorder %s1752_s29, %s2086_s12 }
 0x3e5   : > { %p1754_p7 = pnand %p1753_p4, %p1904_p5 }
 0x3e6   : > { %p1759_p11 = por %p1758_p10, %p1757_p9 }
 0x3e7   : > { %p1755_p8 = pneg %p1754_p7 }
 0x3e8   : > { %p1761_p13 = por %p1760_p12, %p1759_p11 }
 0x3ea   : > { %p1762_p0 = pnand %p1761_p13, %p1755_p8 }
 0x3ec   : > { %1765 = shalt.err (!%p1762_p0)
}
 0x3ed   : > { %s1804_s22 = smov 128   ;;  %s1805_s25 = smov 8  }
 0x3ee   : > { %1568 = dma.vmem_to_hbm [thread:$0]  (%p1904_p5), %s2088_s15, 1024, %s2086_s12, %s2092_s21, %s1804_s22, %s1804_s22, %s1805_s25  }
 0x3ef PF: > { %p1574_p1 = scmp.ge.s32.totalorder %s1800_s20, 2  ;;  %s1286_s30 = sand.u32 1, %s1788_s17  }
 0x3f0   : > { %s1287_s29 = scalar_lea.sflag [#allocation3], %s1286_s30 }
 0x3f1   : > { %p1571_p2 = pnand %p1574_p1, %p1908_p6 }
 0x3f3   : > { %1783 = dma.done.wait (!%p1571_p2), %s1287_s29, 1024  }
 0x3f4   : > { %1785 = vsyncadd (!%p1571_p2), %s1287_s29, 4294966272  ;;  %s2148_s13 = sld [smem:[#allocation5_spill]]  ;;  %p21_p3 = scmp.ge.s32.totalorder %s1891_s23, 4  }
 0x3f5   : > { %s2149_s17 = smov %s1792_s18  ;;  %s2150_s18 = smov %s1796_s19 }
 0x3f6   : > { %s2152_s20 = smov %s1891_s23  ;;  %23 = sbr.rel (!%p21_p3) target bundleno = 3 (0x3), region = 102 }
 0x3fa   : > { %s2151_s19 = smov %s2148_s13 }
 0x3fd   :  { %1292 = vsyncpa [#allocation3], 1 }
 0x3fe   :  { %1294 = vsyncpa [#allocation3 + $0x1], 1 }

// kernel: psa_forward.5
= control target key start
LH: loop header
LB: loop body
LE: loop exit
PB: predicated region body
PF: predicated region fallthrough
CT: control target
= control target key end

     0   :  { %s3907_s9 = smov 0   ;;  %s3909_s10 = smov 0   ;;  %s4860_s0 = inlined_call_operand.vmem [shape: bf16[2,64,1,128], index: 0, kind: input, shape index: {}, may-alias: {0,1}]   ;;  %s4861_s1 = inlined_call_operand.vmem [shape: bf16[2,64,1,128], index: 1, kind: input, shape index: {}, may-alias: {0,1}]   ;;  %s4862_s2 = inlined_call_operand.vmem [shape: bf16[2,64,1,64], index: 2, kind: output, shape index: {}]  }
   0x1   :  { %s3911_s11 = smov 0  }
   0x2 LB: > { %s24_s12 = sadd.s32 1, %s3883_s10  ;;  %p3576_p0 = scmp.ge.s32.totalorder %s3887_s11, 1  ;;  %s3887_s11 = sphi %s3911_s11, %s12_s11   ;;  %s3883_s10 = sphi %s3909_s10, %s4866_s10   ;;  %s3879_s9 = sphi %s3907_s9, %s4865_s9  }
   0x3   : > { %p26_p1 = scmp.ge.s32.totalorder %s24_s12, 2  ;;  %p141_p2 = scmp.lt.s32.totalorder %s3887_s11, 3 }
   0x5   : > { %s4868_s12 = smov (%p26_p1, %s24_s12), 0  ;;  %p142_p3 = pnand %p3576_p0, %p141_p2 }
   0x6   : > { %p174_p4 = scmp.lt.s32.totalorder (!%p142_p3), %s3879_s9, 1  ;;  %v398_v0 = vlaneseq (!%p142_p3)  ;;  %v3889_v1 = vmov (!%p142_p3), 1966171168   ;;  %vm1349_vm0 = vcmask (!%p142_p3), 1041409   ;;  %vm1352_vm1 = vcmask (!%p142_p3), 1042434   ;;  %s3890_s17 = smov (!%p142_p3), 96  }
   0x7   : > { %145 = sbr.rel (%p142_p3) target bundleno = 1043 (0x413), region = 28  ;;  %v396_v2 = vunpack.c.l.s4 (!%p142_p3), %v3889_v1  ;;  %vm1355_vm2 = vcmask (!%p142_p3), 1043459   ;;  %vm1358_vm3 = vcmask (!%p142_p3), 1044484   ;;  %vm1361_vm4 = vcmask (!%p142_p3), 1045509   ;;  %s3891_s21 = smov (!%p142_p3), 64  }
   0x8   : > { %v399_v3 = vshrl.u32 (!%p142_p3), %v398_v0, 7  ;;  %vm1364_vm5 = vcmask (!%p142_p3), 1046534   ;;  %vm1367_vm6 = vcmask (!%p142_p3), 1047559   ;;  %vm2619_vm7 = vcmask (!%p142_p3), 261120  }
   0x9   : > { %v397_v4 = vunpack.c.0.s8 (!%p142_p3), %v396_v2  ;;  %vm2709_vm8 = vcmask (!%p142_p3), 523264   ;;  %vm3287_vm9 = vcmask (!%p142_p3), 516096   ;;  %vm3288_vm10 = vsmask.f32 (!%p142_p3), 256 }
   0xa   : > { %vm4458_vm11 = vmand (!%p142_p3), %vm3287_vm9, %vm3288_vm10 }
   0xb   : > { %v3933_v5 = vsub.s32 (!%p142_p3), %v397_v4, %v399_v3 }
   0xe   : > { %s4870_s9 = smov (!%p174_p4, %s3879_s9), 1 }
   0xf   : > { %s3925_s13 = sshll.u32 %s4870_s9, 6 }
  0x10   : > { %s3931_s16 = scalar_lea.vmem %s4861_s1, %s3925_s13  ;;  %s4124_s20 = scalar_lea.vmem %s4860_s0, %s3925_s13 }
  0x11   : > { %v3644_v6 = vld.sshfl [vmem:[%s3931_s16] sm:$0x1 pattern:$0x75316420]  ;;  %s4431_s24 = scalar_lea.vmem %s4862_s2, %s3925_s13 }
  0x12   : > { %v3645_v7 = vld.sshfl [vmem:[%s3931_s16 + $0x1] sm:$0x1 pattern:$0x75316420]  ;;  %v1548_v8 = vrot.slane %v3644_v6, %v3933_v5 }
  0x13   : > { %v3646_v9 = vld.sshfl [vmem:[%s3931_s16 + $0x2] sm:$0x1 pattern:$0x75316420]  ;;  %v1562_v10 = vrot.slane %v3645_v7, %v3933_v5 }
  0x14   : > { %v3647_v11 = vld.sshfl [vmem:[%s3931_s16 + $0x3] sm:$0x1 pattern:$0x75316420]  ;;  %v1576_v12 = vrot.slane %v3646_v9, %v3933_v5  ;;  %v2431_v15 = vunpack.c.l.b16 %v1548_v8 }
  0x15   : > { %v3648_v13 = vld.sshfl [vmem:[%s3931_s16 + $0x4] sm:$0x1 pattern:$0x75316420]  ;;  %v1590_v14 = vrot.slane %v3647_v11, %v3933_v5  ;;  %v2432_v16 = vunpack.c.l.b16 %v1562_v10 }
  0x16   : > { %v3649_v17 = vld.sshfl [vmem:[%s3931_s16 + $0x5] sm:$0x1 pattern:$0x75316420]  ;;  %v1604_v18 = vrot.slane %v3648_v13, %v3933_v5  ;;  %v2433_v19 = vunpack.c.l.b16 %v1576_v12 }
  0x17   : > { %v3650_v20 = vld.sshfl [vmem:[%s3931_s16 + $0x6] sm:$0x1 pattern:$0x75316420]  ;;  %v1618_v21 = vrot.slane %v3649_v17, %v3933_v5  ;;  %v2434_v22 = vunpack.c.l.b16 %v1590_v14  ;;  %v2495_v23 = vrot.slane %v2432_v16, 7 }
  0x18   : > { %v3651_v24 = vld.sshfl [vmem:[%s3931_s16 + $0x7] sm:$0x1 pattern:$0x75316420]  ;;  %v1632_v25 = vrot.slane %v3650_v20, %v3933_v5  ;;  %v2435_v26 = vunpack.c.l.b16 %v1604_v18  ;;  %v2497_v27 = vrot.slane %v2433_v19, 6 }
  0x19   : > { %v3652_v28 = vld.sshfl [vmem:[%s3931_s16 + $0x8] sm:$0x1 pattern:$0x75316420]  ;;  %v1646_v29 = vrot.slane %v3651_v24, %v3933_v5  ;;  %v2436_v30 = vunpack.c.l.b16 %v1618_v21  ;;  %v2496_v31 = vsel %vm1349_vm0, %v2495_v23, %v2431_v15  ;;  %v2499_v32 = vrot.slane %v2434_v22, 5 }
  0x1a   : > { %v3653_v33 = vld.sshfl [vmem:[%s3931_s16 + $0x9] sm:$0x1 pattern:$0x75316420]  ;;  %v1660_v34 = vrot.slane %v3652_v28, %v3933_v5  ;;  %v2437_v35 = vunpack.c.l.b16 %v1632_v25  ;;  %v2498_v36 = vsel %vm1352_vm1, %v2497_v27, %v2496_v31  ;;  %v2501_v37 = vrot.slane %v2435_v26, 4 }
  0x1b   : > { %v3654_v38 = vld.sshfl [vmem:[%s3931_s16 + $0xa] sm:$0x1 pattern:$0x75316420]  ;;  %v1674_v39 = vrot.slane %v3653_v33, %v3933_v5  ;;  %v2438_v40 = vunpack.c.l.b16 %v1646_v29  ;;  %v2500_v41 = vsel %vm1355_vm2, %v2499_v32, %v2498_v36  ;;  %v2503_v42 = vrot.slane %v2436_v30, 3 }
  0x1c   : > { %v3655_v43 = vld.sshfl [vmem:[%s3931_s16 + $0xb] sm:$0x1 pattern:$0x75316420]  ;;  %v1688_v44 = vrot.slane %v3654_v38, %v3933_v5  ;;  %v2439_v45 = vunpack.c.l.b16 %v1660_v34  ;;  %v2502_v46 = vsel %vm1358_vm3, %v2501_v37, %v2500_v41  ;;  %v2505_v47 = vrot.slane %v2437_v35, 2 }
  0x1d   : > { %v3656_v48 = vld.sshfl [vmem:[%s3931_s16 + $0xc] sm:$0x1 pattern:$0x75316420]  ;;  %v1702_v49 = vrot.slane %v3655_v43, %v3933_v5  ;;  %v2440_v50 = vunpack.c.l.b16 %v1674_v39  ;;  %v2504_v51 = vsel %vm1361_vm4, %v2503_v42, %v2502_v46  ;;  %v2507_v52 = vrot.slane %v2438_v40, 1 }
  0x1e   : > { %v3657_v53 = vld.sshfl [vmem:[%s3931_s16 + $0xd] sm:$0x1 pattern:$0x75316420]  ;;  %v1716_v54 = vrot.slane %v3656_v48, %v3933_v5  ;;  %v2441_v55 = vunpack.c.l.b16 %v1688_v44  ;;  %v2506_v56 = vsel %vm1364_vm5, %v2505_v47, %v2504_v51 }
  0x1f   : > { %v3658_v57 = vld.sshfl [vmem:[%s3931_s16 + $0xe] sm:$0x1 pattern:$0x75316420]  ;;  %v1730_v58 = vrot.slane %v3657_v53, %v3933_v5  ;;  %v2442_v59 = vunpack.c.l.b16 %v1702_v49  ;;  %v2509_v60 = vrot.slane %v2440_v50, 7  ;;  %v2508_v0 = vsel %vm1367_vm6, %v2507_v52, %v2506_v56 }
  0x20   : > { %v3659_v61 = vld.sshfl [vmem:[%s3931_s16 + $0xf] sm:$0x1 pattern:$0x75316420]  ;;  %v1744_v62 = vrot.slane %v3658_v57, %v3933_v5  ;;  %v2443_v63 = vunpack.c.l.b16 %v1716_v54  ;;  %v2511_v1 = vrot.slane %v2441_v55, 6 }
  0x21   : > { %v1758_v2 = vrot.slane %v3659_v61, %v3933_v5  ;;  %v2444_v3 = vunpack.c.l.b16 %v1730_v58  ;;  %v2510_v4 = vsel %vm1349_vm0, %v2509_v60, %v2439_v45  ;;  %v2513_v6 = vrot.slane %v2442_v59, 5  ;;  %v3660_v7 = vld.sshfl [vmem:[%s3931_s16 + $0x10] sm:$0x1 pattern:$0x75316420] }
  0x22   : > { %v2445_v8 = vunpack.c.l.b16 %v1744_v62  ;;  %v2512_v9 = vsel %vm1352_vm1, %v2511_v1, %v2510_v4  ;;  %v2515_v10 = vrot.slane %v2443_v63, 4  ;;  %v3661_v11 = vld.sshfl [vmem:[%s3931_s16 + $0x11] sm:$0x1 pattern:$0x75316420]  ;;  %v1772_v12 = vrot.slane %v3660_v7, %v3933_v5 }
  0x23   : > { %v2446_v13 = vunpack.c.l.b16 %v1758_v2  ;;  %v2514_v14 = vsel %vm1355_vm2, %v2513_v6, %v2512_v9  ;;  %v2517_v15 = vrot.slane %v2444_v3, 3  ;;  %v3662_v16 = vld.sshfl [vmem:[%s3931_s16 + $0x12] sm:$0x1 pattern:$0x75316420]  ;;  %v1786_v17 = vrot.slane %v3661_v11, %v3933_v5 }
  0x24   : > { %v2516_v18 = vsel %vm1358_vm3, %v2515_v10, %v2514_v14  ;;  %v2519_v19 = vrot.slane %v2445_v8, 2  ;;  %v3663_v20 = vld.sshfl [vmem:[%s3931_s16 + $0x13] sm:$0x1 pattern:$0x75316420]  ;;  %v1800_v21 = vrot.slane %v3662_v16, %v3933_v5  ;;  %v2447_v22 = vunpack.c.l.b16 %v1772_v12 }
  0x25   : > { %v2518_v23 = vsel %vm1361_vm4, %v2517_v15, %v2516_v18  ;;  %v2521_v24 = vrot.slane %v2446_v13, 1  ;;  %v3664_v25 = vld.sshfl [vmem:[%s3931_s16 + $0x14] sm:$0x1 pattern:$0x75316420]  ;;  %v1814_v26 = vrot.slane %v3663_v20, %v3933_v5  ;;  %v2448_v27 = vunpack.c.l.b16 %v1786_v17 }
  0x26   : > { %v2520_v28 = vsel %vm1364_vm5, %v2519_v19, %v2518_v23  ;;  %v3665_v29 = vld.sshfl [vmem:[%s3931_s16 + $0x15] sm:$0x1 pattern:$0x75316420]  ;;  %v1828_v30 = vrot.slane %v3664_v25, %v3933_v5  ;;  %v2449_v31 = vunpack.c.l.b16 %v1800_v21 }
  0x27   : > { %v2522_v32 = vsel %vm1367_vm6, %v2521_v24, %v2520_v28  ;;  %v3666_v33 = vld.sshfl [vmem:[%s3931_s16 + $0x16] sm:$0x1 pattern:$0x75316420]  ;;  %v1842_v34 = vrot.slane %v3665_v29, %v3933_v5  ;;  %v2450_v35 = vunpack.c.l.b16 %v1814_v26  ;;  %v2523_v36 = vrot.slane %v2448_v27, 7 }
  0x28   : > { %v3994_v37 = vpack.c.b16 %v2522_v32, %v2508_v0  ;;  %v3667_v38 = vld.sshfl [vmem:[%s3931_s16 + $0x17] sm:$0x1 pattern:$0x75316420]  ;;  %v1856_v39 = vrot.slane %v3666_v33, %v3933_v5  ;;  %v2451_v40 = vunpack.c.l.b16 %v1828_v30  ;;  %v2525_v41 = vrot.slane %v2449_v31, 6 }
  0x29   : > { %v3668_v42 = vld.sshfl [vmem:[%s3931_s16 + $0x18] sm:$0x1 pattern:$0x75316420]  ;;  %v1870_v43 = vrot.slane %v3667_v38, %v3933_v5  ;;  %v2452_v44 = vunpack.c.l.b16 %v1842_v34  ;;  %v2524_v45 = vsel %vm1349_vm0, %v2523_v36, %v2447_v22  ;;  %v2527_v46 = vrot.slane %v2450_v35, 5 }
  0x2a   : > { %2611 = vrot.lane.b32.xlu0 %v3994_v37, %s3890_s17  ;;  %v3669_v47 = vld.sshfl [vmem:[%s3931_s16 + $0x19] sm:$0x1 pattern:$0x75316420]  ;;  %v1884_v48 = vrot.slane %v3668_v42, %v3933_v5  ;;  %v2453_v49 = vunpack.c.l.b16 %v1856_v39  ;;  %v2526_v50 = vsel %vm1352_vm1, %v2525_v41, %v2524_v45  ;;  %v2529_v51 = vrot.slane %v2451_v40, 4 }
  0x2b   : > { %v3670_v52 = vld.sshfl [vmem:[%s3931_s16 + $0x1a] sm:$0x1 pattern:$0x75316420]  ;;  %v1898_v53 = vrot.slane %v3669_v47, %v3933_v5  ;;  %v2454_v54 = vunpack.c.l.b16 %v1870_v43  ;;  %v2528_v55 = vsel %vm1355_vm2, %v2527_v46, %v2526_v50  ;;  %v2531_v56 = vrot.slane %v2452_v44, 3 }
  0x2c   : > { %v3671_v57 = vld.sshfl [vmem:[%s3931_s16 + $0x1b] sm:$0x1 pattern:$0x75316420]  ;;  %v1912_v58 = vrot.slane %v3670_v52, %v3933_v5  ;;  %v2455_v59 = vunpack.c.l.b16 %v1884_v48  ;;  %v2530_v60 = vsel %vm1358_vm3, %v2529_v51, %v2528_v55  ;;  %v2533_v61 = vrot.slane %v2453_v49, 2 }
  0x2d   : > { %v3672_v62 = vld.sshfl [vmem:[%s3931_s16 + $0x1c] sm:$0x1 pattern:$0x75316420]  ;;  %v1926_v63 = vrot.slane %v3671_v57, %v3933_v5  ;;  %v2456_v0 = vunpack.c.l.b16 %v1898_v53  ;;  %v2532_v1 = vsel %vm1361_vm4, %v2531_v56, %v2530_v60  ;;  %v2535_v2 = vrot.slane %v2454_v54, 1 }
  0x2e   : > { %v3673_v3 = vld.sshfl [vmem:[%s3931_s16 + $0x1d] sm:$0x1 pattern:$0x75316420]  ;;  %v1940_v4 = vrot.slane %v3672_v62, %v3933_v5  ;;  %v2457_v6 = vunpack.c.l.b16 %v1912_v58  ;;  %v2534_v7 = vsel %vm1364_vm5, %v2533_v61, %v2532_v1 }
  0x2f   : > { %v3674_v8 = vld.sshfl [vmem:[%s3931_s16 + $0x1e] sm:$0x1 pattern:$0x75316420]  ;;  %v1954_v9 = vrot.slane %v3673_v3, %v3933_v5  ;;  %v2458_v10 = vunpack.c.l.b16 %v1926_v63  ;;  %v2537_v11 = vrot.slane %v2456_v0, 7  ;;  %v2536_v15 = vsel %vm1367_vm6, %v2535_v2, %v2534_v7 }
  0x30   : > { %v3675_v12 = vld.sshfl [vmem:[%s3931_s16 + $0x1f] sm:$0x1 pattern:$0x75316420]  ;;  %v1968_v13 = vrot.slane %v3674_v8, %v3933_v5  ;;  %v2459_v14 = vunpack.c.l.b16 %v1940_v4  ;;  %v2539_v16 = vrot.slane %v2457_v6, 6 }
  0x31   : > { %v1982_v17 = vrot.slane %v3675_v12, %v3933_v5  ;;  %v2460_v18 = vunpack.c.l.b16 %v1954_v9  ;;  %v2538_v19 = vsel %vm1349_vm0, %v2537_v11, %v2455_v59  ;;  %v2541_v20 = vrot.slane %v2458_v10, 5  ;;  %v3676_v21 = vld.sshfl [vmem:[%s3931_s16 + $0x20] sm:$0x1 pattern:$0x75316420] }
  0x32   : > { %v2461_v22 = vunpack.c.l.b16 %v1968_v13  ;;  %v2540_v23 = vsel %vm1352_vm1, %v2539_v16, %v2538_v19  ;;  %v2543_v24 = vrot.slane %v2459_v14, 4  ;;  %v3677_v25 = vld.sshfl [vmem:[%s3931_s16 + $0x21] sm:$0x1 pattern:$0x75316420]  ;;  %v1996_v26 = vrot.slane %v3676_v21, %v3933_v5 }
  0x33   : > { %v2462_v27 = vunpack.c.l.b16 %v1982_v17  ;;  %v2542_v28 = vsel %vm1355_vm2, %v2541_v20, %v2540_v23  ;;  %v2545_v29 = vrot.slane %v2460_v18, 3  ;;  %v3678_v30 = vld.sshfl [vmem:[%s3931_s16 + $0x22] sm:$0x1 pattern:$0x75316420]  ;;  %v2010_v31 = vrot.slane %v3677_v25, %v3933_v5 }
  0x34   : > { %v2544_v32 = vsel %vm1358_vm3, %v2543_v24, %v2542_v28  ;;  %v2547_v33 = vrot.slane %v2461_v22, 2  ;;  %v3679_v34 = vld.sshfl [vmem:[%s3931_s16 + $0x23] sm:$0x1 pattern:$0x75316420]  ;;  %v2024_v35 = vrot.slane %v3678_v30, %v3933_v5  ;;  %v2463_v36 = vunpack.c.l.b16 %v1996_v26 }
  0x35   : > { %v2546_v38 = vsel %vm1361_vm4, %v2545_v29, %v2544_v32  ;;  %v2549_v39 = vrot.slane %v2462_v27, 1  ;;  %v3680_v40 = vld.sshfl [vmem:[%s3931_s16 + $0x24] sm:$0x1 pattern:$0x75316420]  ;;  %v2038_v41 = vrot.slane %v3679_v34, %v3933_v5  ;;  %v2464_v42 = vunpack.c.l.b16 %v2010_v31 }
  0x36   : > { %v2548_v43 = vsel %vm1364_vm5, %v2547_v33, %v2546_v38  ;;  %v3681_v44 = vld.sshfl [vmem:[%s3931_s16 + $0x25] sm:$0x1 pattern:$0x75316420]  ;;  %v2052_v45 = vrot.slane %v3680_v40, %v3933_v5  ;;  %v2465_v46 = vunpack.c.l.b16 %v2024_v35 }
  0x37   : > { %v2550_v47 = vsel %vm1367_vm6, %v2549_v39, %v2548_v43  ;;  %v3682_v48 = vld.sshfl [vmem:[%s3931_s16 + $0x26] sm:$0x1 pattern:$0x75316420]  ;;  %v2066_v49 = vrot.slane %v3681_v44, %v3933_v5  ;;  %v2466_v50 = vunpack.c.l.b16 %v2038_v41  ;;  %v2551_v51 = vrot.slane %v2464_v42, 7 }
  0x38   : > { %v4044_v52 = vpack.c.b16 %v2550_v47, %v2536_v15  ;;  %v3683_v53 = vld.sshfl [vmem:[%s3931_s16 + $0x27] sm:$0x1 pattern:$0x75316420]  ;;  %v2080_v54 = vrot.slane %v3682_v48, %v3933_v5  ;;  %v2467_v55 = vunpack.c.l.b16 %v2052_v45  ;;  %v2553_v56 = vrot.slane %v2465_v46, 6 }
  0x39   : > { %v3684_v57 = vld.sshfl [vmem:[%s3931_s16 + $0x28] sm:$0x1 pattern:$0x75316420]  ;;  %v2094_v58 = vrot.slane %v3683_v53, %v3933_v5  ;;  %v2468_v59 = vunpack.c.l.b16 %v2066_v49  ;;  %v2552_v60 = vsel %vm1349_vm0, %v2551_v51, %v2463_v36  ;;  %v2555_v61 = vrot.slane %v2466_v50, 5 }
  0x3a   : > { %2613 = vrot.lane.b32.xlu0 %v4044_v52, %s3890_s17  ;;  %v3685_v62 = vld.sshfl [vmem:[%s3931_s16 + $0x29] sm:$0x1 pattern:$0x75316420]  ;;  %v2108_v63 = vrot.slane %v3684_v57, %v3933_v5  ;;  %v2469_v0 = vunpack.c.l.b16 %v2080_v54  ;;  %v2554_v1 = vsel %vm1352_vm1, %v2553_v56, %v2552_v60  ;;  %v2557_v2 = vrot.slane %v2467_v55, 4 }
  0x3b   : > { %v3686_v3 = vld.sshfl [vmem:[%s3931_s16 + $0x2a] sm:$0x1 pattern:$0x75316420]  ;;  %v2122_v4 = vrot.slane %v3685_v62, %v3933_v5  ;;  %v2470_v6 = vunpack.c.l.b16 %v2094_v58  ;;  %v2556_v7 = vsel %vm1355_vm2, %v2555_v61, %v2554_v1  ;;  %v2559_v8 = vrot.slane %v2468_v59, 3 }
  0x3c   : > { %v3687_v9 = vld.sshfl [vmem:[%s3931_s16 + $0x2b] sm:$0x1 pattern:$0x75316420]  ;;  %v2136_v10 = vrot.slane %v3686_v3, %v3933_v5  ;;  %v2471_v11 = vunpack.c.l.b16 %v2108_v63  ;;  %v2558_v12 = vsel %vm1358_vm3, %v2557_v2, %v2556_v7  ;;  %v2561_v13 = vrot.slane %v2469_v0, 2 }
  0x3d   : > { %v3688_v14 = vld.sshfl [vmem:[%s3931_s16 + $0x2c] sm:$0x1 pattern:$0x75316420]  ;;  %v2150_v15 = vrot.slane %v3687_v9, %v3933_v5  ;;  %v2472_v16 = vunpack.c.l.b16 %v2122_v4  ;;  %v2560_v17 = vsel %vm1361_vm4, %v2559_v8, %v2558_v12  ;;  %v2563_v18 = vrot.slane %v2470_v6, 1 }
  0x3e   : > { %v3689_v19 = vld.sshfl [vmem:[%s3931_s16 + $0x2d] sm:$0x1 pattern:$0x75316420]  ;;  %v2164_v20 = vrot.slane %v3688_v14, %v3933_v5  ;;  %v2473_v21 = vunpack.c.l.b16 %v2136_v10  ;;  %v2562_v22 = vsel %vm1364_vm5, %v2561_v13, %v2560_v17 }
  0x3f   : > { %v3690_v23 = vld.sshfl [vmem:[%s3931_s16 + $0x2e] sm:$0x1 pattern:$0x75316420]  ;;  %v2178_v24 = vrot.slane %v3689_v19, %v3933_v5  ;;  %v2474_v25 = vunpack.c.l.b16 %v2150_v15  ;;  %v2565_v26 = vrot.slane %v2472_v16, 7  ;;  %v2564_v30 = vsel %vm1367_vm6, %v2563_v18, %v2562_v22 }
  0x40   : > { %v3691_v27 = vld.sshfl [vmem:[%s3931_s16 + $0x2f] sm:$0x1 pattern:$0x75316420]  ;;  %v2192_v28 = vrot.slane %v3690_v23, %v3933_v5  ;;  %v2475_v29 = vunpack.c.l.b16 %v2164_v20  ;;  %v2567_v31 = vrot.slane %v2473_v21, 6 }
  0x41   : > { %v2206_v32 = vrot.slane %v3691_v27, %v3933_v5  ;;  %v2476_v33 = vunpack.c.l.b16 %v2178_v24  ;;  %v2566_v34 = vsel %vm1349_vm0, %v2565_v26, %v2471_v11  ;;  %v2569_v35 = vrot.slane %v2474_v25, 5  ;;  %v3692_v36 = vld.sshfl [vmem:[%s3931_s16 + $0x30] sm:$0x1 pattern:$0x75316420] }
  0x42   : > { %v2477_v38 = vunpack.c.l.b16 %v2192_v28  ;;  %v2568_v39 = vsel %vm1352_vm1, %v2567_v31, %v2566_v34  ;;  %v2571_v40 = vrot.slane %v2475_v29, 4  ;;  %v3693_v41 = vld.sshfl [vmem:[%s3931_s16 + $0x31] sm:$0x1 pattern:$0x75316420]  ;;  %v2220_v42 = vrot.slane %v3692_v36, %v3933_v5 }
  0x43   : > { %v2478_v43 = vunpack.c.l.b16 %v2206_v32  ;;  %v2570_v44 = vsel %vm1355_vm2, %v2569_v35, %v2568_v39  ;;  %v2573_v45 = vrot.slane %v2476_v33, 3  ;;  %v3694_v46 = vld.sshfl [vmem:[%s3931_s16 + $0x32] sm:$0x1 pattern:$0x75316420]  ;;  %v2234_v47 = vrot.slane %v3693_v41, %v3933_v5 }
  0x44   : > { %v2572_v48 = vsel %vm1358_vm3, %v2571_v40, %v2570_v44  ;;  %v2575_v49 = vrot.slane %v2477_v38, 2  ;;  %v3695_v50 = vld.sshfl [vmem:[%s3931_s16 + $0x33] sm:$0x1 pattern:$0x75316420]  ;;  %v2248_v51 = vrot.slane %v3694_v46, %v3933_v5  ;;  %v2479_v53 = vunpack.c.l.b16 %v2220_v42 }
  0x45   : > { %v2574_v54 = vsel %vm1361_vm4, %v2573_v45, %v2572_v48  ;;  %v2577_v55 = vrot.slane %v2478_v43, 1  ;;  %v3696_v56 = vld.sshfl [vmem:[%s3931_s16 + $0x34] sm:$0x1 pattern:$0x75316420]  ;;  %v2262_v57 = vrot.slane %v3695_v50, %v3933_v5  ;;  %v2480_v58 = vunpack.c.l.b16 %v2234_v47 }
  0x46   : > { %v2576_v59 = vsel %vm1364_vm5, %v2575_v49, %v2574_v54  ;;  %v3697_v60 = vld.sshfl [vmem:[%s3931_s16 + $0x35] sm:$0x1 pattern:$0x75316420]  ;;  %v2276_v61 = vrot.slane %v3696_v56, %v3933_v5  ;;  %v2481_v62 = vunpack.c.l.b16 %v2248_v51 }
  0x47   : > { %v2578_v63 = vsel %vm1367_vm6, %v2577_v55, %v2576_v59  ;;  %v3698_v0 = vld.sshfl [vmem:[%s3931_s16 + $0x36] sm:$0x1 pattern:$0x75316420]  ;;  %v2290_v1 = vrot.slane %v3697_v60, %v3933_v5  ;;  %v2482_v2 = vunpack.c.l.b16 %v2262_v57  ;;  %v2579_v3 = vrot.slane %v2480_v58, 7 }
  0x48   : > { %v4094_v4 = vpack.c.b16 %v2578_v63, %v2564_v30  ;;  %v3699_v6 = vld.sshfl [vmem:[%s3931_s16 + $0x37] sm:$0x1 pattern:$0x75316420]  ;;  %v2304_v7 = vrot.slane %v3698_v0, %v3933_v5  ;;  %v2483_v8 = vunpack.c.l.b16 %v2276_v61  ;;  %v2581_v9 = vrot.slane %v2481_v62, 6 }
  0x49   : > { %v3700_v10 = vld.sshfl [vmem:[%s3931_s16 + $0x38] sm:$0x1 pattern:$0x75316420]  ;;  %v2318_v11 = vrot.slane %v3699_v6, %v3933_v5  ;;  %v2484_v12 = vunpack.c.l.b16 %v2290_v1  ;;  %v2580_v13 = vsel %vm1349_vm0, %v2579_v3, %v2479_v53  ;;  %v2583_v14 = vrot.slane %v2482_v2, 5 }
  0x4a   : > { %2615 = vrot.lane.b32.xlu1 %v4094_v4, %s3890_s17  ;;  %v3701_v15 = vld.sshfl [vmem:[%s3931_s16 + $0x39] sm:$0x1 pattern:$0x75316420]  ;;  %v2332_v16 = vrot.slane %v3700_v10, %v3933_v5  ;;  %v2485_v17 = vunpack.c.l.b16 %v2304_v7  ;;  %v2582_v18 = vsel %vm1352_vm1, %v2581_v9, %v2580_v13  ;;  %v2585_v19 = vrot.slane %v2483_v8, 4 }
  0x4b   : > { %v3702_v20 = vld.sshfl [vmem:[%s3931_s16 + $0x3a] sm:$0x1 pattern:$0x75316420]  ;;  %v2346_v21 = vrot.slane %v3701_v15, %v3933_v5  ;;  %v2486_v22 = vunpack.c.l.b16 %v2318_v11  ;;  %v2584_v23 = vsel %vm1355_vm2, %v2583_v14, %v2582_v18  ;;  %v2587_v24 = vrot.slane %v2484_v12, 3 }
  0x4c   : > { %v3703_v25 = vld.sshfl [vmem:[%s3931_s16 + $0x3b] sm:$0x1 pattern:$0x75316420]  ;;  %v2360_v26 = vrot.slane %v3702_v20, %v3933_v5  ;;  %v2487_v27 = vunpack.c.l.b16 %v2332_v16  ;;  %v2586_v28 = vsel %vm1358_vm3, %v2585_v19, %v2584_v23  ;;  %v2589_v29 = vrot.slane %v2485_v17, 2 }
  0x4d   : > { %v3704_v30 = vld.sshfl [vmem:[%s3931_s16 + $0x3c] sm:$0x1 pattern:$0x75316420]  ;;  %v2374_v31 = vrot.slane %v3703_v25, %v3933_v5  ;;  %v2488_v32 = vunpack.c.l.b16 %v2346_v21  ;;  %v2588_v33 = vsel %vm1361_vm4, %v2587_v24, %v2586_v28  ;;  %v2591_v34 = vrot.slane %v2486_v22, 1 }
  0x4e   : > { %v3705_v35 = vld.sshfl [vmem:[%s3931_s16 + $0x3d] sm:$0x1 pattern:$0x75316420]  ;;  %v2388_v36 = vrot.slane %v3704_v30, %v3933_v5  ;;  %v2489_v38 = vunpack.c.l.b16 %v2360_v26  ;;  %v2590_v39 = vsel %vm1364_vm5, %v2589_v29, %v2588_v33 }
  0x4f   : > { %v3706_v40 = vld.sshfl [vmem:[%s3931_s16 + $0x3e] sm:$0x1 pattern:$0x75316420]  ;;  %v2402_v41 = vrot.slane %v3705_v35, %v3933_v5  ;;  %v2490_v42 = vunpack.c.l.b16 %v2374_v31  ;;  %v2593_v43 = vrot.slane %v2488_v32, 7  ;;  %v2592_v47 = vsel %vm1367_vm6, %v2591_v34, %v2590_v39 }
  0x50   : > { %v3707_v44 = vld.sshfl [vmem:[%s3931_s16 + $0x3f] sm:$0x1 pattern:$0x75316420]  ;;  %v2416_v45 = vrot.slane %v3706_v40, %v3933_v5  ;;  %v2491_v46 = vunpack.c.l.b16 %v2388_v36  ;;  %v2595_v48 = vrot.slane %v2489_v38, 6 }
  0x51   : > { %v2430_v49 = vrot.slane %v3707_v44, %v3933_v5  ;;  %v2492_v50 = vunpack.c.l.b16 %v2402_v41  ;;  %v2594_v51 = vsel %vm1349_vm0, %v2593_v43, %v2487_v27  ;;  %v2597_v53 = vrot.slane %v2490_v42, 5  ;;  %v3580_v54 = vld.sshfl [vmem:[%s4124_s20] sm:$0x1 pattern:$0x75316420] }
  0x52   : > { %v2493_v55 = vunpack.c.l.b16 %v2416_v45  ;;  %v2596_v56 = vsel %vm1352_vm1, %v2595_v48, %v2594_v51  ;;  %v2599_v57 = vrot.slane %v2491_v46, 4  ;;  %v3581_v58 = vld.sshfl [vmem:[%s4124_s20 + $0x1] sm:$0x1 pattern:$0x75316420]  ;;  %v401_v59 = vrot.slane %v3580_v54, %v3933_v5 }
  0x53   : > { %v2494_v60 = vunpack.c.l.b16 %v2430_v49  ;;  %v2598_v61 = vsel %vm1355_vm2, %v2597_v53, %v2596_v56  ;;  %v2601_v62 = vrot.slane %v2492_v50, 3  ;;  %v3582_v63 = vld.sshfl [vmem:[%s4124_s20 + $0x2] sm:$0x1 pattern:$0x75316420]  ;;  %v415_v0 = vrot.slane %v3581_v58, %v3933_v5 }
  0x54   : > { %v2600_v1 = vsel %vm1358_vm3, %v2599_v57, %v2598_v61  ;;  %v2603_v2 = vrot.slane %v2493_v55, 2  ;;  %v3583_v3 = vld.sshfl [vmem:[%s4124_s20 + $0x3] sm:$0x1 pattern:$0x75316420]  ;;  %v429_v6 = vrot.slane %v3582_v63, %v3933_v5  ;;  %v1284_v7 = vunpack.c.l.b16 %v401_v59 }
  0x55   : > { %v2602_v8 = vsel %vm1361_vm4, %v2601_v62, %v2600_v1  ;;  %v2605_v9 = vrot.slane %v2494_v60, 1  ;;  %v3584_v10 = vld.sshfl [vmem:[%s4124_s20 + $0x4] sm:$0x1 pattern:$0x75316420]  ;;  %v443_v11 = vrot.slane %v3583_v3, %v3933_v5  ;;  %v1285_v12 = vunpack.c.l.b16 %v415_v0 }
  0x56   : > { %v2604_v13 = vsel %vm1364_vm5, %v2603_v2, %v2602_v8  ;;  %v3585_v14 = vld.sshfl [vmem:[%s4124_s20 + $0x5] sm:$0x1 pattern:$0x75316420]  ;;  %v457_v15 = vrot.slane %v3584_v10, %v3933_v5  ;;  %v1286_v16 = vunpack.c.l.b16 %v429_v6 }
  0x57   : > { %v2606_v17 = vsel %vm1367_vm6, %v2605_v9, %v2604_v13  ;;  %v3586_v18 = vld.sshfl [vmem:[%s4124_s20 + $0x6] sm:$0x1 pattern:$0x75316420]  ;;  %v471_v19 = vrot.slane %v3585_v14, %v3933_v5  ;;  %v1287_v20 = vunpack.c.l.b16 %v443_v11  ;;  %v1348_v21 = vrot.slane %v1285_v12, 7 }
  0x58   : > { %v4150_v22 = vpack.c.b16 %v2606_v17, %v2592_v47  ;;  %v3587_v23 = vld.sshfl [vmem:[%s4124_s20 + $0x7] sm:$0x1 pattern:$0x75316420]  ;;  %v485_v24 = vrot.slane %v3586_v18, %v3933_v5  ;;  %v1288_v25 = vunpack.c.l.b16 %v457_v15  ;;  %v1351_v26 = vrot.slane %v1286_v16, 6 }
  0x59   : > { %v3588_v27 = vld.sshfl [vmem:[%s4124_s20 + $0x8] sm:$0x1 pattern:$0x75316420]  ;;  %v499_v28 = vrot.slane %v3587_v23, %v3933_v5  ;;  %v1289_v29 = vunpack.c.l.b16 %v471_v19  ;;  %v1350_v30 = vsel %vm1349_vm0, %v1348_v21, %v1284_v7  ;;  %v1354_v31 = vrot.slane %v1287_v20, 5 }
  0x5a   : > { %2617 = vrot.lane.b32.xlu1 %v4150_v22, %s3890_s17  ;;  %v3589_v32 = vld.sshfl [vmem:[%s4124_s20 + $0x9] sm:$0x1 pattern:$0x75316420]  ;;  %v513_v33 = vrot.slane %v3588_v27, %v3933_v5  ;;  %v1290_v34 = vunpack.c.l.b16 %v485_v24  ;;  %v1353_v35 = vsel %vm1352_vm1, %v1351_v26, %v1350_v30  ;;  %v1357_v36 = vrot.slane %v1288_v25, 4 }
  0x5b   : > { %v3590_v38 = vld.sshfl [vmem:[%s4124_s20 + $0xa] sm:$0x1 pattern:$0x75316420]  ;;  %v527_v39 = vrot.slane %v3589_v32, %v3933_v5  ;;  %v1356_v40 = vsel %vm1355_vm2, %v1354_v31, %v1353_v35  ;;  %v1360_v41 = vrot.slane %v1289_v29, 3  ;;  %v1291_v44 = vunpack.c.l.b16 %v499_v28 }
  0x5c   : > { %v3591_v42 = vld.sshfl [vmem:[%s4124_s20 + $0xb] sm:$0x1 pattern:$0x75316420]  ;;  %v541_v43 = vrot.slane %v3590_v38, %v3933_v5  ;;  %v1359_v45 = vsel %vm1358_vm3, %v1357_v36, %v1356_v40  ;;  %v1292_v48 = vunpack.c.l.b16 %v513_v33  ;;  %v1363_v54 = vrot.slane %v1290_v34, 2 }
  0x5d   : > { %v3592_v46 = vld.sshfl [vmem:[%s4124_s20 + $0xc] sm:$0x1 pattern:$0x75316420]  ;;  %v555_v47 = vrot.slane %v3591_v42, %v3933_v5  ;;  %v1293_v49 = vunpack.c.l.b16 %v527_v39  ;;  %v1362_v58 = vsel %vm1361_vm4, %v1360_v41, %v1359_v45  ;;  %v1366_v63 = vrot.slane %v1291_v44, 1 }
  0x5e   : > { %v3593_v50 = vld.sshfl [vmem:[%s4124_s20 + $0xd] sm:$0x1 pattern:$0x75316420]  ;;  %v569_v51 = vrot.slane %v3592_v46, %v3933_v5  ;;  %v1294_v53 = vunpack.c.l.b16 %v541_v43  ;;  %v1365_v8 = vsel %vm1364_vm5, %v1363_v54, %v1362_v58 }
  0x5f   : > { %v3594_v55 = vld.sshfl [vmem:[%s4124_s20 + $0xe] sm:$0x1 pattern:$0x75316420]  ;;  %v583_v56 = vrot.slane %v3593_v50, %v3933_v5  ;;  %v1295_v57 = vunpack.c.l.b16 %v555_v47  ;;  %v1369_v59 = vrot.slane %v1293_v49, 7  ;;  %v1368_v16 = vsel %vm1367_vm6, %v1366_v63, %v1365_v8 }
  0x60   : > { %v3595_v60 = vld.sshfl [vmem:[%s4124_s20 + $0xf] sm:$0x1 pattern:$0x75316420]  ;;  %v597_v61 = vrot.slane %v3594_v55, %v3933_v5  ;;  %v1296_v62 = vunpack.c.l.b16 %v569_v51  ;;  %v1371_v0 = vrot.slane %v1294_v53, 6 }
  0x61   : > { %v611_v1 = vrot.slane %v3595_v60, %v3933_v5  ;;  %v1297_v2 = vunpack.c.l.b16 %v583_v56  ;;  %v1370_v3 = vsel %vm1349_vm0, %v1369_v59, %v1292_v48  ;;  %v1373_v6 = vrot.slane %v1295_v57, 5  ;;  %v3597_v23 = vld.sshfl [vmem:[%s4124_s20 + $0x11] sm:$0x1 pattern:$0x75316420] }
  0x62   : > { %v1298_v7 = vunpack.c.l.b16 %v597_v61  ;;  %v1372_v9 = vsel %vm1352_vm1, %v1371_v0, %v1370_v3  ;;  %v1375_v10 = vrot.slane %v1296_v62, 4  ;;  %v3596_v24 = vld.sshfl [vmem:[%s4124_s20 + $0x10] sm:$0x1 pattern:$0x75316420]  ;;  %v639_v26 = vrot.slane %v3597_v23, %v3933_v5 }
  0x63   : > { %v1299_v11 = vunpack.c.l.b16 %v611_v1  ;;  %v1374_v12 = vsel %vm1355_vm2, %v1373_v6, %v1372_v9  ;;  %v1377_v13 = vrot.slane %v1297_v2, 3  ;;  %v3598_v25 = vld.sshfl [vmem:[%s4124_s20 + $0x12] sm:$0x1 pattern:$0x75316420]  ;;  %v625_v33 = vrot.slane %v3596_v24, %v3933_v5 }
  0x64   : > { %v1376_v14 = vsel %vm1358_vm3, %v1375_v10, %v1374_v12  ;;  %v1379_v15 = vrot.slane %v1298_v7, 2  ;;  %v3605_v27 = vld.sshfl [vmem:[%s4124_s20 + $0x19] sm:$0x1 pattern:$0x75316420]  ;;  %v653_v30 = vrot.slane %v3598_v25, %v3933_v5  ;;  %v1301_v35 = vunpack.c.l.b16 %v639_v26 }
  0x65   : > { %v1378_v17 = vsel %vm1361_vm4, %v1377_v13, %v1376_v14  ;;  %v1381_v18 = vrot.slane %v1299_v11, 1  ;;  %v3599_v29 = vld.sshfl [vmem:[%s4124_s20 + $0x13] sm:$0x1 pattern:$0x75316420]  ;;  %v751_v34 = vrot.slane %v3605_v27, %v3933_v5  ;;  %v1300_v44 = vunpack.c.l.b16 %v625_v33 }
  0x66   : > { %v1380_v19 = vsel %vm1364_vm5, %v1379_v15, %v1378_v17  ;;  %v3606_v32 = vld.sshfl [vmem:[%s4124_s20 + $0x1a] sm:$0x1 pattern:$0x75316420]  ;;  %v667_v39 = vrot.slane %v3599_v29, %v3933_v5  ;;  %v1302_v42 = vunpack.c.l.b16 %v653_v30  ;;  %v1383_v46 = vrot.slane %v1301_v35, 7 }
  0x67   : > { %v1382_v20 = vsel %vm1367_vm6, %v1381_v18, %v1380_v19  ;;  %v3604_v36 = vld.sshfl [vmem:[%s4124_s20 + $0x18] sm:$0x1 pattern:$0x75316420]  ;;  %v765_v41 = vrot.slane %v3606_v32, %v3933_v5  ;;  %v1309_v45 = vunpack.c.l.b16 %v751_v34 }
  0x68   : > { %v1467_v21 = vpack.c.b16 %v1382_v20, %v1368_v16  ;;  %v3600_v38 = vld.sshfl [vmem:[%s4124_s20 + $0x14] sm:$0x1 pattern:$0x75316420]  ;;  %v737_v43 = vrot.slane %v3604_v36, %v3933_v5  ;;  %v1303_v51 = vunpack.c.l.b16 %v667_v39  ;;  %v1385_v54 = vrot.slane %v1302_v42, 6 }
  0x69   : > { %v3607_v40 = vld.sshfl [vmem:[%s4124_s20 + $0x1b] sm:$0x1 pattern:$0x75316420]  ;;  %v681_v48 = vrot.slane %v3600_v38, %v3933_v5  ;;  %v1310_v53 = vunpack.c.l.b16 %v765_v41  ;;  %v1384_v58 = vsel %vm1349_vm0, %v1383_v46, %v1300_v44  ;;  %v1397_v59 = vrot.slane %v1309_v45, 7 }
  0x6a   : > { %3778 = vmatprep.mubr.msk.bf16.mxu0 %vm2619_vm7, %v1467_v21  ;;  %v3601_v47 = vld.sshfl [vmem:[%s4124_s20 + $0x15] sm:$0x1 pattern:$0x75316420]  ;;  %v779_v50 = vrot.slane %v3607_v40, %v3933_v5  ;;  %v1308_v57 = vunpack.c.l.b16 %v737_v43  ;;  %v1387_v1 = vrot.slane %v1303_v51, 5  ;;  %v1386_v2 = vsel %vm1352_vm1, %v1385_v54, %v1384_v58 }
  0x6b   : > { %v3608_v49 = vld.sshfl [vmem:[%s4124_s20 + $0x1c] sm:$0x1 pattern:$0x75316420]  ;;  %v695_v56 = vrot.slane %v3601_v47, %v3933_v5  ;;  %v1304_v62 = vunpack.c.l.b16 %v681_v48  ;;  %v1399_v3 = vrot.slane %v1310_v53, 6 }
  0x6c   : > { %v3602_v55 = vld.sshfl [vmem:[%s4124_s20 + $0x16] sm:$0x1 pattern:$0x75316420]  ;;  %v793_v61 = vrot.slane %v3608_v49, %v3933_v5  ;;  %v1311_v0 = vunpack.c.l.b16 %v779_v50  ;;  %v1398_v11 = vsel %vm1349_vm0, %v1397_v59, %v1308_v57  ;;  %v1388_v16 = vsel %vm1355_vm2, %v1387_v1, %v1386_v2 }
  0x6d   : > { %v3609_v60 = vld.sshfl [vmem:[%s4124_s20 + $0x1d] sm:$0x1 pattern:$0x75316420]  ;;  %v709_v8 = vrot.slane %v3602_v55, %v3933_v5  ;;  %v1305_v10 = vunpack.c.l.b16 %v695_v56  ;;  %v1389_v13 = vrot.slane %v1304_v62, 4  ;;  %v1400_v24 = vsel %vm1352_vm1, %v1399_v3, %v1398_v11 }
  0x6e   : > { %v3603_v63 = vld.sshfl [vmem:[%s4124_s20 + $0x17] sm:$0x1 pattern:$0x75316420]  ;;  %v807_v9 = vrot.slane %v3609_v60, %v3933_v5  ;;  %v1312_v12 = vunpack.c.l.b16 %v793_v61  ;;  %v1401_v17 = vrot.slane %v1311_v0, 5 }
  0x6f   : > { %v3613_v6 = vld.sshfl [vmem:[%s4124_s20 + $0x21] sm:$0x1 pattern:$0x75316420]  ;;  %v723_v21 = vrot.slane %v3603_v63, %v3933_v5  ;;  %v1306_v27 = vunpack.c.l.b16 %v709_v8  ;;  %v1391_v29 = vrot.slane %v1305_v10, 3 }
  0x70   : > { %v3610_v7 = vld.sshfl [vmem:[%s4124_s20 + $0x1e] sm:$0x1 pattern:$0x75316420]  ;;  %v863_v19 = vrot.slane %v3613_v6, %v3933_v5  ;;  %v1403_v32 = vrot.slane %v1312_v12, 4  ;;  %v1402_v36 = vsel %vm1355_vm2, %v1401_v17, %v1400_v24 }
  0x71   : > { %v3612_v14 = vld.sshfl [vmem:[%s4124_s20 + $0x20] sm:$0x1 pattern:$0x75316420]  ;;  %v821_v23 = vrot.slane %v3610_v7, %v3933_v5  ;;  %v4242_v42 = vunpack.c.l.b16 %v723_v21  ;;  %v1393_v46 = vrot.slane %v1306_v27, 2 }
  0x72   : > { %v3611_v15 = vld.sshfl [vmem:[%s4124_s20 + $0x1f] sm:$0x1 pattern:$0x75316420]  ;;  %v849_v34 = vrot.slane %v3612_v14, %v3933_v5  ;;  %v1317_v40 = vunpack.c.l.b16 %v863_v19  ;;  %v1404_v50 = vsel %vm1358_vm3, %v1403_v32, %v1402_v36 }
  0x73   : > { %v3614_v18 = vld.sshfl [vmem:[%s4124_s20 + $0x22] sm:$0x1 pattern:$0x75316420]  ;;  %v835_v41 = vrot.slane %v3611_v15, %v3933_v5  ;;  %v1314_v43 = vunpack.c.l.b16 %v821_v23  ;;  %v1395_v62 = vrot.slane %v4242_v42, 1 }
  0x74   : > { %v3621_v25 = vld.sshfl [vmem:[%s4124_s20 + $0x29] sm:$0x1 pattern:$0x75316420]  ;;  %v877_v35 = vrot.slane %v3614_v18, %v3933_v5  ;;  %v1316_v54 = vunpack.c.l.b16 %v849_v34  ;;  %v1411_v60 = vrot.slane %v1317_v40, 7 }
  0x75   : > { %v3615_v30 = vld.sshfl [vmem:[%s4124_s20 + $0x23] sm:$0x1 pattern:$0x75316420]  ;;  %v975_v39 = vrot.slane %v3621_v25, %v3933_v5  ;;  %v4254_v61 = vunpack.c.l.b16 %v835_v41  ;;  %v1407_v63 = vrot.slane %v1314_v43, 2 }
  0x76   : > { %v3616_v33 = vld.sshfl [vmem:[%s4124_s20 + $0x24] sm:$0x1 pattern:$0x75316420]  ;;  %v891_v49 = vrot.slane %v3615_v30, %v3933_v5  ;;  %v1318_v55 = vunpack.c.l.b16 %v877_v35 }
  0x77   : > { %v3620_v38 = vld.sshfl [vmem:[%s4124_s20 + $0x28] sm:$0x1 pattern:$0x75316420]  ;;  %v905_v53 = vrot.slane %v3616_v33, %v3933_v5  ;;  %v1325_v59 = vunpack.c.l.b16 %v975_v39  ;;  %v1409_v21 = vrot.slane %v4254_v61, 1 }
  0x78   : > { %v3622_v44 = vld.sshfl [vmem:[%s4124_s20 + $0x2a] sm:$0x1 pattern:$0x75316420]  ;;  %v961_v57 = vrot.slane %v3620_v38, %v3933_v5  ;;  %v1319_v7 = vunpack.c.l.b16 %v891_v49 }
  0x79   : > { %v3617_v48 = vld.sshfl [vmem:[%s4124_s20 + $0x25] sm:$0x1 pattern:$0x75316420]  ;;  %v989_v58 = vrot.slane %v3622_v44, %v3933_v5  ;;  %v4268_v12 = vunpack.c.l.b16 %v905_v53  ;;  %v1425_v17 = vrot.slane %v1325_v59, 7 }
  0x7a   : > { %v3618_v51 = vld.sshfl [vmem:[%s4124_s20 + $0x26] sm:$0x1 pattern:$0x75316420]  ;;  %v919_v3 = vrot.slane %v3617_v48, %v3933_v5  ;;  %v1324_v14 = vunpack.c.l.b16 %v961_v57 }
  0x7b   : > { %v3623_v56 = vld.sshfl [vmem:[%s4124_s20 + $0x2b] sm:$0x1 pattern:$0x75316420]  ;;  %v933_v6 = vrot.slane %v3618_v51, %v3933_v5  ;;  %v1326_v15 = vunpack.c.l.b16 %v989_v58  ;;  %v1417_v36 = vrot.slane %v4268_v12, 4 }
  0x7c   : > { %v3619_v0 = vld.sshfl [vmem:[%s4124_s20 + $0x27] sm:$0x1 pattern:$0x75316420]  ;;  %v1003_v11 = vrot.slane %v3623_v56, %v3933_v5  ;;  %v1426_v39 = vsel %vm1349_vm0, %v1425_v17, %v1324_v14 }
  0x7d   : > { %v3629_v1 = vld.sshfl [vmem:[%s4124_s20 + $0x31] sm:$0x1 pattern:$0x75316420]  ;;  %v4285_v30 = vunpack.c.l.b16 %v933_v6  ;;  %v1427_v40 = vrot.slane %v1326_v15, 6 }
  0x7e   : > { %v3637_v8 = vld.sshfl [vmem:[%s4124_s20 + $0x39] sm:$0x1 pattern:$0x75316420]  ;;  %v1087_v25 = vrot.slane %v3629_v1, %v3933_v5  ;;  %v1327_v34 = vunpack.c.l.b16 %v1003_v11 }
  0x7f   : > { %v3624_v10 = vld.sshfl [vmem:[%s4124_s20 + $0x2c] sm:$0x1 pattern:$0x75316420] }
  0x80   : > { %v3628_v18 = vld.sshfl [vmem:[%s4124_s20 + $0x30] sm:$0x1 pattern:$0x75316420]  ;;  %v1017_v33 = vrot.slane %v3624_v10, %v3933_v5  ;;  %v1333_v48 = vunpack.c.l.b16 %v1087_v25  ;;  %v1429_v1 = vrot.slane %v1327_v34, 5 }
  0x81   : > { %v3630_v19 = vld.sshfl [vmem:[%s4124_s20 + $0x32] sm:$0x1 pattern:$0x75316420] }
  0x82   : > { %v3625_v23 = vld.sshfl [vmem:[%s4124_s20 + $0x2d] sm:$0x1 pattern:$0x75316420]  ;;  %v1101_v43 = vrot.slane %v3630_v19, %v3933_v5  ;;  %v1328_v57 = vunpack.c.l.b16 %v1017_v33  ;;  %v1439_v10 = vrot.slane %v1333_v48, 7 }
  0x83   : > { %v3638_v24 = vld.sshfl [vmem:[%s4124_s20 + $0x3a] sm:$0x1 pattern:$0x75316420]  ;;  %v1031_v51 = vrot.slane %v3625_v23, %v3933_v5 }
  0x84   : > { %v3626_v27 = vld.sshfl [vmem:[%s4124_s20 + $0x2e] sm:$0x1 pattern:$0x75316420]  ;;  %v1213_v44 = vrot.slane %v3638_v24, %v3933_v5 }
  0x85   : > { %v3636_v32 = vld.sshfl [vmem:[%s4124_s20 + $0x38] sm:$0x1 pattern:$0x75316420]  ;;  %v1045_v56 = vrot.slane %v3626_v27, %v3933_v5  ;;  %v1329_v12 = vunpack.c.l.b16 %v1031_v51 }
  0x86   : > { %v3631_v38 = vld.sshfl [vmem:[%s4124_s20 + $0x33] sm:$0x1 pattern:$0x75316420] }
  0x87   : > { %v3639_v41 = vld.sshfl [vmem:[%s4124_s20 + $0x3b] sm:$0x1 pattern:$0x75316420]  ;;  %v1115_v59 = vrot.slane %v3631_v38, %v3933_v5  ;;  %v1330_v24 = vunpack.c.l.b16 %v1045_v56  ;;  %v1433_v38 = vrot.slane %v1329_v12, 3 }
  0x88   : > { %v3640_v58 = vld.sshfl [vmem:[%s4124_s20 + $0x3c] sm:$0x1 pattern:$0x75316420] }
  0x89   : > { %v3633_v6 = vld.sshfl [vmem:[%s4124_s20 + $0x35] sm:$0x1 pattern:$0x75316420]  ;;  %v1335_v19 = vunpack.c.l.b16 %v1115_v59 }
  0x8a   : > { %v3641_v14 = vld.sshfl [vmem:[%s4124_s20 + $0x3d] sm:$0x1 pattern:$0x75316420] }
  0x9c   : > { %v2612_v28 = vpop.permute.xlu0 %2611 }
  0x9d   : > { %3802 = vmatprep.subr.msk.bf16.mxu0 %vm2619_vm7, %v2612_v28  ;;  %v2633_v31 = vsel %vm2619_vm7, %v2612_v28, 0  ;;  %v1313_v28 = vunpack.c.l.b16 %v807_v9 }
  0x9e   : > { %3771 = vmatpush3.bf16.xpose.msra.mxu0 %v2633_v31  ;;  %v1390_v31 = vsel %vm1358_vm3, %v1389_v13, %v1388_v16  ;;  %v1413_v13 = vrot.slane %v1318_v55, 6  ;;  %v1412_v16 = vsel %vm1349_vm0, %v1411_v60, %v1316_v54  ;;  %v3632_v55 = vld.sshfl [vmem:[%s4124_s20 + $0x34] sm:$0x1 pattern:$0x75316420]  ;;  %v1227_v60 = vrot.slane %v3639_v41, %v3933_v5 }
  0x9f   : > { %v1392_v45 = vsel %vm1361_vm4, %v1391_v29, %v1390_v31  ;;  %v1405_v47 = vrot.slane %v1313_v28, 3  ;;  %v947_v28 = vrot.slane %v3619_v0, %v3933_v5  ;;  %v4283_v29 = vunpack.c.l.b16 %v919_v3 }
  0xa0   : > { %v4264_v9 = vsel %vm1364_vm5, %v1393_v46, %v1392_v45  ;;  %v1415_v31 = vrot.slane %v1319_v7, 5  ;;  %v1414_v35 = vsel %vm1352_vm1, %v1413_v13, %v1412_v16  ;;  %v1073_v46 = vrot.slane %v3628_v18, %v3933_v5 }
  0xa1   : > { %v1406_v2 = vsel %vm1361_vm4, %v1405_v47, %v1404_v50  ;;  %v1185_v47 = vrot.slane %v3636_v32, %v3933_v5  ;;  %v4301_v53 = vunpack.c.l.b16 %v947_v28  ;;  %v1428_v0 = vsel %vm1352_vm1, %v1427_v40, %v1426_v39 }
  0xa2   : > { %v1416_v54 = vsel %vm1355_vm2, %v1415_v31, %v1414_v35  ;;  %v1342_v3 = vunpack.c.l.b16 %v1213_v44  ;;  %v1332_v7 = vunpack.c.l.b16 %v1073_v46  ;;  %v1419_v13 = vrot.slane %v4283_v29, 3  ;;  %v3642_v31 = vld.sshfl [vmem:[%s4124_s20 + $0x3e] sm:$0x1 pattern:$0x75316420] }
  0xa3   : > { %v1129_v15 = vrot.slane %v3632_v55, %v3933_v5  ;;  %v1241_v16 = vrot.slane %v3640_v58, %v3933_v5  ;;  %v1431_v18 = vrot.slane %v1328_v57, 4  ;;  %v1343_v23 = vunpack.c.l.b16 %v1227_v60  ;;  %v3635_v44 = vld.sshfl [vmem:[%s4124_s20 + $0x37] sm:$0x1 pattern:$0x75316420] }
  0xa4   : > { %v1430_v25 = vsel %vm1355_vm2, %v1429_v1, %v1428_v0  ;;  %v1455_v28 = vrot.slane %v1342_v3, 6  ;;  %v1143_v29 = vrot.slane %v3633_v6, %v3933_v5  ;;  %v1255_v32 = vrot.slane %v3641_v14, %v3933_v5 }
  0xa5   : > { %v1440_v33 = vsel %vm1349_vm0, %v1439_v10, %v1332_v7  ;;  %v1418_v35 = vsel %vm1358_vm3, %v1417_v36, %v1416_v54  ;;  %v1336_v39 = vunpack.c.l.b16 %v1129_v15  ;;  %v1344_v40 = vunpack.c.l.b16 %v1241_v16 }
  0xa6   : > { %v1457_v46 = vrot.slane %v1343_v23, 5  ;;  %v1421_v36 = vrot.slane %v4285_v30, 2  ;;  %v1435_v54 = vrot.slane %v1330_v24, 2  ;;  %v1337_v55 = vunpack.c.l.b16 %v1143_v29 }
  0xa7   : > { %v1345_v56 = vunpack.c.l.b16 %v1255_v32  ;;  %v1420_v57 = vsel %vm1361_vm4, %v1419_v13, %v1418_v35  ;;  %v1445_v59 = vrot.slane %v1336_v39, 4  ;;  %v1459_v60 = vrot.slane %v1344_v40, 4 }
  0xa8   : > { %v1423_v3 = vrot.slane %v4301_v53, 1  ;;  %v1422_v10 = vsel %vm1364_vm5, %v1421_v36, %v1420_v57  ;;  %v1447_v12 = vrot.slane %v1337_v55, 3  ;;  %v1396_v53 = vsel %vm1367_vm6, %v1395_v62, %v4264_v9 }
  0xa9   : > { %v1461_v13 = vrot.slane %v1345_v56, 3 }
  0xaa   : > { %v1424_v23 = vsel %vm1367_vm6, %v1423_v3, %v1422_v10 }
  0xac   : > { %v2614_v20 = vpop.permute.xlu0 %2613 }
  0xad   : > { %3803 = vmatprep.subr.msk.bf16.mxu0 %vm2619_vm7, %v2614_v20  ;;  %v2636_v26 = vsel %vm2619_vm7, %v2614_v20, 0  ;;  %v4274_v20 = vsel %vm1364_vm5, %v1407_v63, %v1406_v2  ;;  %v3627_v63 = vld.sshfl [vmem:[%s4124_s20 + $0x2f] sm:$0x1 pattern:$0x75316420]  ;;  %v1334_v2 = vunpack.c.l.b16 %v1101_v43  ;;  %v1432_v43 = vsel %vm1358_vm3, %v1431_v18, %v1430_v25 }
  0xae   : > { %3773 = vmatpush3.bf16.xpose.msra.mxu0 %v2636_v26  ;;  %v1199_v26 = vrot.slane %v3637_v8, %v3933_v5  ;;  %v1340_v8 = vunpack.c.l.b16 %v1185_v47  ;;  %v1059_v17 = vrot.slane %v3627_v63, %v3933_v5  ;;  %v3643_v47 = vld.sshfl [vmem:[%s4124_s20 + $0x3f] sm:$0x1 pattern:$0x75316420]  ;;  %v1434_v58 = vsel %vm1361_vm4, %v1433_v38, %v1432_v43 }
  0xaf   : > { %v1441_v27 = vrot.slane %v1334_v2, 6  ;;  %v1171_v63 = vrot.slane %v3635_v44, %v3933_v5  ;;  %v1283_v0 = vrot.slane %v3643_v47, %v3933_v5 }
  0xb0   : > { %v1341_v49 = vunpack.c.l.b16 %v1199_v26  ;;  %v3634_v26 = vld.sshfl [vmem:[%s4124_s20 + $0x36] sm:$0x1 pattern:$0x75316420]  ;;  %v1331_v41 = vunpack.c.l.b16 %v1059_v17  ;;  %v1410_v17 = vsel %vm1367_vm6, %v1409_v21, %v4274_v20 }
  0xb1   : > { %v1157_v48 = vrot.slane %v3634_v26, %v3933_v5  ;;  %v1339_v18 = vunpack.c.l.b16 %v1171_v63  ;;  %v1468_v42 = vpack.c.b16 %v1410_v17, %v1396_v53 }
  0xb2   : > { %v1453_v11 = vrot.slane %v1341_v49, 7  ;;  %v1269_v49 = vrot.slane %v3642_v31, %v3933_v5  ;;  %v1437_v30 = vrot.slane %v1331_v41, 1 }
  0xb3   : > { %v1338_v6 = vunpack.c.l.b16 %v1157_v48  ;;  %v1451_v62 = vrot.slane %v1339_v18, 1 }
  0xb4   : > { %v1454_v34 = vsel %vm1349_vm0, %v1453_v11, %v1340_v8  ;;  %v1346_v7 = vunpack.c.l.b16 %v1269_v49  ;;  %v1436_v11 = vsel %vm1364_vm5, %v1435_v54, %v1434_v58 }
  0xb5   : > { %v1456_v51 = vsel %vm1352_vm1, %v1455_v28, %v1454_v34  ;;  %v1438_v24 = vsel %vm1367_vm6, %v1437_v30, %v1436_v11  ;;  %v1449_v25 = vrot.slane %v1338_v6, 2 }
  0xb6   : > { %v1458_v2 = vsel %vm1355_vm2, %v1457_v46, %v1456_v51  ;;  %v1463_v26 = vrot.slane %v1346_v7, 2  ;;  %v1469_v31 = vpack.c.b16 %v1438_v24, %v1424_v23 }
  0xb7   : > { %v1460_v16 = vsel %vm1358_vm3, %v1459_v60, %v1458_v2 }
  0xb8   : > { %v1462_v28 = vsel %vm1361_vm4, %v1461_v13, %v1460_v16 }
  0xb9   : > { %v1464_v20 = vsel %vm1364_vm5, %v1463_v26, %v1462_v28 }
  0xbc   : > { %v2616_v45 = vpop.permute.xlu1 %2615 }
  0xbd   : > { %3804 = vmatprep.subr.msk.bf16.mxu0 %vm2619_vm7, %v2616_v45  ;;  %v2639_v50 = vsel %vm2619_vm7, %v2616_v45, 0  ;;  %v1443_v45 = vrot.slane %v1335_v19, 5  ;;  %v1347_v19 = vunpack.c.l.b16 %v1283_v0 }
  0xbe   : > { %3775 = vmatpush3.bf16.xpose.msra.mxu0 %v2639_v50  ;;  %v1442_v50 = vsel %vm1352_vm1, %v1441_v27, %v1440_v33 }
  0xbf   : > { %v1444_v1 = vsel %vm1355_vm2, %v1443_v45, %v1442_v50  ;;  %v1465_v9 = vrot.slane %v1347_v19, 1 }
  0xc0   : > { %v1446_v15 = vsel %vm1358_vm3, %v1445_v59, %v1444_v1 }
  0xc1   : > { %v1448_v27 = vsel %vm1361_vm4, %v1447_v12, %v1446_v15  ;;  %v1466_v29 = vsel %vm1367_vm6, %v1465_v9, %v1464_v20 }
  0xc2   : > { %v1450_v61 = vsel %vm1364_vm5, %v1449_v25, %v1448_v27 }
  0xc3   : > { %v1452_v21 = vsel %vm1367_vm6, %v1451_v62, %v1450_v61 }
  0xc4   : > { %v1470_v32 = vpack.c.b16 %v1466_v29, %v1452_v21 }
  0xcc   : > { %v2618_v8 = vpop.permute.xlu1 %2617 }
  0xcd   : > { %3805 = vmatprep.subr.msk.bf16.mxu0 %vm2619_vm7, %v2618_v8  ;;  %v2642_v14 = vsel %vm2619_vm7, %v2618_v8, 0 }
  0xce   : > { %3777 = vmatpush3.bf16.xpose.msra.mxu0 %v2642_v14 }
  0xd5   : > { %3779 = vmatmul.mubr.msk.bf16.vlgmr.msra.gmra.mrb[0].mxu0 %vm2619_vm7, %v1468_v42 }
  0xd6   : > { %3782 = vmatprep.mubr.msk.bf16.mxu0 %vm2619_vm7, %v1469_v31 }
  0xdd   : > { %3783 = vmatmul.mubr.msk.bf16.gmra.mrb[4].mxu0 %vm2619_vm7, %v1470_v32 }
 0x1a8   : > { %v3780_v33 = vpop.f32.mrb[0].mxu0 }
 0x1a9   : > { %v2678_v34 = vpop.f32.mrb[1].mxu0  ;;  %v2716_v41 = vsel %vm2709_vm8, %v3780_v33, -inf }
 0x1aa   : > { %v3781_v35 = vpop.f32.mrb[2].mxu0  ;;  %v2710_v38 = vsel %vm2709_vm8, %v2678_v34, -inf }
 0x1ab   : > { %2711 = vmax.xlane.f32.xlu0 %v2710_v38  ;;  %v2681_v39 = vpop.f32.mrb[3].mxu0  ;;  %v2719_v46 = vsel %vm2709_vm8, %v3781_v35, -inf }
 0x1ac   : > { %v2713_v40 = vsel %vm2709_vm8, %v2681_v39, -inf }
 0x1ad   : > { %2714 = vmax.xlane.f32.xlu1 %v2713_v40 }
 0x1af   : > { %2717 = vmax.xlane.f32.xlu0 %v2716_v41 }
 0x1b0   : > { %v3784_v43 = vpop.f32.mrb[4].mxu0 }
 0x1b1   : > { %v2694_v44 = vpop.f32.mrb[5].mxu0  ;;  %v2728_v49 = vsel %vm2709_vm8, %v3784_v43, -inf }
 0x1b2   : > { %v3785_v45 = vpop.f32.mrb[6].mxu0  ;;  %v2722_v47 = vsel %vm2709_vm8, %v2694_v44, -inf }
 0x1b3   : > { %2720 = vmax.xlane.f32.xlu0 %v2719_v46  ;;  %2723 = vmax.xlane.f32.xlu1 %v2722_v47  ;;  %v2697_v48 = vpop.f32.mrb[7].mxu0  ;;  %v2731_v51 = vsel %vm2709_vm8, %v3785_v45, -inf }
 0x1b4   : > { %v2725_v50 = vsel %vm2709_vm8, %v2697_v48, -inf }
 0x1b7   : > { %2729 = vmax.xlane.f32.xlu1 %v2728_v49  ;;  %2726 = vmax.xlane.f32.xlu0 %v2725_v50 }
 0x1bb   : > { %2732 = vmax.xlane.f32.xlu0 %v2731_v51 }
 0x1c8   : > { %2802 = vrot.lane.b32.xlu1 %v3994_v37, %s3891_s21 }
 0x238   : > { %v2712_v36 = vpop.xlane.xlu0 %2711 }
 0x239   : > { %v2734_v54 = vsub.f32 %v2678_v34, %v2712_v36 }
 0x23a   : > { %v2715_v55 = vpop.xlane.xlu1 %2714 }
 0x23b   : > { %v2742_v58 = vmul.f32 1.442695, %v2734_v54  ;;  %v2735_v59 = vsub.f32 %v2681_v39, %v2715_v55 }
 0x23c   : > { %v2718_v56 = vpop.xlane.xlu0 %2717 }
 0x23d   : > { %v2736_v57 = vsub.f32 %v3780_v33, %v2718_v56  ;;  %v2744_v2 = vmul.f32 1.442695, %v2735_v59 }
 0x23f   : > { %v2746_v60 = vmul.f32 1.442695, %v2736_v57 }
 0x240   : > { %v2721_v63 = vpop.xlane.xlu0 %2720  ;;  %v2724_v0 = vpop.xlane.xlu1 %2723 }
 0x241   : > { %3833 = vpow2.f32 %v2746_v60  ;;  %v2737_v1 = vsub.f32 %v3781_v35, %v2721_v63  ;;  %v2738_v30 = vsub.f32 %v2694_v44, %v2724_v0 }
 0x242   : > { %3835 = vpow2.f32 %v2742_v58 }
 0x243   : > { %v2748_v3 = vmul.f32 1.442695, %v2737_v1  ;;  %v2750_v8 = vmul.f32 1.442695, %v2738_v30 }
 0x244   : > { %v2730_v6 = vpop.xlane.xlu1 %2729  ;;  %v2727_v7 = vpop.xlane.xlu0 %2726 }
 0x245   : > { %3837 = vpow2.f32 %v2748_v3  ;;  %v2740_v37 = vsub.f32 %v3784_v43, %v2730_v6  ;;  %v2739_v11 = vsub.f32 %v2697_v48, %v2727_v7 }
 0x246   : > { %3839 = vpow2.f32 %v2744_v2 }
 0x247   : > { %v2754_v10 = vmul.f32 1.442695, %v2740_v37  ;;  %v2752_v16 = vmul.f32 1.442695, %v2739_v11 }
 0x248   : > { %v2733_v12 = vpop.xlane.xlu0 %2732  ;;  %v2803_v13 = vpop.permute.xlu1 %2802 }
 0x249   : > { %3841 = vpow2.f32 %v2754_v10  ;;  %v2741_v14 = vsub.f32 %v3785_v45, %v2733_v12  ;;  %3786 = vmatprep.subr.bf16.mxu1 %v2803_v13 }
 0x24a   : > { %3787 = vmatpush3.bf16.msra.mxu1 %v2803_v13  ;;  %3843 = vpow2.f32 %v2750_v8 }
 0x24b   : > { %v4375_v15 = vpop.eup %3833  ;;  %v2756_v53 = vmul.f32 1.442695, %v2741_v14 }
 0x24c   : > { %v2764_v17 = vsel %vm2709_vm8, %v4375_v15, 0.0  ;;  %v3836_v18 = vpop.eup %3835 }
 0x24d   : > { %3845 = vpow2.f32 %v2756_v53  ;;  %2765 = vadd.xlane.f32.xlu1 %v2764_v17  ;;  %v2758_v23 = vsel %vm2709_vm8, %v3836_v18, 0.0 }
 0x24e   : > { %3847 = vpow2.f32 %v2752_v16 }
 0x24f   : > { %v3838_v19 = vpop.eup %3837 }
 0x250   : > { %v2767_v24 = vsel %vm2709_vm8, %v3838_v19, 0.0  ;;  %v3840_v25 = vpop.eup %3839 }
 0x251   : > { %2759 = vadd.xlane.f32.xlu1 %v2758_v23  ;;  %2768 = vadd.xlane.f32.xlu0 %v2767_v24  ;;  %v2761_v28 = vsel %vm2709_vm8, %v3840_v25, 0.0 }
 0x253   : > { %v4381_v26 = vpop.eup %3841 }
 0x254   : > { %v2776_v27 = vsel %vm2709_vm8, %v4381_v26, 0.0  ;;  %v3844_v42 = vpop.eup %3843 }
 0x255   : > { %2777 = vadd.xlane.f32.xlu1 %v2776_v27  ;;  %2762 = vadd.xlane.f32.xlu0 %v2761_v28  ;;  %v2770_v62 = vsel %vm2709_vm8, %v3844_v42, 0.0 }
 0x257   : > { %v3846_v31 = vpop.eup %3845 }
 0x258   : > { %v2779_v9 = vsel %vm2709_vm8, %v3846_v31, 0.0  ;;  %v3848_v61 = vpop.eup %3847 }
 0x259   : > { %2771 = vadd.xlane.f32.xlu1 %v2770_v62  ;;  %2780 = vadd.xlane.f32.xlu0 %v2779_v9  ;;  %v2773_v20 = vsel %vm2709_vm8, %v3848_v61, 0.0 }
 0x25d   : > { %2774 = vadd.xlane.f32.xlu0 %v2773_v20 }
 0x26a   : > { %2806 = vrot.lane.b32.xlu1 %v4094_v4, %s3891_s21 }
 0x26e   : > { %2808 = vrot.lane.b32.xlu1 %v4150_v22, %s3891_s21 }
 0x273   : > { %2804 = vrot.lane.b32.xlu0 %v4044_v52, %s3891_s21 }
 0x2da   : > { %v2766_v21 = vpop.xlane.xlu1 %2765 }
 0x2de   : > { %v2760_v29 = vpop.xlane.xlu1 %2759  ;;  %v2769_v32 = vpop.xlane.xlu0 %2768 }
 0x2df   : > { %3849 = vrcp.f32 %v2760_v29 }
 0x2e2   : > { %v2778_v33 = vpop.xlane.xlu1 %2777  ;;  %v2763_v34 = vpop.xlane.xlu0 %2762 }
 0x2e3   : > { %3851 = vrcp.f32 %v2763_v34 }
 0x2e4   : > { %3853 = vrcp.f32 %v2769_v32 }
 0x2e5   : > { %3855 = vrcp.f32 %v2766_v21 }
 0x2e6   : > { %v2781_v35 = vpop.xlane.xlu0 %2780  ;;  %v2772_v38 = vpop.xlane.xlu1 %2771 }
 0x2e7   : > { %3857 = vrcp.f32 %v2772_v38 }
 0x2e9   : > { %v3850_v4 = vpop.eup %3849 }
 0x2ea   : > { %v2775_v39 = vpop.xlane.xlu0 %2774  ;;  %v2807_v40 = vpop.permute.xlu1 %2806  ;;  %v2790_v52 = vmul.f32 %v3850_v4, %v3836_v18 }
 0x2eb   : > { %3859 = vrcp.f32 %v2775_v39 }
 0x2ec   : > { %3861 = vrcp.f32 %v2781_v35 }
 0x2ed   : > { %v3852_v22 = vpop.eup %3851  ;;  %3863 = vrcp.f32 %v2778_v33 }
 0x2ee   : > { %v2805_v41 = vpop.permute.xlu0 %2804  ;;  %v2791_v43 = vmul.f32 %v3852_v22, %v3840_v25  ;;  %v3854_v45 = vpop.eup %3853 }
 0x2ef   : > { %3788 = vmatprep.subr.bf16.mxu1 %v2805_v41  ;;  %v2809_v46 = vpop.permute.xlu1 %2808  ;;  %v3856_v47 = vpop.eup %3855  ;;  %v2793_v50 = vmul.f32 %v3854_v45, %v3838_v19  ;;  %v3344_v45 = vld [vmem:[%s4431_s24 + $0x12] sm:$0x1] }
 0x2f0   : > { %3789 = vmatpush3.bf16.msra.mxu1 %v2805_v41  ;;  %v2798_v44 = vpack.c.bf16 %v2791_v43, %v2790_v52  ;;  %v2792_v36 = vmul.f32 %v3856_v47, %v4375_v15  ;;  %v3362_v47 = vld [vmem:[%s4431_s24 + $0x18] sm:$0x1] }
 0x2f1   : > { %3790 = vmatprep.subr.bf16.mxu1 %v2807_v40  ;;  %v3858_v48 = vpop.eup %3857 }
 0x2f2   : > { %3794 = vmatprep.mubr.msk.bf16.mxu1 %vm2709_vm8, %v2798_v44  ;;  %v2794_v54 = vmul.f32 %v3858_v48, %v3844_v42  ;;  %v2799_v55 = vpack.c.bf16 %v2793_v50, %v2792_v36  ;;  %v3341_v44 = vld [vmem:[%s4431_s24 + $0x11] sm:$0x1]  ;;  %v3347_v36 = vld [vmem:[%s4431_s24 + $0x13] sm:$0x1] }
 0x2f4   : > { %3791 = vmatpush3.bf16.msra.mxu1 %v2807_v40  ;;  %v3338_v40 = vld [vmem:[%s4431_s24 + $0x10] sm:$0x1] }
 0x2f5   : > { %v3860_v49 = vpop.eup %3859  ;;  %3792 = vmatprep.subr.bf16.mxu1 %v2809_v46 }
 0x2f6   : > { %v2795_v51 = vmul.f32 %v3860_v49, %v3848_v61  ;;  %v3862_v56 = vpop.eup %3861 }
 0x2f7   : > { %v3864_v58 = vpop.eup %3863  ;;  %v2797_v59 = vmul.f32 %v3862_v56, %v3846_v31 }
 0x2f8   : > { %3793 = vmatpush3.bf16.msra.mxu1 %v2809_v46  ;;  %v2800_v57 = vpack.c.bf16 %v2795_v51, %v2794_v54  ;;  %v2796_v60 = vmul.f32 %v3864_v58, %v4381_v26  ;;  %v3350_v46 = vld [vmem:[%s4431_s24 + $0x14] sm:$0x1]  ;;  %v3353_v54 = vld [vmem:[%s4431_s24 + $0x15] sm:$0x1] }
 0x2fa   : > { %v2801_v63 = vpack.c.bf16 %v2797_v59, %v2796_v60  ;;  %v3359_v60 = vld [vmem:[%s4431_s24 + $0x17] sm:$0x1] }
 0x2fb   : > { %3795 = vmatmul.mubr.msk.bf16.vlgmr.msra.gmra.mrb[0].mxu1 %vm2709_vm8, %v2799_v55  ;;  %v3356_v55 = vld [vmem:[%s4431_s24 + $0x16] sm:$0x1] }
 0x2fc   : > { %3798 = vmatprep.mubr.msk.bf16.mxu1 %vm2709_vm8, %v2800_v57 }
 0x303   : > { %3799 = vmatmul.mubr.msk.bf16.gmra.mrb[4].mxu1 %vm2709_vm8, %v2801_v63  ;;  %v3365_v63 = vld [vmem:[%s4431_s24 + $0x19] sm:$0x1] }
 0x3ce   : > { %v3796_v0 = vpop.f32.mrb[0].mxu1 }
 0x3cf   : > { %v2860_v1 = vpop.f32.mrb[1].mxu1 }
 0x3d0   : > { %v3797_v2 = vpop.f32.mrb[2].mxu1 }
 0x3d1   : > { %v2892_v3 = vpack.c.bf16 %v3797_v2, %v3796_v0  ;;  %v3717_v30 = vpack.c.bf16 %v3797_v2, %v3797_v2  ;;  %v2863_v6 = vpop.f32.mrb[3].mxu1  ;;  %v3368_v0 = vld [vmem:[%s4431_s24 + $0x1a] sm:$0x1] }
 0x3d2   : > { %v2891_v7 = vpack.c.bf16 %v2863_v6, %v2860_v1  ;;  %v3716_v37 = vpack.c.bf16 %v2863_v6, %v2863_v6  ;;  %v3371_v6 = vld [vmem:[%s4431_s24 + $0x1b] sm:$0x1] }
 0x3d3   : > { %v2955_v8 = vrot.slane %v2892_v3, %v3933_v5  ;;  %v2962_v10 = vrot.slane %v3717_v30, %v3933_v5 }
 0x3d4   : > { %v4404_v11 = vrot.slane %v2891_v7, %v3933_v5  ;;  %v4407_v12 = vrot.slane %v3716_v37, %v3933_v5  ;;  %v3374_v7 = vld [vmem:[%s4431_s24 + $0x1c] sm:$0x1]  ;;  %v3377_v37 = vld [vmem:[%s4431_s24 + $0x1d] sm:$0x1] }
 0x3d5   : > { %v2963_v13 = vcombine.high %v2955_v8, %v2955_v8  ;;  %v2964_v14 = vcombine.high %v2962_v10, %v2962_v10  ;;  %v2971_v15 = vrot.slane %v2955_v8, %v3933_v5  ;;  %v4411_v16 = vrot.slane %v2962_v10, %v3933_v5 }
 0x3d6   : > { %v2914_v53 = vcombine.high %v4404_v11, %v4404_v11  ;;  %v2915_v17 = vcombine.high %v4407_v12, %v4407_v12  ;;  %v4419_v18 = vrot.slane %v4404_v11, %v3933_v5  ;;  %v4423_v19 = vrot.slane %v4407_v12, %v3933_v5  ;;  %v4425_v23 = vpop.f32.mrb[4].mxu1 }
 0x3d7   : > { %v2985_v24 = vrot.slane %v2963_v13, %v3933_v5  ;;  %v4435_v25 = vrot.slane %v2964_v14, %v3933_v5  ;;  %v2993_v26 = vcombine.high %v2971_v15, %v2971_v15  ;;  %v4439_v27 = vcombine.high %v4411_v16, %v4411_v16  ;;  %v4441_v28 = vpop.f32.mrb[5].mxu1 }
 0x3d8   : > { %v3112_v42 = vunpack.i.h.s16 %v2971_v15  ;;  %v3120_v31 = vunpack.i.h.s16 %v4411_v16  ;;  %v3728_v62 = vpack.i.b16 %v2971_v15, %v2971_v15  ;;  %v3732_v9 = vpack.i.b16 %v4411_v16, %v4411_v16  ;;  %v4446_v61 = vpop.f32.mrb[6].mxu1  ;;  %v3380_v15 = vld [vmem:[%s4431_s24 + $0x1e] sm:$0x1]  ;;  %v3383_v16 = vld [vmem:[%s4431_s24 + $0x1f] sm:$0x1] }
 0x3d9   : > { %v2995_v20 = vcombine.high %v2985_v24, %v2985_v24  ;;  %v4450_v21 = vcombine.high %v4435_v25, %v4435_v25  ;;  %v3114_v29 = vunpack.i.h.s16 %v2985_v24  ;;  %v3116_v32 = vunpack.i.h.s16 %v2993_v26  ;;  %v4452_v33 = vpop.f32.mrb[7].mxu1 }
 0x3da   : > { %v3122_v34 = vunpack.i.h.s16 %v4435_v25  ;;  %v3124_v35 = vunpack.i.h.s16 %v4439_v27  ;;  %v3176_v38 = vpack.i.b16 %v3112_v42, %v3112_v42  ;;  %v3729_v39 = vpack.i.b16 %v2985_v24, %v2985_v24 }
 0x3db   : > { %v3118_v22 = vunpack.i.h.s16 %v2995_v20  ;;  %v3126_v41 = vunpack.i.h.s16 %v4450_v21  ;;  %v3178_v52 = vpack.i.b16 %v3114_v29, %v3114_v29  ;;  %v3730_v43 = vpack.i.b16 %v2993_v26, %v2993_v26 }
 0x3dc   : > { %v3180_v48 = vpack.i.b16 %v3116_v32, %v3116_v32  ;;  %v3731_v49 = vpack.i.b16 %v2995_v20, %v2995_v20  ;;  %v3184_v50 = vpack.i.b16 %v3120_v31, %v3120_v31  ;;  %v3733_v51 = vpack.i.b16 %v4435_v25, %v4435_v25 }
 0x3dd   : > { %v3182_v56 = vpack.i.b16 %v3118_v22, %v3118_v22  ;;  %v3186_v57 = vpack.i.b16 %v3122_v34, %v3122_v34  ;;  %v3734_v58 = vpack.i.b16 %v4439_v27, %v4439_v27  ;;  %v3188_v59 = vpack.i.b16 %v3124_v35, %v3124_v35 }
 0x3de   : > { %v3735_v1 = vpack.i.b16 %v4450_v21, %v4450_v21  ;;  %v3190_v2 = vpack.i.b16 %v3126_v41, %v3126_v41  ;;  %v3339_v3 = vsel %vm4458_vm11, %v3728_v62, %v3338_v40  ;;  %v3342_v30 = vsel %vm4458_vm11, %v3176_v38, %v3341_v44 }
 0x3df   : > { %3340 = vst [vmem:[%s4431_s24 + $0x10] sm:$0x1] %v3339_v3  ;;  %3343 = vst [vmem:[%s4431_s24 + $0x11] sm:$0x1] %v3342_v30  ;;  %v3345_v8 = vsel %vm4458_vm11, %v3729_v39, %v3344_v45  ;;  %v3348_v10 = vsel %vm4458_vm11, %v3178_v52, %v3347_v36  ;;  %v3351_v13 = vsel %vm4458_vm11, %v3730_v43, %v3350_v46  ;;  %v3096_v11 = vunpack.i.h.s16 %v4419_v18 }
 0x3e0   : > { %v3354_v14 = vsel %vm4458_vm11, %v3180_v48, %v3353_v54  ;;  %3346 = vst [vmem:[%s4431_s24 + $0x12] sm:$0x1] %v3345_v8  ;;  %3349 = vst [vmem:[%s4431_s24 + $0x13] sm:$0x1] %v3348_v10  ;;  %v3357_v24 = vsel %vm4458_vm11, %v3731_v49, %v3356_v55  ;;  %v3360_v25 = vsel %vm4458_vm11, %v3182_v56, %v3359_v60  ;;  %v3293_v48 = vld [vmem:[%s4431_s24 + $0x1] sm:$0x1] }
 0x3e1   : > { %3352 = vst [vmem:[%s4431_s24 + $0x14] sm:$0x1] %v3351_v13  ;;  %3355 = vst [vmem:[%s4431_s24 + $0x15] sm:$0x1] %v3354_v14  ;;  %v3363_v26 = vsel %vm4458_vm11, %v3732_v9, %v3362_v47  ;;  %v3366_v27 = vsel %vm4458_vm11, %v3184_v50, %v3365_v63  ;;  %v3369_v42 = vsel %vm4458_vm11, %v3733_v51, %v3368_v0  ;;  %v3290_v47 = vld [vmem:[%s4431_s24] sm:$0x1] }
 0x3e2   : > { %3358 = vst [vmem:[%s4431_s24 + $0x16] sm:$0x1] %v3357_v24  ;;  %3361 = vst [vmem:[%s4431_s24 + $0x17] sm:$0x1] %v3360_v25  ;;  %v3372_v31 = vsel %vm4458_vm11, %v3186_v57, %v3371_v6  ;;  %v3375_v62 = vsel %vm4458_vm11, %v3734_v58, %v3374_v7  ;;  %v3378_v9 = vsel %vm4458_vm11, %v3188_v59, %v3377_v37  ;;  %v3296_v49 = vld [vmem:[%s4431_s24 + $0x2] sm:$0x1] }
 0x3e3   : > { %3364 = vst [vmem:[%s4431_s24 + $0x18] sm:$0x1] %v3363_v26  ;;  %3367 = vst [vmem:[%s4431_s24 + $0x19] sm:$0x1] %v3366_v27  ;;  %v3381_v20 = vsel %vm4458_vm11, %v3735_v1, %v3380_v15  ;;  %v3384_v21 = vsel %vm4458_vm11, %v3190_v2, %v3383_v16  ;;  %v2936_v29 = vrot.slane %v2914_v53, %v3933_v5  ;;  %v3104_v53 = vunpack.i.h.s16 %v4423_v19  ;;  %v3302_v55 = vld [vmem:[%s4431_s24 + $0x4] sm:$0x1] }
 0x3e4   : > { %3370 = vst [vmem:[%s4431_s24 + $0x1a] sm:$0x1] %v3369_v42  ;;  %3373 = vst [vmem:[%s4431_s24 + $0x1b] sm:$0x1] %v3372_v31  ;;  %v4539_v32 = vrot.slane %v2915_v17, %v3933_v5  ;;  %v2944_v34 = vcombine.high %v4419_v18, %v4419_v18  ;;  %v4547_v35 = vcombine.high %v4423_v19, %v4423_v19  ;;  %v3305_v56 = vld [vmem:[%s4431_s24 + $0x5] sm:$0x1] }
 0x3e5   : > { %3376 = vst [vmem:[%s4431_s24 + $0x1c] sm:$0x1] %v3375_v62  ;;  %3379 = vst [vmem:[%s4431_s24 + $0x1d] sm:$0x1] %v3378_v9  ;;  %v2946_v38 = vcombine.high %v2936_v29, %v2936_v29  ;;  %v3098_v17 = vunpack.i.h.s16 %v2936_v29  ;;  %v3720_v41 = vpack.i.b16 %v4419_v18, %v4419_v18  ;;  %v3160_v52 = vpack.i.b16 %v3096_v11, %v3096_v11  ;;  %v3299_v18 = vld [vmem:[%s4431_s24 + $0x3] sm:$0x1] }
 0x3e6   : > { %3382 = vst [vmem:[%s4431_s24 + $0x1e] sm:$0x1] %v3381_v20  ;;  %3385 = vst [vmem:[%s4431_s24 + $0x1f] sm:$0x1] %v3384_v21  ;;  %v4553_v12 = vcombine.high %v4539_v32, %v4539_v32  ;;  %v3106_v39 = vunpack.i.h.s16 %v4539_v32  ;;  %v3100_v40 = vunpack.i.h.s16 %v2944_v34  ;;  %v3108_v22 = vunpack.i.h.s16 %v4547_v35  ;;  %v3314_v57 = vld [vmem:[%s4431_s24 + $0x8] sm:$0x1] }
 0x3e7   : > { %v3102_v43 = vunpack.i.h.s16 %v2946_v38  ;;  %v3721_v45 = vpack.i.b16 %v2936_v29, %v2936_v29  ;;  %v3162_v46 = vpack.i.b16 %v3098_v17, %v3098_v17  ;;  %v3722_v50 = vpack.i.b16 %v2944_v34, %v2944_v34  ;;  %v3308_v0 = vld [vmem:[%s4431_s24 + $0x6] sm:$0x1]  ;;  %v3311_v1 = vld [vmem:[%s4431_s24 + $0x7] sm:$0x1]  ;;  %v3320_v7 = vld [vmem:[%s4431_s24 + $0xa] sm:$0x1] }
 0x3e8   : > { %v3110_v44 = vunpack.i.h.s16 %v4553_v12  ;;  %v3164_v51 = vpack.i.b16 %v3100_v40, %v3100_v40  ;;  %v3723_v36 = vpack.i.b16 %v2946_v38, %v2946_v38  ;;  %v3724_v54 = vpack.i.b16 %v4423_v19, %v4423_v19  ;;  %v3317_v19 = vld [vmem:[%s4431_s24 + $0x9] sm:$0x1]  ;;  %v3323_v37 = vld [vmem:[%s4431_s24 + $0xb] sm:$0x1]  ;;  %v3326_v8 = vld [vmem:[%s4431_s24 + $0xc] sm:$0x1] }
 0x3e9   : > { %v3166_v58 = vpack.i.b16 %v3102_v43, %v3102_v43  ;;  %v3168_v59 = vpack.i.b16 %v3104_v53, %v3104_v53  ;;  %v3725_v60 = vpack.i.b16 %v4539_v32, %v4539_v32  ;;  %v3170_v63 = vpack.i.b16 %v3106_v39, %v3106_v39  ;;  %v3329_v16 = vld [vmem:[%s4431_s24 + $0xd] sm:$0x1]  ;;  %v3332_v24 = vld [vmem:[%s4431_s24 + $0xe] sm:$0x1]  ;;  %v3335_v25 = vld [vmem:[%s4431_s24 + $0xf] sm:$0x1] }
 0x3ea   : > { %v3726_v2 = vpack.i.b16 %v4547_v35, %v4547_v35  ;;  %v3172_v3 = vpack.i.b16 %v3108_v22, %v3108_v22  ;;  %v3727_v30 = vpack.i.b16 %v4553_v12, %v4553_v12  ;;  %v3174_v6 = vpack.i.b16 %v3110_v44, %v3110_v44 }
 0x3eb   : > { %v3291_v10 = vsel %vm4458_vm11, %v3720_v41, %v3290_v47  ;;  %v3294_v13 = vsel %vm4458_vm11, %v3160_v52, %v3293_v48  ;;  %v3297_v14 = vsel %vm4458_vm11, %v3721_v45, %v3296_v49  ;;  %v3300_v15 = vsel %vm4458_vm11, %v3162_v46, %v3299_v18 }
 0x3ec   : > { %3292 = vst [vmem:[%s4431_s24] sm:$0x1] %v3291_v10  ;;  %3295 = vst [vmem:[%s4431_s24 + $0x1] sm:$0x1] %v3294_v13  ;;  %v3303_v26 = vsel %vm4458_vm11, %v3722_v50, %v3302_v55  ;;  %v3306_v27 = vsel %vm4458_vm11, %v3164_v51, %v3305_v56  ;;  %v3309_v42 = vsel %vm4458_vm11, %v3723_v36, %v3308_v0 }
 0x3ed   : > { %3298 = vst [vmem:[%s4431_s24 + $0x2] sm:$0x1] %v3297_v14  ;;  %3301 = vst [vmem:[%s4431_s24 + $0x3] sm:$0x1] %v3300_v15  ;;  %v3312_v31 = vsel %vm4458_vm11, %v3166_v58, %v3311_v1  ;;  %v3315_v62 = vsel %vm4458_vm11, %v3724_v54, %v3314_v57  ;;  %v3318_v9 = vsel %vm4458_vm11, %v3168_v59, %v3317_v19  ;;  %v3443_v14 = vld [vmem:[%s4431_s24 + $0x33] sm:$0x1] }
 0x3ee   : > { %3304 = vst [vmem:[%s4431_s24 + $0x4] sm:$0x1] %v3303_v26  ;;  %3307 = vst [vmem:[%s4431_s24 + $0x5] sm:$0x1] %v3306_v27  ;;  %v3321_v20 = vsel %vm4458_vm11, %v3725_v60, %v3320_v7  ;;  %v3324_v21 = vsel %vm4458_vm11, %v3170_v63, %v3323_v37  ;;  %v3327_v29 = vsel %vm4458_vm11, %v3726_v2, %v3326_v8  ;;  %v3434_v63 = vld [vmem:[%s4431_s24 + $0x30] sm:$0x1] }
 0x3ef   : > { %3310 = vst [vmem:[%s4431_s24 + $0x6] sm:$0x1] %v3309_v42  ;;  %3313 = vst [vmem:[%s4431_s24 + $0x7] sm:$0x1] %v3312_v31  ;;  %v3330_v32 = vsel %vm4458_vm11, %v3172_v3, %v3329_v16  ;;  %v3333_v34 = vsel %vm4458_vm11, %v3727_v30, %v3332_v24  ;;  %v3336_v35 = vsel %vm4458_vm11, %v3174_v6, %v3335_v25  ;;  %v3437_v3 = vld [vmem:[%s4431_s24 + $0x31] sm:$0x1] }
 0x3f0   : > { %3316 = vst [vmem:[%s4431_s24 + $0x8] sm:$0x1] %v3315_v62  ;;  %3319 = vst [vmem:[%s4431_s24 + $0x9] sm:$0x1] %v3318_v9  ;;  %v2894_v11 = vpack.c.bf16 %v4446_v61, %v4425_v23  ;;  %v3719_v53 = vpack.c.bf16 %v4446_v61, %v4446_v61  ;;  %v2893_v38 = vpack.c.bf16 %v4452_v33, %v4441_v28  ;;  %v3440_v30 = vld [vmem:[%s4431_s24 + $0x32] sm:$0x1] }
 0x3f1   : > { %3322 = vst [vmem:[%s4431_s24 + $0xa] sm:$0x1] %v3321_v20  ;;  %3325 = vst [vmem:[%s4431_s24 + $0xb] sm:$0x1] %v3324_v21  ;;  %v3718_v12 = vpack.c.bf16 %v4452_v33, %v4452_v33  ;;  %v3446_v6 = vld [vmem:[%s4431_s24 + $0x34] sm:$0x1] }
 0x3f2   : > { %3328 = vst [vmem:[%s4431_s24 + $0xc] sm:$0x1] %v3327_v29  ;;  %3331 = vst [vmem:[%s4431_s24 + $0xd] sm:$0x1] %v3330_v32  ;;  %v3053_v17 = vrot.slane %v2894_v11, %v3933_v5  ;;  %v3060_v39 = vrot.slane %v3719_v53, %v3933_v5  ;;  %v4643_v40 = vrot.slane %v2893_v38, %v3933_v5  ;;  %v3458_v7 = vld [vmem:[%s4431_s24 + $0x38] sm:$0x1] }
 0x3f3   : > { %3334 = vst [vmem:[%s4431_s24 + $0xe] sm:$0x1] %v3333_v34  ;;  %3337 = vst [vmem:[%s4431_s24 + $0xf] sm:$0x1] %v3336_v35  ;;  %v4646_v22 = vrot.slane %v3718_v12, %v3933_v5  ;;  %v3449_v15 = vld [vmem:[%s4431_s24 + $0x35] sm:$0x1] }
 0x3f4   : > { %v3061_v23 = vcombine.high %v3053_v17, %v3053_v17  ;;  %v3062_v41 = vcombine.high %v3060_v39, %v3060_v39  ;;  %v3069_v61 = vrot.slane %v3053_v17, %v3933_v5  ;;  %v4650_v52 = vrot.slane %v3060_v39, %v3933_v5  ;;  %v3452_v16 = vld [vmem:[%s4431_s24 + $0x36] sm:$0x1]  ;;  %v3455_v42 = vld [vmem:[%s4431_s24 + $0x37] sm:$0x1]  ;;  %v3461_v31 = vld [vmem:[%s4431_s24 + $0x39] sm:$0x1] }
 0x3f5   : > { %v3012_v28 = vcombine.high %v4643_v40, %v4643_v40  ;;  %v3013_v33 = vcombine.high %v4646_v22, %v4646_v22  ;;  %v4658_v43 = vrot.slane %v4643_v40, %v3933_v5  ;;  %v4662_v44 = vrot.slane %v4646_v22, %v3933_v5  ;;  %v3464_v62 = vld [vmem:[%s4431_s24 + $0x3a] sm:$0x1]  ;;  %v3467_v32 = vld [vmem:[%s4431_s24 + $0x3b] sm:$0x1]  ;;  %v3470_v34 = vld [vmem:[%s4431_s24 + $0x3c] sm:$0x1] }
 0x3f6   : > { %v3083_v45 = vrot.slane %v3061_v23, %v3933_v5  ;;  %v4666_v46 = vrot.slane %v3062_v41, %v3933_v5  ;;  %v3091_v47 = vcombine.high %v3069_v61, %v3069_v61  ;;  %v4670_v48 = vcombine.high %v4650_v52, %v4650_v52  ;;  %v3473_v35 = vld [vmem:[%s4431_s24 + $0x3d] sm:$0x1]  ;;  %v3476_v17 = vld [vmem:[%s4431_s24 + $0x3e] sm:$0x1]  ;;  %v3479_v39 = vld [vmem:[%s4431_s24 + $0x3f] sm:$0x1] }
 0x3f7   : > { %v3144_v49 = vunpack.i.h.s16 %v3069_v61  ;;  %v3152_v50 = vunpack.i.h.s16 %v4650_v52  ;;  %v3744_v51 = vpack.i.b16 %v3069_v61, %v3069_v61  ;;  %v3748_v36 = vpack.i.b16 %v4650_v52, %v4650_v52 }
 0x3f8   : > { %v3093_v54 = vcombine.high %v3083_v45, %v3083_v45  ;;  %v4677_v18 = vcombine.high %v4666_v46, %v4666_v46  ;;  %v3146_v55 = vunpack.i.h.s16 %v3083_v45  ;;  %v3148_v56 = vunpack.i.h.s16 %v3091_v47 }
 0x3f9   : > { %v3154_v57 = vunpack.i.h.s16 %v4666_v46  ;;  %v3156_v58 = vunpack.i.h.s16 %v4670_v48  ;;  %v3208_v59 = vpack.i.b16 %v3144_v49, %v3144_v49  ;;  %v3745_v60 = vpack.i.b16 %v3083_v45, %v3083_v45 }
 0x3fa   : > { %v3150_v0 = vunpack.i.h.s16 %v3093_v54  ;;  %v3158_v1 = vunpack.i.h.s16 %v4677_v18  ;;  %v3210_v19 = vpack.i.b16 %v3146_v55, %v3146_v55  ;;  %v3746_v2 = vpack.i.b16 %v3091_v47, %v3091_v47 }
 0x3fb   : > { %v3212_v37 = vpack.i.b16 %v3148_v56, %v3148_v56  ;;  %v3747_v8 = vpack.i.b16 %v3093_v54, %v3093_v54  ;;  %v3216_v10 = vpack.i.b16 %v3152_v50, %v3152_v50  ;;  %v3749_v13 = vpack.i.b16 %v4666_v46, %v4666_v46 }
 0x3fc   : > { %v3214_v24 = vpack.i.b16 %v3150_v0, %v3150_v0  ;;  %v3218_v25 = vpack.i.b16 %v3154_v57, %v3154_v57  ;;  %v3750_v26 = vpack.i.b16 %v4670_v48, %v4670_v48  ;;  %v3220_v27 = vpack.i.b16 %v3156_v58, %v3156_v58 }
 0x3fd   : > { %v3751_v9 = vpack.i.b16 %v4677_v18, %v4677_v18  ;;  %v3222_v20 = vpack.i.b16 %v3158_v1, %v3158_v1  ;;  %v3435_v21 = vsel %vm4458_vm11, %v3744_v51, %v3434_v63  ;;  %v3438_v29 = vsel %vm4458_vm11, %v3208_v59, %v3437_v3  ;;  %v3392_v3 = vld [vmem:[%s4431_s24 + $0x22] sm:$0x1] }
 0x3fe   : > { %3436 = vst [vmem:[%s4431_s24 + $0x30] sm:$0x1] %v3435_v21  ;;  %3439 = vst [vmem:[%s4431_s24 + $0x31] sm:$0x1] %v3438_v29  ;;  %v3441_v11 = vsel %vm4458_vm11, %v3745_v60, %v3440_v30  ;;  %v3444_v53 = vsel %vm4458_vm11, %v3210_v19, %v3443_v14  ;;  %v3447_v38 = vsel %vm4458_vm11, %v3746_v2, %v3446_v6  ;;  %v3128_v40 = vunpack.i.h.s16 %v4658_v43  ;;  %v3386_v19 = vld [vmem:[%s4431_s24 + $0x20] sm:$0x1] }
 0x3ff   : > { %v3450_v12 = vsel %vm4458_vm11, %v3212_v37, %v3449_v15  ;;  %3442 = vst [vmem:[%s4431_s24 + $0x32] sm:$0x1] %v3441_v11  ;;  %3445 = vst [vmem:[%s4431_s24 + $0x33] sm:$0x1] %v3444_v53  ;;  %v3453_v23 = vsel %vm4458_vm11, %v3747_v8, %v3452_v16  ;;  %v3456_v41 = vsel %vm4458_vm11, %v3214_v24, %v3455_v42  ;;  %v3389_v2 = vld [vmem:[%s4431_s24 + $0x21] sm:$0x1] }
 0x400   : > { %3448 = vst [vmem:[%s4431_s24 + $0x34] sm:$0x1] %v3447_v38  ;;  %3451 = vst [vmem:[%s4431_s24 + $0x35] sm:$0x1] %v3450_v12  ;;  %v3459_v61 = vsel %vm4458_vm11, %v3748_v36, %v3458_v7  ;;  %v3462_v52 = vsel %vm4458_vm11, %v3216_v10, %v3461_v31  ;;  %v3465_v45 = vsel %vm4458_vm11, %v3749_v13, %v3464_v62  ;;  %v3398_v8 = vld [vmem:[%s4431_s24 + $0x24] sm:$0x1] }
 0x401   : > { %3454 = vst [vmem:[%s4431_s24 + $0x36] sm:$0x1] %v3453_v23  ;;  %3457 = vst [vmem:[%s4431_s24 + $0x37] sm:$0x1] %v3456_v41  ;;  %v3468_v46 = vsel %vm4458_vm11, %v3218_v25, %v3467_v32  ;;  %v3471_v47 = vsel %vm4458_vm11, %v3750_v26, %v3470_v34  ;;  %v3474_v48 = vsel %vm4458_vm11, %v3220_v27, %v3473_v35  ;;  %v3401_v10 = vld [vmem:[%s4431_s24 + $0x25] sm:$0x1] }
 0x402   : > { %3460 = vst [vmem:[%s4431_s24 + $0x38] sm:$0x1] %v3459_v61  ;;  %3463 = vst [vmem:[%s4431_s24 + $0x39] sm:$0x1] %v3462_v52  ;;  %v3477_v49 = vsel %vm4458_vm11, %v3751_v9, %v3476_v17  ;;  %v3480_v50 = vsel %vm4458_vm11, %v3222_v20, %v3479_v39  ;;  %v3034_v51 = vrot.slane %v3012_v28, %v3933_v5  ;;  %v3136_v28 = vunpack.i.h.s16 %v4662_v44  ;;  %v3410_v13 = vld [vmem:[%s4431_s24 + $0x28] sm:$0x1] }
 0x403   : > { %3466 = vst [vmem:[%s4431_s24 + $0x3a] sm:$0x1] %v3465_v45  ;;  %3469 = vst [vmem:[%s4431_s24 + $0x3b] sm:$0x1] %v3468_v46  ;;  %v4758_v36 = vrot.slane %v3013_v33, %v3933_v5  ;;  %v3042_v54 = vcombine.high %v4658_v43, %v4658_v43  ;;  %v4766_v18 = vcombine.high %v4662_v44, %v4662_v44  ;;  %v3404_v25 = vld [vmem:[%s4431_s24 + $0x26] sm:$0x1] }
 0x404   : > { %3472 = vst [vmem:[%s4431_s24 + $0x3c] sm:$0x1] %v3471_v47  ;;  %3475 = vst [vmem:[%s4431_s24 + $0x3d] sm:$0x1] %v3474_v48  ;;  %v3044_v55 = vcombine.high %v3034_v51, %v3034_v51  ;;  %v3130_v22 = vunpack.i.h.s16 %v3034_v51  ;;  %v3736_v58 = vpack.i.b16 %v4658_v43, %v4658_v43  ;;  %v3192_v59 = vpack.i.b16 %v3128_v40, %v3128_v40  ;;  %v3395_v43 = vld [vmem:[%s4431_s24 + $0x23] sm:$0x1] }
 0x405   : > { %3478 = vst [vmem:[%s4431_s24 + $0x3e] sm:$0x1] %v3477_v49  ;;  %3481 = vst [vmem:[%s4431_s24 + $0x3f] sm:$0x1] %v3480_v50  ;;  %v4772_v5 = vcombine.high %v4758_v36, %v4758_v36  ;;  %v3138_v33 = vunpack.i.h.s16 %v4758_v36  ;;  %v3132_v56 = vunpack.i.h.s16 %v3042_v54  ;;  %v3140_v57 = vunpack.i.h.s16 %v4766_v18  ;;  %v3407_v26 = vld [vmem:[%s4431_s24 + $0x27] sm:$0x1] }
 0x406   : > { %v3134_v60 = vunpack.i.h.s16 %v3044_v55  ;;  %v3737_v0 = vpack.i.b16 %v3034_v51, %v3034_v51  ;;  %v3194_v1 = vpack.i.b16 %v3130_v22, %v3130_v22  ;;  %v3738_v30 = vpack.i.b16 %v3042_v54, %v3042_v54  ;;  %v3416_v9 = vld [vmem:[%s4431_s24 + $0x2a] sm:$0x1]  ;;  %v3419_v20 = vld [vmem:[%s4431_s24 + $0x2b] sm:$0x1]  ;;  %v3422_v21 = vld [vmem:[%s4431_s24 + $0x2c] sm:$0x1] }
 0x407   : > { %v3142_v63 = vunpack.i.h.s16 %v4772_v5  ;;  %v3196_v6 = vpack.i.b16 %v3132_v56, %v3132_v56  ;;  %v3739_v7 = vpack.i.b16 %v3044_v55, %v3044_v55  ;;  %v3740_v37 = vpack.i.b16 %v4662_v44, %v4662_v44  ;;  %v3413_v44 = vld [vmem:[%s4431_s24 + $0x29] sm:$0x1]  ;;  %v3425_v11 = vld [vmem:[%s4431_s24 + $0x2d] sm:$0x1]  ;;  %v3428_v53 = vld [vmem:[%s4431_s24 + $0x2e] sm:$0x1] }
 0x408   : > { %v3198_v14 = vpack.i.b16 %v3134_v60, %v3134_v60  ;;  %v3200_v15 = vpack.i.b16 %v3136_v28, %v3136_v28  ;;  %v3741_v16 = vpack.i.b16 %v4758_v36, %v4758_v36  ;;  %v3202_v24 = vpack.i.b16 %v3138_v33, %v3138_v33  ;;  %v3431_v38 = vld [vmem:[%s4431_s24 + $0x2f] sm:$0x1] }
 0x409   : > { %v3742_v27 = vpack.i.b16 %v4766_v18, %v4766_v18  ;;  %v3204_v42 = vpack.i.b16 %v3140_v57, %v3140_v57  ;;  %v3743_v31 = vpack.i.b16 %v4772_v5, %v4772_v5  ;;  %v3206_v62 = vpack.i.b16 %v3142_v63, %v3142_v63 }
 0x40a   : > { %v3387_v29 = vsel %vm4458_vm11, %v3736_v58, %v3386_v19  ;;  %v3390_v32 = vsel %vm4458_vm11, %v3192_v59, %v3389_v2  ;;  %v3393_v34 = vsel %vm4458_vm11, %v3737_v0, %v3392_v3  ;;  %v3396_v35 = vsel %vm4458_vm11, %v3194_v1, %v3395_v43 }
 0x40b   : > { %3388 = vst [vmem:[%s4431_s24 + $0x20] sm:$0x1] %v3387_v29  ;;  %3391 = vst [vmem:[%s4431_s24 + $0x21] sm:$0x1] %v3390_v32  ;;  %v3399_v12 = vsel %vm4458_vm11, %v3738_v30, %v3398_v8  ;;  %v3402_v17 = vsel %vm4458_vm11, %v3196_v6, %v3401_v10  ;;  %v3405_v39 = vsel %vm4458_vm11, %v3739_v7, %v3404_v25 }
 0x40c   : > { %3394 = vst [vmem:[%s4431_s24 + $0x22] sm:$0x1] %v3393_v34  ;;  %3397 = vst [vmem:[%s4431_s24 + $0x23] sm:$0x1] %v3396_v35  ;;  %v3408_v23 = vsel %vm4458_vm11, %v3198_v14, %v3407_v26  ;;  %v3411_v41 = vsel %vm4458_vm11, %v3740_v37, %v3410_v13  ;;  %v3414_v61 = vsel %vm4458_vm11, %v3200_v15, %v3413_v44 }
 0x40d   : > { %3400 = vst [vmem:[%s4431_s24 + $0x24] sm:$0x1] %v3399_v12  ;;  %3403 = vst [vmem:[%s4431_s24 + $0x25] sm:$0x1] %v3402_v17  ;;  %v3417_v52 = vsel %vm4458_vm11, %v3741_v16, %v3416_v9  ;;  %v3420_v45 = vsel %vm4458_vm11, %v3202_v24, %v3419_v20  ;;  %v3423_v46 = vsel %vm4458_vm11, %v3742_v27, %v3422_v21 }
 0x40e   : > { %3406 = vst [vmem:[%s4431_s24 + $0x26] sm:$0x1] %v3405_v39  ;;  %3409 = vst [vmem:[%s4431_s24 + $0x27] sm:$0x1] %v3408_v23  ;;  %v3426_v47 = vsel %vm4458_vm11, %v3204_v42, %v3425_v11  ;;  %v3429_v48 = vsel %vm4458_vm11, %v3743_v31, %v3428_v53  ;;  %v3432_v49 = vsel %vm4458_vm11, %v3206_v62, %v3431_v38 }
 0x40f   : > { %3412 = vst [vmem:[%s4431_s24 + $0x28] sm:$0x1] %v3411_v41  ;;  %3415 = vst [vmem:[%s4431_s24 + $0x29] sm:$0x1] %v3414_v61 }
 0x410   : > { %3418 = vst [vmem:[%s4431_s24 + $0x2a] sm:$0x1] %v3417_v52  ;;  %3421 = vst [vmem:[%s4431_s24 + $0x2b] sm:$0x1] %v3420_v45 }
 0x411   : > { %3424 = vst [vmem:[%s4431_s24 + $0x2c] sm:$0x1] %v3423_v46  ;;  %3427 = vst [vmem:[%s4431_s24 + $0x2d] sm:$0x1] %v3426_v47 }
 0x412   : > { %3430 = vst [vmem:[%s4431_s24 + $0x2e] sm:$0x1] %v3429_v48  ;;  %3433 = vst [vmem:[%s4431_s24 + $0x2f] sm:$0x1] %v3432_v49 }
 0x413 PF: > { %s12_s11 = sadd.s32 1, %s3887_s11   ;;  %s4865_s9 = smov %s3883_s10 }
 0x414   : > { %p9_p5 = scmp.ge.s32.totalorder %s12_s11, 4   ;;  %s4866_s10 = smov %s4868_s12 }
 0x416   :  { %11 = sbr.rel (!%p9_p5) target bundleno = 2 (0x2), region = 61 }

</bundles_post_ra>
